<compile_context>
chip_gen: v7x
topology: tpu7x:2x2x1
jax: 0.10.0
libtpu: 0.0.40
codegen_flags: <defaults>
</compile_context>

<pallas_src>
import jax
import jax.numpy as jnp
from jax.experimental import pallas as pl
from jax.experimental.pallas import tpu as pltpu

HIDDEN = 1024


def _round_up(x, m):
    return ((x + m - 1) // m) * m


def _cdiv(a, b):
    return -(-a // b)


def _vmem_cap_bytes():
    """Physical VMEM of the current chip, with headroom for compiler scratch."""
    try:
        cap = int(pltpu.get_tpu_info().vmem_capacity_bytes)
    except Exception:
        cap = 64 << 20  # conservative (v7x-sized) fallback
    # 75% of physical, never above 96 MiB (v5e/v6e), never below 48 MiB.
    return max(48 << 20, min(int(cap * 0.75), 96 << 20))


def _vmem_estimate(F, tile_b, bpe):
    """Rough per-core VMEM footprint for the chosen tile size."""
    weights = (F * HIDDEN + HIDDEN * HIDDEN) * bpe + 3 * HIDDEN * 4  # W1,W2,b1,b2,w3t
    x_tiles = 2 * tile_b * F * bpe          # double-buffered input tile
    out_tiles = 2 * tile_b * 128 * 4        # lane-padded output tile
    acts = 3 * tile_b * HIDDEN * 4          # h1, h2, matmul temporaries (f32)
    return weights + x_tiles + out_tiles + acts


def adv_net_kernel(x_ref, w1_ref, b1_ref, w2_ref, b2_ref, w3t_ref, b3_ref, o_ref):
    # GRL: identity in the forward pass.

    # Layer 1: Linear(in_feature, 1024) + ReLU  (MXU matmul, f32 accumulate)
    h1 = jnp.dot(x_ref[...], w1_ref[...], preferred_element_type=jnp.float32)
    h1 = jnp.maximum(h1 + b1_ref[...], 0.0)
    # Dropout(0.5) -> identity in eval mode.

    # Layer 2: Linear(1024, 1024) + ReLU
    h2 = jnp.dot(h1.astype(w2_ref.dtype), w2_ref[...],
                 preferred_element_type=jnp.float32)
    h2 = jnp.maximum(h2 + b2_ref[...], 0.0)
    # Dropout(0.5) -> identity in eval mode.

    # Layer 3: Linear(1024, 1) + Sigmoid.
    # N=1 output column would waste a full MXU pass; do it as a lane-wise
    # multiply (VPU) + cross-lane reduce (XLU) instead. W3 arrives transposed
    # as (1, HIDDEN); b3 is an SMEM scalar.
    logit = jnp.sum(h2 * w3t_ref[...], axis=-1, keepdims=True) + b3_ref[0, 0]
    o_ref[...] = jax.nn.sigmoid(logit)


def adversarial_network_forward(x, w1, b1, w2, b2, w3, b3, *,
                                tile_b=512, use_bf16=True):
    """Run the AdversarialNetwork forward pass.

    x:  [B, F] float32
    w1: [F, 1024], b1: [1, 1024]
    w2: [1024, 1024], b2: [1, 1024]
    w3: [1024, 1] (or already-transposed [1, 1024]), b3: [1, 1]
    """
    B, F = x.shape
    assert w1.shape == (F, HIDDEN)

    # Present W3 lane-dense as (1, HIDDEN) for the in-kernel reduction.
    w3t = w3.reshape(1, HIDDEN) if w3.shape == (HIDDEN, 1) else w3
    assert w3t.shape == (1, HIDDEN)
    b3 = b3.reshape(1, 1).astype(jnp.float32)

    if use_bf16:
        # Matmul inputs in bf16 (native MXU rate, half the weight DMA);
        # accumulation stays f32 inside the kernel.
        x = x.astype(jnp.bfloat16)
        w1 = w1.astype(jnp.bfloat16)
        w2 = w2.astype(jnp.bfloat16)
    bpe = 2 if use_bf16 else 4

    # ---- Tile selection -------------------------------------------------
    # 1) Shrink the max tile until the footprint fits the per-core VMEM cap.
    cap = _vmem_cap_bytes()
    tile_max = max(8, min(tile_b, _round_up(B, 8)))
    while tile_max > 8 and _vmem_estimate(F, tile_max, bpe) > int(cap * 0.85):
        tile_max = max(8, tile_max // 2)
    # 2) Balance tiles to minimize dead padded rows, and guarantee >= 2 grid
    #    steps when B >= 16 so both v7x TensorCores get work.
    num_tiles = _cdiv(B, tile_max)
    if num_tiles < 2 and B >= 16:
        num_tiles = 2
    tile_b = _round_up(_cdiv(B, num_tiles), 8)
    Bp = tile_b * num_tiles
    if Bp != B:
        x = jnp.pad(x, ((0, Bp - B), (0, 0)))
    grid = (num_tiles,)

    vmem_limit = int(min(cap, max(2 * _vmem_estimate(F, tile_b, bpe), 48 << 20)))

    resident = dict(pipeline_mode=pl.Buffered(1))  # constant across the grid

    out = pl.pallas_call(
        adv_net_kernel,
        out_shape=jax.ShapeDtypeStruct((Bp, 1), jnp.float32),
        grid_spec=pltpu.PrefetchScalarGridSpec(
            num_scalar_prefetch=0,
            grid=grid,
            in_specs=[
                pl.BlockSpec((tile_b, F), lambda i: (i, 0)),                   # x tile
                pl.BlockSpec((F, HIDDEN), lambda i: (0, 0), **resident),       # W1
                pl.BlockSpec((1, HIDDEN), lambda i: (0, 0), **resident),       # b1
                pl.BlockSpec((HIDDEN, HIDDEN), lambda i: (0, 0), **resident),  # W2
                pl.BlockSpec((1, HIDDEN), lambda i: (0, 0), **resident),       # b2
                pl.BlockSpec((1, HIDDEN), lambda i: (0, 0), **resident),       # W3^T
                pl.BlockSpec(memory_space=pltpu.MemorySpace.SMEM),             # b3 scalar
            ],
            out_specs=pl.BlockSpec((tile_b, 1), lambda i: (i, 0)),
        ),
        compiler_params=pltpu.CompilerParams(
            dimension_semantics=("parallel",),
            vmem_limit_bytes=vmem_limit,
        ),
    )(x, w1, b1, w2, b2, w3t, b3)

    return out[:B]


def init_params(key, in_feature):
    # Deterministic synthetic init (PyTorch default is kaiming-uniform; exact
    # distribution is irrelevant for kernel semantics, so use scaled uniform).
    k1, k2, k3, k4, k5, k6 = jax.random.split(key, 6)

    def lin(kw, kb, fan_in, fan_out):
        bound = 1.0 / jnp.sqrt(fan_in)
        w = jax.random.uniform(kw, (fan_in, fan_out), jnp.float32, -bound, bound)
        b = jax.random.uniform(kb, (1, fan_out), jnp.float32, -bound, bound)
        return w, b

    w1, b1 = lin(k1, k2, in_feature, HIDDEN)
    w2, b2 = lin(k3, k4, HIDDEN, HIDDEN)
    w3, b3 = lin(k5, k6, HIDDEN, 1)
    return w1, b1, w2, b2, w3, b3


def reference_forward(x, w1, b1, w2, b2, w3, b3, *, use_bf16=True):
    """Pure-JAX reference with the same precision choices as the kernel."""
    if use_bf16:
        x = x.astype(jnp.bfloat16)
        w1 = w1.astype(jnp.bfloat16)
        w2 = w2.astype(jnp.bfloat16)
    h1 = jnp.maximum(
        jnp.dot(x, w1, preferred_element_type=jnp.float32) + b1, 0.0)
    h2 = jnp.maximum(
        jnp.dot(h1.astype(w2.dtype), w2, preferred_element_type=jnp.float32) + b2, 0.0)
    logit = jnp.dot(h2, w3.astype(jnp.float32),
                    preferred_element_type=jnp.float32) + b3
    return jax.nn.sigmoid(logit)


if __name__ == "__main__":
    key = jax.random.PRNGKey(0)
    kx, kp = jax.random.split(key)

    batch = 20          # intentionally not a multiple of 8 to exercise padding
    in_feature = 256
    x = jax.random.normal(kx, (batch, in_feature), jnp.float32)

    params = init_params(kp, in_feature)

    # Default (bf16 matmul) path vs. matching-precision reference.
    y = adversarial_network_forward(x, *params)
    y = jax.block_until_ready(y)
    y_ref = reference_forward(x, *params, use_bf16=True)
    assert y.shape == (batch, 1)
    assert jnp.allclose(y, y_ref, atol=2e-3, rtol=2e-3)

    # f32 path vs. f32 reference (tight tolerance).
    y32 = adversarial_network_forward(x, *params, use_bf16=False)
    y32 = jax.block_until_ready(y32)
    y32_ref = reference_forward(x, *params, use_bf16=False)
    assert jnp.allclose(y32, y32_ref, atol=1e-4, rtol=1e-4)

    print("KERNEL_OK")
</pallas_src>

<mosaic_0001>
module attributes {stable_mosaic.version = 11 : i64} {
  func.func @adv_net_kernel(%arg0: i32, %arg1: memref<16x256xbf16, #tpu.memory_space<vmem>>, %arg2: memref<256x1024xbf16, #tpu.memory_space<vmem>>, %arg3: memref<1x1024xf32, #tpu.memory_space<vmem>>, %arg4: memref<1024x1024xbf16, #tpu.memory_space<vmem>>, %arg5: memref<1x1024xf32, #tpu.memory_space<vmem>>, %arg6: memref<1x1024xf32, #tpu.memory_space<vmem>>, %arg7: memref<1x1xf32, #tpu.memory_space<smem>>, %arg8: memref<16x1xf32, #tpu.memory_space<vmem>>) attributes {dimension_semantics = [#tpu.dimension_semantics<parallel>], iteration_bounds = array<i64: 2>, scalar_prefetch = 0 : i64, scratch_operands = 0 : i64, tpu.core_type = #tpu.core_type<tc>, window_params = [{transform_indices = @transform_0, window_bounds = array<i64: 16, 256>}, {pipeline_mode = #tpu.pipeline_mode<synchronous>, transform_indices = @transform_1, window_bounds = array<i64: 256, 1024>}, {pipeline_mode = #tpu.pipeline_mode<synchronous>, transform_indices = @transform_2, window_bounds = array<i64: 1, 1024>}, {pipeline_mode = #tpu.pipeline_mode<synchronous>, transform_indices = @transform_3, window_bounds = array<i64: 1024, 1024>}, {pipeline_mode = #tpu.pipeline_mode<synchronous>, transform_indices = @transform_4, window_bounds = array<i64: 1, 1024>}, {pipeline_mode = #tpu.pipeline_mode<synchronous>, transform_indices = @transform_5, window_bounds = array<i64: 1, 1024>}, {transform_indices = @transform_6, window_bounds = array<i64: 1, 1>}, {transform_indices = @transform_7, window_bounds = array<i64: 16, 1>}]} {
    %c0 = arith.constant 0 : index
    %c0_0 = arith.constant 0 : index
    %0 = vector.load %arg1[%c0, %c0_0] : memref<16x256xbf16, #tpu.memory_space<vmem>>, vector<16x256xbf16>
    %c0_1 = arith.constant 0 : index
    %c0_2 = arith.constant 0 : index
    %1 = vector.load %arg2[%c0_1, %c0_2] : memref<256x1024xbf16, #tpu.memory_space<vmem>>, vector<256x1024xbf16>
    %cst = arith.constant dense<0.000000e+00> : vector<16x1024xf32>
    %2 = tpu.matmul %0, %1, %cst {dimension_numbers = #tpu.dot_dimension_numbers<[1], [0], [0], [1], [0, 0, 1, 1], [], []>} : vector<16x256xbf16>, vector<256x1024xbf16>, vector<16x1024xf32> -> vector<16x1024xf32>
    %c0_3 = arith.constant 0 : index
    %c0_4 = arith.constant 0 : index
    %3 = vector.load %arg3[%c0_3, %c0_4] : memref<1x1024xf32, #tpu.memory_space<vmem>>, vector<1x1024xf32>
    %4 = vector.broadcast %3 : vector<1x1024xf32> to vector<16x1024xf32>
    %5 = arith.addf %2, %4 : vector<16x1024xf32>
    %cst_5 = arith.constant 0.000000e+00 : f32
    %6 = vector.broadcast %cst_5 : f32 to vector<16x1024xf32>
    %7 = arith.maximumf %5, %6 : vector<16x1024xf32>
    %8 = arith.truncf %7 : vector<16x1024xf32> to vector<16x1024xbf16>
    %c0_6 = arith.constant 0 : index
    %c0_7 = arith.constant 0 : index
    %9 = vector.load %arg4[%c0_6, %c0_7] : memref<1024x1024xbf16, #tpu.memory_space<vmem>>, vector<1024x1024xbf16>
    %cst_8 = arith.constant dense<0.000000e+00> : vector<16x1024xf32>
    %10 = tpu.matmul %8, %9, %cst_8 {dimension_numbers = #tpu.dot_dimension_numbers<[1], [0], [0], [1], [0, 0, 1, 1], [], []>} : vector<16x1024xbf16>, vector<1024x1024xbf16>, vector<16x1024xf32> -> vector<16x1024xf32>
    %c0_9 = arith.constant 0 : index
    %c0_10 = arith.constant 0 : index
    %11 = vector.load %arg5[%c0_9, %c0_10] : memref<1x1024xf32, #tpu.memory_space<vmem>>, vector<1x1024xf32>
    %12 = vector.broadcast %11 : vector<1x1024xf32> to vector<16x1024xf32>
    %13 = arith.addf %10, %12 : vector<16x1024xf32>
    %cst_11 = arith.constant 0.000000e+00 : f32
    %14 = vector.broadcast %cst_11 : f32 to vector<16x1024xf32>
    %15 = arith.maximumf %13, %14 : vector<16x1024xf32>
    %c0_12 = arith.constant 0 : index
    %c0_13 = arith.constant 0 : index
    %16 = vector.load %arg6[%c0_12, %c0_13] : memref<1x1024xf32, #tpu.memory_space<vmem>>, vector<1x1024xf32>
    %17 = vector.broadcast %16 : vector<1x1024xf32> to vector<16x1024xf32>
    %18 = arith.mulf %15, %17 : vector<16x1024xf32>
    %cst_14 = arith.constant dense<0.000000e+00> : vector<16xf32>
    %19 = vector.multi_reduction <add>, %18, %cst_14 [1] : vector<16x1024xf32> to vector<16xf32>
    %20 = vector.shape_cast %19 : vector<16xf32> to vector<16x1xf32>
    %c0_15 = arith.constant 0 : index
    %c0_16 = arith.constant 0 : index
    %21 = memref.load %arg7[%c0_15, %c0_16] : memref<1x1xf32, #tpu.memory_space<smem>>
    %22 = vector.broadcast %21 : f32 to vector<16x1xf32>
    %23 = arith.addf %20, %22 : vector<16x1xf32>
    %24 = arith.negf %23 : vector<16x1xf32>
    %25 = math.exp %24 : vector<16x1xf32>
    %cst_17 = arith.constant 1.000000e+00 : f32
    %26 = vector.broadcast %cst_17 : f32 to vector<16x1xf32>
    %27 = arith.addf %26, %25 : vector<16x1xf32>
    %28 = arith.divf %26, %27 : vector<16x1xf32>
    %c0_18 = arith.constant 0 : index
    %c0_19 = arith.constant 0 : index
    %29 = vector.load %arg8[%c0_18, %c0_19] : memref<16x1xf32, #tpu.memory_space<vmem>>, vector<16x1xf32>
    tpu.vector_store %arg8[%c0_18, %c0_19], %28 {strides = array<i32>} : memref<16x1xf32, #tpu.memory_space<vmem>>, vector<16x1xf32>,
    return
  }
  func.func @transform_0(%arg0: i32) -> (i32, i32) {
    %c0_i32 = arith.constant 0 : i32
    %c0_i32_0 = arith.constant 0 : i32
    return %arg0, %c0_i32 : i32, i32
  }
  func.func @transform_1(%arg0: i32) -> (i32, i32) {
    %c0_i32 = arith.constant 0 : i32
    %c0_i32_0 = arith.constant 0 : i32
    %c0_i32_1 = arith.constant 0 : i32
    return %c0_i32, %c0_i32_0 : i32, i32
  }
  func.func @transform_2(%arg0: i32) -> (i32, i32) {
    %c0_i32 = arith.constant 0 : i32
    %c0_i32_0 = arith.constant 0 : i32
    %c0_i32_1 = arith.constant 0 : i32
    return %c0_i32, %c0_i32_0 : i32, i32
  }
  func.func @transform_3(%arg0: i32) -> (i32, i32) {
    %c0_i32 = arith.constant 0 : i32
    %c0_i32_0 = arith.constant 0 : i32
    %c0_i32_1 = arith.constant 0 : i32
    return %c0_i32, %c0_i32_0 : i32, i32
  }
  func.func @transform_4(%arg0: i32) -> (i32, i32) {
    %c0_i32 = arith.constant 0 : i32
    %c0_i32_0 = arith.constant 0 : i32
    %c0_i32_1 = arith.constant 0 : i32
    return %c0_i32, %c0_i32_0 : i32, i32
  }
  func.func @transform_5(%arg0: i32) -> (i32, i32) {
    %c0_i32 = arith.constant 0 : i32
    %c0_i32_0 = arith.constant 0 : i32
    %c0_i32_1 = arith.constant 0 : i32
    return %c0_i32, %c0_i32_0 : i32, i32
  }
  func.func @transform_6(%arg0: i32) -> (i32, i32) {
    %c0_i32 = arith.constant 0 : i32
    %c0_i32_0 = arith.constant 0 : i32
    %c0_i32_1 = arith.constant 0 : i32
    return %c0_i32, %c0_i32_0 : i32, i32
  }
  func.func @transform_7(%arg0: i32) -> (i32, i32) {
    %c0_i32 = arith.constant 0 : i32
    %c0_i32_0 = arith.constant 0 : i32
    return %arg0, %c0_i32 : i32, i32
  }
}

</mosaic_0001>

<bundles_post_ra>
// kernel: tpu_custom_call.1
= control target key start
LH: loop header
LB: loop body
LE: loop exit
PB: predicated region body
PF: predicated region fallthrough
CT: control target
= control target key end

     0   :  { %s6974_s0 = inlined_call_operand.hbm [shape: bf16[32,256], index: 0, kind: input, shape index: {}]   ;;  %s6975_s1 = inlined_call_operand.hbm [shape: bf16[256,1024], index: 1, kind: input, shape index: {}]   ;;  %s6976_s2 = inlined_call_operand.hbm [shape: f32[1,1024], index: 2, kind: input, shape index: {}]   ;;  %s6977_s3 = inlined_call_operand.hbm [shape: bf16[1024,1024], index: 3, kind: input, shape index: {}]   ;;  %s6978_s4 = inlined_call_operand.hbm [shape: f32[1,1024], index: 4, kind: input, shape index: {}]   ;;  %s6979_s5 = inlined_call_operand.hbm [shape: f32[1,1024], index: 5, kind: input, shape index: {}]   ;;  %s6980_s6 = inlined_call_operand.<no memory space> [shape: f32[1,1], index: 6, kind: input, shape index: {}]   ;;  %s6981_s7 = inlined_call_operand.vmem [shape: f32[32,1], index: 7, kind: output, shape index: {}]  }
   0x1   :  { %12 = sst [smem:[#allocation2]] %s6980_s6 }
   0x2   :  { %13 = vsyncpa [#allocation4], 0 }
   0x3   :  { %15 = vsyncpa [#allocation4 + $0x1], 0 }
   0x4   :  { %16 = vsyncpa [#allocation6], 0 }
   0x5   :  { %17 = vsyncpa [#allocation9], 0 }
   0x6   :  { %18 = vsyncpa [#allocation12], 0  ;;  %s6526_s26 = smov 0   ;;  %s6528_s27 = smov 0  }
   0x7   :  { %s6530_s28 = smov 0   ;;  %s6532_s29 = smov 0  }
   0x8 LB: > { %s6473_s6 = smov [#allocation5]   ;;  %s5416_s8 = sadd.s32 4294967295, %s6471_s29   ;;  %s6471_s29 = sphi %s6532_s29, %s6997_s29   ;;  %s6467_s28 = sphi %s6530_s28, %s6996_s28   ;;  %s6463_s27 = sphi %s6528_s27, %s6995_s27   ;;  %s6459_s26 = sphi %s6526_s26, %s6994_s26  }
   0x9   : > { %s219_s30 = sshll.u32 %s6473_s6, 4  ;;  %p5418_p0 = scmp.ge.s32.totalorder %s6471_s29, 1  ;;  %s6555_s30 = int_to_ptr.vmem [resolvable:$true] %s219_s30 }
   0xa   : > { %p6550_p1 = scmp.eq.s32.totalorder %s5416_s8, 0  ;;  %p207_p2 = scmp.lt.s32.totalorder %s6471_s29, 3 }
   0xb   : > { %s6474_s11 = smov [#allocation8]   ;;  %s6475_s14 = smov [#allocation7]  }
   0xc   : > { %s6985_s9 = scalar_select %p6550_p1, 1, 0 }
   0xd   : > { %p6557_p3 = pnand %p5418_p0, %p207_p2  ;;  %s243_s12 = sshll.u32 %s6474_s11, 4  ;;  %s6569_s12 = int_to_ptr.vmem [resolvable:$true] %s243_s12 }
   0xe   : > { %s233_s15 = sshll.u32 %s6475_s14, 4  ;;  %s6255_s18 = scalar_lea.hbm %s6975_s1, 16384  ;;  %s6571_s15 = int_to_ptr.vmem [resolvable:$true] %s233_s15 }
   0xf   : > { %s6986_s10 = scalar_select %p6557_p3, 1, 0 }
  0x10   : > { %p6172_p4 = pneg %p6557_p3  ;;  %p6256_p6 = scmp.ne.s32.totalorder %s6975_s1, %s6255_s18 }
  0x11   : > { %p6262_p10 = scmp.lt.u32.totalorder %s6255_s18, %s6975_s1 }
  0x12   : > { %p6565_p5 = pnand %p6172_p4, %p6550_p1 }
  0x14   : > { %p6581_p7 = pneg %p6565_p5 }
  0x16   : > { %p6258_p8 = pnand %p6581_p7, %p6256_p6 }
  0x18   : > { %p6259_p9 = pneg %p6258_p8 }
  0x1a   : > { %p6264_p11 = pnand %p6262_p10, %p6259_p9 }
  0x1c   : > { %6267 = shalt.err (!%p6264_p11)
}
  0x1d   : > { %s6268_s24 = scalar_lea.vmem %s6555_s30, 16384  ;;  %p6276_p2 = scmp.lt.s32.totalorder %s6555_s30, %s6555_s30 }
  0x1e   : > { %p6269_p12 = scmp.ne.s32.totalorder %s6555_s30, %s6268_s24  ;;  %p6277_p4 = scmp.lt.s32.totalorder %s6268_s24, %s6268_s24 }
  0x20   : > { %p6271_p13 = pnand %p6269_p12, %p6581_p7  ;;  %p6278_p6 = por %p6277_p4, %p6276_p2 }
  0x22   : > { %p6272_p0 = pneg %p6271_p13 }
  0x24   : > { %p6279_p8 = pnand %p6278_p6, %p6272_p0 }
  0x26   : > { %6282 = shalt.err (!%p6279_p8)
}
  0x27   : > { %s6476_s25 = smov 512   ;;  %s6477_s6 = smov 32  }
  0x28   : > { %6175 = dma.hbm_to_vmem [thread:$0]  (!%p6565_p5), %s6975_s1, 16384, %s6555_s30, [#allocation6], %s6476_s25, %s6476_s25, %s6477_s6  }
  0x29   : > { %s6283_s18 = scalar_lea.hbm %s6977_s3, 65536 }
  0x2a   : > { %p6284_p9 = scmp.ne.s32.totalorder %s6977_s3, %s6283_s18  ;;  %p6290_p12 = scmp.lt.u32.totalorder %s6283_s18, %s6977_s3 }
  0x2c   : > { %p6286_p10 = pnand %p6284_p9, %p6581_p7 }
  0x2e   : > { %p6287_p11 = pneg %p6286_p10 }
  0x30   : > { %p6292_p13 = pnand %p6290_p12, %p6287_p11 }
  0x32   : > { %6295 = shalt.err (!%p6292_p13)
}
  0x33   : > { %s6296_s30 = scalar_lea.vmem %s6569_s12, 65536  ;;  %p6304_p6 = scmp.lt.s32.totalorder %s6569_s12, %s6569_s12 }
  0x34   : > { %p6297_p0 = scmp.ne.s32.totalorder %s6569_s12, %s6296_s30  ;;  %p6305_p8 = scmp.lt.s32.totalorder %s6296_s30, %s6296_s30 }
  0x36   : > { %p6299_p2 = pnand %p6297_p0, %p6581_p7  ;;  %p6306_p9 = por %p6305_p8, %p6304_p6 }
  0x38   : > { %p6300_p4 = pneg %p6299_p2 }
  0x3a   : > { %p6307_p10 = pnand %p6306_p9, %p6300_p4 }
  0x3c   : > { %6310 = shalt.err (!%p6307_p10)
}
  0x3d   : > { %6181 = dma.hbm_to_vmem [thread:$0]  (!%p6565_p5), %s6977_s3, 65536, %s6569_s12, [#allocation9], %s6476_s25, %s6476_s25, %s6477_s6  }
  0x3e   : > { %s6311_s17 = scalar_lea.hbm %s6976_s2, 128 }
  0x3f   : > { %p6312_p11 = scmp.ne.s32.totalorder %s6976_s2, %s6311_s17  ;;  %p6318_p0 = scmp.lt.u32.totalorder %s6311_s17, %s6976_s2 }
  0x41   : > { %p6314_p12 = pnand %p6312_p11, %p6581_p7 }
  0x43   : > { %p6315_p13 = pneg %p6314_p12 }
  0x45   : > { %p6320_p2 = pnand %p6318_p0, %p6315_p13 }
  0x47   : > { %6323 = shalt.err (!%p6320_p2)
}
  0x48   : > { %s6324_s12 = scalar_lea.vmem %s6571_s15, 128  ;;  %p6332_p9 = scmp.lt.s32.totalorder %s6571_s15, %s6571_s15 }
  0x49   : > { %p6325_p4 = scmp.ne.s32.totalorder %s6571_s15, %s6324_s12  ;;  %p6333_p10 = scmp.lt.s32.totalorder %s6324_s12, %s6324_s12 }
  0x4b   : > { %p6327_p6 = pnand %p6325_p4, %p6581_p7  ;;  %p6334_p11 = por %p6333_p10, %p6332_p9 }
  0x4d   : > { %p6328_p8 = pneg %p6327_p6 }
  0x4f   : > { %p6335_p12 = pnand %p6334_p11, %p6328_p8 }
  0x51   : > { %6338 = shalt.err (!%p6335_p12)
}
  0x52   : > { %6178 = dma.hbm_to_vmem [thread:$0]  (!%p6565_p5), %s6976_s2, 128, %s6571_s15, [#allocation6]  }
  0x53   : > { %s6478_s23 = smov [#allocation10]   ;;  %s6479_s24 = smov [#allocation11]  }
  0x54   : > { %s257_s30 = sshll.u32 %s6478_s23, 4  ;;  %s268_s11 = sshll.u32 %s6479_s24, 4  ;;  %s258_s30 = int_to_ptr.vmem [resolvable:$true] %s257_s30  ;;  %s269_s11 = int_to_ptr.vmem [resolvable:$true] %s268_s11 }
  0x55   : > { %s6339_s17 = scalar_lea.hbm %s6978_s4, 128 }
  0x56   : > { %p6340_p13 = scmp.ne.s32.totalorder %s6978_s4, %s6339_s17  ;;  %p6346_p4 = scmp.lt.u32.totalorder %s6339_s17, %s6978_s4 }
  0x58   : > { %p6342_p0 = pnand %p6340_p13, %p6581_p7 }
  0x5a   : > { %p6343_p2 = pneg %p6342_p0 }
  0x5c   : > { %p6348_p6 = pnand %p6346_p4, %p6343_p2 }
  0x5e   : > { %6351 = shalt.err (!%p6348_p6)
}
  0x5f   : > { %s6352_s15 = scalar_lea.vmem %s258_s30, 128  ;;  %p6360_p11 = scmp.lt.s32.totalorder %s258_s30, %s258_s30 }
  0x60   : > { %p6353_p8 = scmp.ne.s32.totalorder %s258_s30, %s6352_s15  ;;  %p6361_p12 = scmp.lt.s32.totalorder %s6352_s15, %s6352_s15 }
  0x62   : > { %p6355_p9 = pnand %p6353_p8, %p6581_p7  ;;  %p6362_p3 = por %p6361_p12, %p6360_p11 }
  0x64   : > { %p6356_p10 = pneg %p6355_p9 }
  0x66   : > { %p6363_p1 = pnand %p6362_p3, %p6356_p10 }
  0x68   : > { %6366 = shalt.err (!%p6363_p1)
}
  0x69   : > { %6184 = dma.hbm_to_vmem [thread:$0]  (!%p6565_p5), %s6978_s4, 128, %s258_s30, [#allocation9]  }
  0x6a   : > { %s6367_s24 = scalar_lea.hbm %s6979_s5, 128 }
  0x6b   : > { %p6368_p13 = scmp.ne.s32.totalorder %s6979_s5, %s6367_s24  ;;  %p6374_p1 = scmp.lt.u32.totalorder %s6367_s24, %s6979_s5 }
  0x6d   : > { %p6370_p0 = pnand %p6368_p13, %p6581_p7 }
  0x6f   : > { %p6371_p3 = pneg %p6370_p0 }
  0x71   : > { %p6376_p2 = pnand %p6374_p1, %p6371_p3 }
  0x73   : > { %6379 = shalt.err (!%p6376_p2)
}
  0x74   : > { %s6380_s19 = scalar_lea.vmem %s269_s11, 128  ;;  %p6388_p9 = scmp.lt.s32.totalorder %s269_s11, %s269_s11 }
  0x75   : > { %p6381_p4 = scmp.ne.s32.totalorder %s269_s11, %s6380_s19  ;;  %p6389_p10 = scmp.lt.s32.totalorder %s6380_s19, %s6380_s19 }
  0x77   : > { %p6383_p6 = pnand %p6381_p4, %p6581_p7  ;;  %p6390_p11 = por %p6389_p10, %p6388_p9 }
  0x79   : > { %p6384_p8 = pneg %p6383_p6 }
  0x7b   : > { %p6391_p12 = pnand %p6390_p11, %p6384_p8 }
  0x7d   : > { %6394 = shalt.err (!%p6391_p12)
}
  0x7e   : > { %6187 = dma.hbm_to_vmem [thread:$0]  (!%p6565_p5), %s6979_s5, 128, %s269_s11, [#allocation12]  }
  0x7f   : > { %s6685_s21 = sadd.s32 1, %s6471_s29   ;;  %s31_s22 = sadd.s32 1, %s6467_s28 }
  0x80   : > { %s28_s13 = ssub.s32 %s6471_s29, %s6685_s21  ;;  %p38_p13 = scmp.ne.s32.totalorder %s6467_s28, %s6463_s27 }
  0x81   : > { %p29_p7 = scmp.eq.s32.totalorder %s28_s13, 0  ;;  %p39_p0 = scmp.eq.s32.totalorder %s6471_s29, 0 }
  0x82   : > { %p44_p3 = scmp.ne.s32.totalorder %s6463_s27, %s6459_s26  ;;  %p6989_p2 = scmp.ne.s32.totalorder %s6985_s9, 0 }
  0x83   : > { %s6696_s15 = scalar_select %p29_p7, %s6467_s28, %s31_s22  }
  0x84   : > { %p40_p1 = por %p39_p0, %p38_p13  ;;  %p6700_p4 = por %p6989_p2, %p44_p3 }
  0x85   : > { %p6197_p6 = scmp.lt.s32.totalorder %s6471_s29, 2  ;;  %s282_s25 = sand.u32 1, %s6467_s28  }
  0x86   : > { %s5425_s11 = sshll.u32 %s282_s25, 4  ;;  %s6085_s6 = sshll.u32 %s6471_s29, 8 }
  0x87   : > { %s6710_s14 = scalar_lea.hbm %s6974_s0, %s6085_s6  ;;  %s286_s26 = scalar_lea.vmem [#allocation3], %s5425_s11 }
  0x88   : > { %s294_s16 = sshll.u32 %s286_s26, 4  ;;  %p6714_p5 = pnand %p6197_p6, %p40_p1  ;;  %s6712_s16 = int_to_ptr.vmem [resolvable:$true] %s294_s16 }
  0x89   : > { %s6718_s18 = scalar_lea.sflag [#allocation4], %s282_s25  ;;  %s6395_s19 = scalar_lea.hbm %s6710_s14, 256 }
  0x8a   : > { %p6396_p8 = scmp.ne.s32.totalorder %s6710_s14, %s6395_s19  ;;  %p6397_p9 = pneg %p6714_p5 }
  0x8b   : > { %s6400_s13 = scalar_lea.hbm %s6974_s0, 512  ;;  %p6401_p12 = scmp.lt.u32.totalorder %s6710_s14, %s6974_s0 }
  0x8c   : > { %p6398_p10 = pnand %p6397_p9, %p6396_p8  ;;  %p6402_p7 = scmp.lt.u32.totalorder %s6400_s13, %s6395_s19 }
  0x8d   : > { %p6404_p0 = scmp.lt.u32.totalorder %s6395_s19, %s6710_s14 }
  0x8e   : > { %p6399_p11 = pneg %p6398_p10  ;;  %p6403_p13 = por %p6402_p7, %p6401_p12 }
  0x90   : > { %p6405_p3 = por %p6404_p0, %p6403_p13 }
  0x92   : > { %p6406_p1 = pnand %p6405_p3, %p6399_p11 }
  0x94   : > { %6409 = shalt.err (!%p6406_p1)
}
  0x95   : > { %s6410_s25 = scalar_lea.vmem %s6712_s16, 256  ;;  %s6480_s6 = smov [#allocation3]  }
  0x96   : > { %p6411_p2 = scmp.ne.s32.totalorder %s6712_s16, %s6410_s25  ;;  %s6415_s23 = sshll.u32 %s6480_s6, 4  ;;  %s6416_s23 = int_to_ptr.vmem [resolvable:$false] %s6415_s23 }
  0x97   : > { %s6417_s24 = scalar_lea.vmem %s6416_s23, 512  ;;  %p6418_p10 = scmp.lt.s32.totalorder %s6712_s16, %s6416_s23 }
  0x98   : > { %p6413_p6 = pnand %p6411_p2, %p6397_p9  ;;  %p6419_p12 = scmp.lt.s32.totalorder %s6417_s24, %s6410_s25 }
  0x9a   : > { %p6414_p8 = pneg %p6413_p6  ;;  %p6420_p7 = por %p6419_p12, %p6418_p10 }
  0x9c   : > { %p6421_p13 = pnand %p6420_p7, %p6414_p8 }
  0x9e   : > { %6424 = shalt.err (!%p6421_p13)
}
  0x9f   : > { %s6481_s26 = smov 128   ;;  %s6482_s19 = smov 8  }
  0xa0   : > { %6191 = dma.hbm_to_vmem [thread:$0]  (!%p6714_p5), %s6710_s14, 256, %s6712_s16, %s6718_s18, %s6481_s26, %s6481_s26, %s6482_s19  }
  0xa1   : > { %p6992_p9 = scmp.ne.s32.totalorder %s6986_s10, 0 }
  0xa2   : > { %s308_s30 = sand.u32 (!%p6992_p9), 1, %s6463_s27  }
  0xa3   : > { %306 = sbr.rel (%p6992_p9) target bundleno = 1317 (0x525), region = 48  ;;  %s6749_s20 = sshll.u32 (!%p6992_p9), %s308_s30, 4 }
  0xa4   : > { %s309_s13 = scalar_lea.sflag (!%p6992_p9), [#allocation4], %s308_s30  ;;  %s312_s22 = scalar_lea.vmem (!%p6992_p9), [#allocation3], %s6749_s20 }
  0xaa   : > { %6442 = dma.done.wait (%p6700_p4), %s309_s13, 256  }
  0xab   : > { %6444 = vsyncadd (%p6700_p4), %s309_s13, 4294967040  ;;  %p6993_p11 = scmp.ne.s32.totalorder %s6985_s9, 0 }
  0xad   : > { %6446 = dma.done.wait (%p6993_p11), [#allocation6], 16512  }
  0xae   : > { %6448 = vsyncadd (%p6993_p11), [#allocation6], 4294950784 }
  0xaf   : > { %6450 = dma.done.wait (%p6993_p11), [#allocation9], 65664  }
  0xb0   : > { %6452 = vsyncadd (%p6993_p11), [#allocation9], 4294901632 }
  0xb1   : > { %6454 = dma.done.wait (%p6993_p11), [#allocation12], 128  }
  0xb2   : > { %6456 = vsyncadd (%p6993_p11), [#allocation12], 4294967168  ;;  %v372_v0 = vld [vmem:[#allocation5] sm:$0xff]  ;;  %v373_v17 = vld [vmem:[#allocation5 + $0x8] sm:$0xff]  ;;  %s5282_s9 = sld [smem:[#allocation2]]  ;;  %s5436_s10 = sshll.u32 %s5416_s8, 1 }
  0xb3   : > { %v376_v1 = vld [vmem:[#allocation5 + $0x20] sm:$0xff]  ;;  %v377_v18 = vld [vmem:[#allocation5 + $0x28] sm:$0xff]  ;;  %p365_p4 = scmp.lt.s32.totalorder %s5436_s10, 3  ;;  %vm5298_vm0 = vcmask 7168  }
  0xb4   : > { %v380_v2 = vld [vmem:[#allocation5 + $0x40] sm:$0xff]  ;;  %v5441_v3 = vcombine.high %v372_v0, %v376_v1  ;;  %v5440_v4 = vcombine.low %v372_v0, %v376_v1  ;;  %v5443_v20 = vcombine.high %v373_v17, %v377_v18  ;;  %v5442_v21 = vcombine.low %v373_v17, %v377_v18  ;;  %v381_v23 = vld [vmem:[#allocation5 + $0x48] sm:$0xff] }
  0xb5   : > { %v384_v5 = vld [vmem:[#allocation5 + $0x60] sm:$0xff]  ;;  %v385_v25 = vld [vmem:[#allocation5 + $0x68] sm:$0xff]  ;;  %s6999_s10 = smov (!%p365_p4, %s5436_s10), 3 }
  0xb6   : > { %v5449_v6 = vcombine.high %v380_v2, %v384_v5  ;;  %v388_v7 = vld [vmem:[#allocation5 + $0x80] sm:$0xff]  ;;  %1192 = vmatprep.subr.bf16.mxu0 %v5441_v3  ;;  %v5448_v9 = vcombine.low %v380_v2, %v384_v5  ;;  %v389_v26 = vld [vmem:[#allocation5 + $0x88] sm:$0xff]  ;;  %1235 = vmatprep.subr.bf16.mxu1 %v5443_v20  ;;  %v5451_v30 = vcombine.high %v381_v23, %v385_v25  ;;  %s5437_s12 = sshll.u32 %s6999_s10, 3 }
  0xb7   : > { %v392_v8 = vld [vmem:[#allocation5 + $0xa0] sm:$0xff]  ;;  %1193 = vmatpush1.bf16.msra.mxu0 %v5440_v4  ;;  %v393_v27 = vld [vmem:[#allocation5 + $0xa8] sm:$0xff]  ;;  %1236 = vmatpush1.bf16.msra.mxu1 %v5442_v21  ;;  %v5450_v31 = vcombine.low %v381_v23, %v385_v25  ;;  %s368_s17 = scalar_lea.vmem %s6981_s7, %s5437_s12 }
  0xb8   : > { %1194 = vmatprep.subr.bf16.mxu0 %v5449_v6  ;;  %v5457_v10 = vcombine.high %v388_v7, %v392_v8  ;;  %v396_v11 = vld [vmem:[#allocation5 + $0xc0] sm:$0xff]  ;;  %v5456_v13 = vcombine.low %v388_v7, %v392_v8  ;;  %1237 = vmatprep.subr.bf16.mxu1 %v5451_v30  ;;  %v5459_v33 = vcombine.high %v389_v26, %v393_v27  ;;  %v397_v35 = vld [vmem:[#allocation5 + $0xc8] sm:$0xff] }
  0xb9   : > { %v400_v12 = vld [vmem:[#allocation5 + $0xe0] sm:$0xff]  ;;  %v401_v36 = vld [vmem:[#allocation5 + $0xe8] sm:$0xff]  ;;  %v5458_v39 = vcombine.low %v389_v26, %v393_v27 }
  0xba   : > { %v5465_v14 = vcombine.high %v396_v11, %v400_v12  ;;  %v404_v15 = vld [vmem:[#allocation5 + $0x100] sm:$0xff]  ;;  %v5464_v19 = vcombine.low %v396_v11, %v400_v12  ;;  %v5467_v41 = vcombine.high %v397_v35, %v401_v36  ;;  %v405_v43 = vld [vmem:[#allocation5 + $0x108] sm:$0xff]  ;;  %v5466_v47 = vcombine.low %v397_v35, %v401_v36 }
  0xbb   : > { %1195 = vmatpush1.bf16.msra.mxu0 %v5448_v9  ;;  %v408_v16 = vld [vmem:[#allocation5 + $0x120] sm:$0xff]  ;;  %1238 = vmatpush1.bf16.msra.mxu1 %v5450_v31  ;;  %v409_v44 = vld [vmem:[#allocation5 + $0x128] sm:$0xff] }
  0xbc   : > { %1196 = vmatprep.subr.bf16.mxu0 %v5457_v10  ;;  %v6770_v22 = vld [vmem:[%s312_s22 + $0x4] ss:$8 sps:$4 sm:$0xff]   ;;  %v5473_v24 = vcombine.high %v404_v15, %v408_v16  ;;  %v5472_v32 = vcombine.low %v404_v15, %v408_v16  ;;  %1239 = vmatprep.subr.bf16.mxu1 %v5459_v33  ;;  %v5475_v49 = vcombine.high %v405_v43, %v409_v44 }
  0xbd   : > { %v412_v28 = vld [vmem:[#allocation5 + $0x140] sm:$0xff]  ;;  %1224 = vmatprep.mubr.bf16.mxu0 %v6770_v22  ;;  %1267 = vmatprep.mubr.bf16.mxu1 %v6770_v22  ;;  %v413_v51 = vld [vmem:[#allocation5 + $0x148] sm:$0xff]  ;;  %v5474_v55 = vcombine.low %v405_v43, %v409_v44 }
  0xbe   : > { %v416_v29 = vld [vmem:[#allocation5 + $0x160] sm:$0xff]  ;;  %v417_v52 = vld [vmem:[#allocation5 + $0x168] sm:$0xff] }
  0xbf   : > { %1197 = vmatpush1.bf16.msra.mxu0 %v5456_v13  ;;  %v5481_v34 = vcombine.high %v412_v28, %v416_v29  ;;  %v420_v37 = vld [vmem:[#allocation5 + $0x180] sm:$0xff]  ;;  %v5480_v40 = vcombine.low %v412_v28, %v416_v29  ;;  %1240 = vmatpush1.bf16.msra.mxu1 %v5458_v39  ;;  %v5483_v57 = vcombine.high %v413_v51, %v417_v52  ;;  %v421_v59 = vld [vmem:[#allocation5 + $0x188] sm:$0xff] }
  0xc0   : > { %1198 = vmatprep.subr.bf16.mxu0 %v5465_v14  ;;  %v424_v38 = vld [vmem:[#allocation5 + $0x1a0] sm:$0xff]  ;;  %1241 = vmatprep.subr.bf16.mxu1 %v5467_v41  ;;  %v425_v60 = vld [vmem:[#allocation5 + $0x1a8] sm:$0xff]  ;;  %v5482_v63 = vcombine.low %v413_v51, %v417_v52 }
  0xc1   : > { %v5489_v42 = vcombine.high %v420_v37, %v424_v38  ;;  %v428_v45 = vld [vmem:[#allocation5 + $0x1c0] sm:$0xff]  ;;  %v5488_v48 = vcombine.low %v420_v37, %v424_v38  ;;  %v5491_v1 = vcombine.high %v421_v59, %v425_v60  ;;  %v429_v3 = vld [vmem:[#allocation5 + $0x1c8] sm:$0xff]  ;;  %v5490_v7 = vcombine.low %v421_v59, %v425_v60 }
  0xc2   : > { %v432_v46 = vld [vmem:[#allocation5 + $0x1e0] sm:$0xff]  ;;  %v433_v4 = vld [vmem:[#allocation5 + $0x1e8] sm:$0xff] }
  0xc3   : > { %1199 = vmatpush1.bf16.msra.mxu0 %v5464_v19  ;;  %v5497_v50 = vcombine.high %v428_v45, %v432_v46  ;;  %v436_v53 = vld [vmem:[#allocation5 + $0x200] sm:$0xff]  ;;  %1242 = vmatpush1.bf16.msra.mxu1 %v5466_v47  ;;  %v5496_v56 = vcombine.low %v428_v45, %v432_v46  ;;  %v5499_v9 = vcombine.high %v429_v3, %v433_v4  ;;  %v437_v11 = vld [vmem:[#allocation5 + $0x208] sm:$0xff] }
  0xc4   : > { %1200 = vmatprep.subr.bf16.mxu0 %v5473_v24  ;;  %v440_v54 = vld [vmem:[#allocation5 + $0x220] sm:$0xff]  ;;  %1243 = vmatprep.subr.bf16.mxu1 %v5475_v49  ;;  %v441_v12 = vld [vmem:[#allocation5 + $0x228] sm:$0xff]  ;;  %v5498_v15 = vcombine.low %v429_v3, %v433_v4 }
  0xc5   : > { %v5505_v58 = vcombine.high %v436_v53, %v440_v54  ;;  %v444_v61 = vld [vmem:[#allocation5 + $0x240] sm:$0xff]  ;;  %v5504_v0 = vcombine.low %v436_v53, %v440_v54  ;;  %v5507_v17 = vcombine.high %v437_v11, %v441_v12  ;;  %v445_v19 = vld [vmem:[#allocation5 + $0x248] sm:$0xff]  ;;  %v5506_v24 = vcombine.low %v437_v11, %v441_v12  ;;  %v374_v54 = vld [vmem:[#allocation5 + $0x10] sm:$0xff] }
  0xc6   : > { %v448_v62 = vld [vmem:[#allocation5 + $0x260] sm:$0xff]  ;;  %v449_v20 = vld [vmem:[#allocation5 + $0x268] sm:$0xff] }
  0xc7   : > { %1201 = vmatpush1.bf16.msra.mxu0 %v5472_v32  ;;  %1244 = vmatpush1.bf16.msra.mxu1 %v5474_v55  ;;  %v5513_v2 = vcombine.high %v444_v61, %v448_v62  ;;  %v452_v5 = vld [vmem:[#allocation5 + $0x280] sm:$0xff]  ;;  %v5512_v8 = vcombine.low %v444_v61, %v448_v62  ;;  %v5515_v26 = vcombine.high %v445_v19, %v449_v20  ;;  %v453_v28 = vld [vmem:[#allocation5 + $0x288] sm:$0xff]  ;;  %v378_v55 = vld [vmem:[#allocation5 + $0x30] sm:$0xff] }
  0xc8   : > { %1202 = vmatprep.subr.bf16.mxu0 %v5481_v34  ;;  %1245 = vmatprep.subr.bf16.mxu1 %v5483_v57  ;;  %v456_v6 = vld [vmem:[#allocation5 + $0x2a0] sm:$0xff]  ;;  %v457_v29 = vld [vmem:[#allocation5 + $0x2a8] sm:$0xff]  ;;  %v5514_v32 = vcombine.low %v445_v19, %v449_v20  ;;  %v5445_v61 = vcombine.high %v374_v54, %v378_v55  ;;  %v382_v62 = vld [vmem:[#allocation5 + $0x50] sm:$0xff]  ;;  %v5444_v3 = vcombine.low %v374_v54, %v378_v55 }
  0xc9   : > { %v5521_v10 = vcombine.high %v452_v5, %v456_v6  ;;  %v460_v13 = vld [vmem:[#allocation5 + $0x2c0] sm:$0xff]  ;;  %v5520_v16 = vcombine.low %v452_v5, %v456_v6  ;;  %v5523_v34 = vcombine.high %v453_v28, %v457_v29  ;;  %v461_v36 = vld [vmem:[#allocation5 + $0x2c8] sm:$0xff]  ;;  %v419_v54 = vld [vmem:[#allocation5 + $0x178] sm:$0xff] }
  0xca   : > { %v464_v14 = vld [vmem:[#allocation5 + $0x2e0] sm:$0xff]  ;;  %v465_v37 = vld [vmem:[#allocation5 + $0x2e8] sm:$0xff]  ;;  %v438_v55 = vld [vmem:[#allocation5 + $0x210] sm:$0xff] }
  0xcb   : > { %1203 = vmatpush1.bf16.msra.mxu0 %v5480_v40  ;;  %1246 = vmatpush1.bf16.msra.mxu1 %v5482_v63  ;;  %v5529_v18 = vcombine.high %v460_v13, %v464_v14  ;;  %v468_v21 = vld [vmem:[#allocation5 + $0x300] sm:$0xff]  ;;  %v5528_v25 = vcombine.low %v460_v13, %v464_v14  ;;  %v5522_v40 = vcombine.low %v453_v28, %v457_v29  ;;  %v469_v44 = vld [vmem:[#allocation5 + $0x308] sm:$0xff]  ;;  %v386_v63 = vld [vmem:[#allocation5 + $0x70] sm:$0xff] }
  0xcc   : > { %1204 = vmatprep.subr.bf16.mxu0 %v5489_v42  ;;  %1247 = vmatprep.subr.bf16.mxu1 %v5491_v1  ;;  %v472_v23 = vld [vmem:[#allocation5 + $0x320] sm:$0xff]  ;;  %v5531_v42 = vcombine.high %v461_v36, %v465_v37  ;;  %v473_v45 = vld [vmem:[#allocation5 + $0x328] sm:$0xff]  ;;  %v5453_v6 = vcombine.high %v382_v62, %v386_v63  ;;  %v5452_v11 = vcombine.low %v382_v62, %v386_v63  ;;  %v375_v13 = vld [vmem:[#allocation5 + $0x18] sm:$0xff] }
  0xcd   : > { %v5537_v27 = vcombine.high %v468_v21, %v472_v23  ;;  %v476_v30 = vld [vmem:[#allocation5 + $0x340] sm:$0xff]  ;;  %v5536_v33 = vcombine.low %v468_v21, %v472_v23  ;;  %v477_v52 = vld [vmem:[#allocation5 + $0x348] sm:$0xff]  ;;  %v379_v14 = vld [vmem:[#allocation5 + $0x38] sm:$0xff] }
  0xce   : > { %v480_v31 = vld [vmem:[#allocation5 + $0x360] sm:$0xff]  ;;  %v481_v53 = vld [vmem:[#allocation5 + $0x368] sm:$0xff]  ;;  %v5447_v19 = vcombine.high %v375_v13, %v379_v14  ;;  %v383_v21 = vld [vmem:[#allocation5 + $0x58] sm:$0xff] }
  0xcf   : > { %1205 = vmatpush1.bf16.msra.mxu0 %v5488_v48  ;;  %1248 = vmatpush1.bf16.msra.mxu1 %v5490_v7  ;;  %v5545_v35 = vcombine.high %v476_v30, %v480_v31  ;;  %v484_v38 = vld [vmem:[#allocation5 + $0x380] sm:$0xff]  ;;  %v5544_v41 = vcombine.low %v476_v30, %v480_v31  ;;  %v5530_v48 = vcombine.low %v461_v36, %v465_v37  ;;  %v485_v59 = vld [vmem:[#allocation5 + $0x388] sm:$0xff]  ;;  %v390_v7 = vld [vmem:[#allocation5 + $0x90] sm:$0xff] }
  0xd0   : > { %1206 = vmatprep.subr.bf16.mxu0 %v5497_v50  ;;  %1249 = vmatprep.subr.bf16.mxu1 %v5499_v9  ;;  %v488_v39 = vld [vmem:[#allocation5 + $0x3a0] sm:$0xff]  ;;  %v5539_v50 = vcombine.high %v469_v44, %v473_v45  ;;  %v489_v60 = vld [vmem:[#allocation5 + $0x3a8] sm:$0xff]  ;;  %v5546_v1 = vcombine.low %v477_v52, %v481_v53  ;;  %v387_v23 = vld [vmem:[#allocation5 + $0x78] sm:$0xff] }
  0xd1   : > { %v5553_v43 = vcombine.high %v484_v38, %v488_v39  ;;  %v492_v46 = vld [vmem:[#allocation5 + $0x3c0] sm:$0xff]  ;;  %v5552_v49 = vcombine.low %v484_v38, %v488_v39  ;;  %v493_v4 = vld [vmem:[#allocation5 + $0x3c8] sm:$0xff]  ;;  %v5554_v9 = vcombine.low %v485_v59, %v489_v60  ;;  %v5455_v28 = vcombine.high %v383_v21, %v387_v23  ;;  %v391_v30 = vld [vmem:[#allocation5 + $0x98] sm:$0xff] }
  0xd2   : > { %v496_v47 = vld [vmem:[#allocation5 + $0x3e0] sm:$0xff]  ;;  %v497_v5 = vld [vmem:[#allocation5 + $0x3e8] sm:$0xff]  ;;  %v395_v31 = vld [vmem:[#allocation5 + $0xb8] sm:$0xff] }
  0xd3   : > { %1207 = vmatpush1.bf16.msra.mxu0 %v5496_v56  ;;  %1250 = vmatpush1.bf16.msra.mxu1 %v5498_v15  ;;  %v5561_v51 = vcombine.high %v492_v46, %v496_v47  ;;  %v5538_v56 = vcombine.low %v469_v44, %v473_v45  ;;  %v5560_v57 = vcombine.low %v492_v46, %v496_v47  ;;  %v398_v15 = vld [vmem:[#allocation5 + $0xd0] sm:$0xff]  ;;  %v399_v38 = vld [vmem:[#allocation5 + $0xd8] sm:$0xff] }
  0xd4   : > { %1208 = vmatprep.subr.bf16.mxu0 %v5505_v58  ;;  %1251 = vmatprep.subr.bf16.mxu1 %v5507_v17  ;;  %v5547_v58 = vcombine.high %v477_v52, %v481_v53  ;;  %v5562_v17 = vcombine.low %v493_v4, %v497_v5  ;;  %v5463_v36 = vcombine.high %v391_v30, %v395_v31  ;;  %v403_v39 = vld [vmem:[#allocation5 + $0xf8] sm:$0xff]  ;;  %v430_v47 = vld [vmem:[#allocation5 + $0x1d0] sm:$0xff] }
  0xd5   : > { %v5471_v44 = vcombine.high %v399_v38, %v403_v39  ;;  %v407_v46 = vld [vmem:[#allocation5 + $0x118] sm:$0xff]  ;;  %v446_v63 = vld [vmem:[#allocation5 + $0x250] sm:$0xff] }
  0xd6   : > { %v415_v53 = vld [vmem:[#allocation5 + $0x158] sm:$0xff] }
  0xd7   : > { %1209 = vmatpush1.bf16.msra.mxu0 %v5504_v0  ;;  %1252 = vmatpush1.bf16.msra.mxu1 %v5506_v24  ;;  %v6776_v0 = vld [vmem:[%s312_s22] ss:$8 sps:$4 sm:$0xff]  }
  0xd8   : > { %1210 = vmatprep.subr.bf16.mxu0 %v5513_v2  ;;  %1253 = vmatprep.subr.bf16.mxu1 %v5515_v26  ;;  %v5555_v2 = vcombine.high %v485_v59, %v489_v60  ;;  %v406_v24 = vld [vmem:[#allocation5 + $0x110] sm:$0xff]  ;;  %v5446_v26 = vcombine.low %v375_v13, %v379_v14  ;;  %v5487_v59 = vcombine.high %v415_v53, %v419_v54  ;;  %v427_v62 = vld [vmem:[#allocation5 + $0x1b8] sm:$0xff] }
  0xd9   : > { %v439_v14 = vld [vmem:[#allocation5 + $0x218] sm:$0xff] }
  0xdb   : > { %1211 = vmatpush1.bf16.msra.mxu0 %v5512_v8  ;;  %1254 = vmatpush1.bf16.msra.mxu1 %v5514_v32  ;;  %v394_v8 = vld [vmem:[#allocation5 + $0xb0] sm:$0xff] }
  0xdc   : > { %1212 = vmatprep.subr.bf16.mxu0 %v5521_v10  ;;  %1255 = vmatprep.subr.bf16.mxu1 %v5523_v34  ;;  %v5563_v10 = vcombine.high %v493_v4, %v497_v5  ;;  %v5461_v12 = vcombine.high %v390_v7, %v394_v8  ;;  %v414_v32 = vld [vmem:[#allocation5 + $0x150] sm:$0xff]  ;;  %v5454_v34 = vcombine.low %v383_v21, %v387_v23  ;;  %v447_v23 = vld [vmem:[#allocation5 + $0x258] sm:$0xff] }
  0xdf   : > { %1213 = vmatpush1.bf16.msra.mxu0 %v5520_v16  ;;  %1256 = vmatpush1.bf16.msra.mxu1 %v5522_v40  ;;  %v402_v16 = vld [vmem:[#allocation5 + $0xf0] sm:$0xff] }
  0xe0   : > { %1214 = vmatprep.subr.bf16.mxu0 %v5529_v18  ;;  %1257 = vmatprep.subr.bf16.mxu1 %v5531_v42  ;;  %v5460_v18 = vcombine.low %v390_v7, %v394_v8  ;;  %v5469_v20 = vcombine.high %v398_v15, %v402_v16  ;;  %v422_v40 = vld [vmem:[#allocation5 + $0x190] sm:$0xff]  ;;  %v5462_v42 = vcombine.low %v391_v30, %v395_v31  ;;  %v435_v7 = vld [vmem:[#allocation5 + $0x1f8] sm:$0xff] }
  0xe1   : > { %v454_v8 = vld [vmem:[#allocation5 + $0x290] sm:$0xff]  ;;  %v455_v31 = vld [vmem:[#allocation5 + $0x298] sm:$0xff] }
  0xe3   : > { %1215 = vmatpush1.bf16.msra.mxu0 %v5528_v25  ;;  %1258 = vmatpush1.bf16.msra.mxu1 %v5530_v48  ;;  %v410_v25 = vld [vmem:[#allocation5 + $0x130] sm:$0xff] }
  0xe4   : > { %1216 = vmatprep.subr.bf16.mxu0 %v5537_v27  ;;  %1259 = vmatprep.subr.bf16.mxu1 %v5539_v50  ;;  %v5468_v27 = vcombine.low %v398_v15, %v402_v16  ;;  %v5477_v29 = vcombine.high %v406_v24, %v410_v25  ;;  %v434_v48 = vld [vmem:[#allocation5 + $0x1f0] sm:$0xff]  ;;  %v443_v15 = vld [vmem:[#allocation5 + $0x238] sm:$0xff] }
  0xe5   : > { %v5501_v52 = vcombine.high %v430_v47, %v434_v48  ;;  %v462_v16 = vld [vmem:[#allocation5 + $0x2d0] sm:$0xff] }
  0xe7   : > { %1217 = vmatpush1.bf16.msra.mxu0 %v5536_v33  ;;  %1260 = vmatpush1.bf16.msra.mxu1 %v5538_v56  ;;  %v418_v33 = vld [vmem:[#allocation5 + $0x170] sm:$0xff] }
  0xe8   : > { %1218 = vmatprep.subr.bf16.mxu0 %v5545_v35  ;;  %1261 = vmatprep.subr.bf16.mxu1 %v5547_v58  ;;  %v5476_v35 = vcombine.low %v406_v24, %v410_v25  ;;  %v5485_v37 = vcombine.high %v414_v32, %v418_v33  ;;  %v442_v56 = vld [vmem:[#allocation5 + $0x230] sm:$0xff]  ;;  %v5500_v58 = vcombine.low %v430_v47, %v434_v48  ;;  %v451_v24 = vld [vmem:[#allocation5 + $0x278] sm:$0xff] }
  0xe9   : > { %v5509_v60 = vcombine.high %v438_v55, %v442_v56  ;;  %v470_v25 = vld [vmem:[#allocation5 + $0x310] sm:$0xff]  ;;  %v475_v47 = vld [vmem:[#allocation5 + $0x338] sm:$0xff] }
  0xea   : > { %v494_v48 = vld [vmem:[#allocation5 + $0x3d0] sm:$0xff] }
  0xeb   : > { %1219 = vmatpush1.bf16.msra.mxu0 %v5544_v41  ;;  %1262 = vmatpush1.bf16.msra.mxu1 %v5546_v1  ;;  %v426_v41 = vld [vmem:[#allocation5 + $0x1b0] sm:$0xff] }
  0xec   : > { %1220 = vmatprep.subr.bf16.mxu0 %v5553_v43  ;;  %1263 = vmatprep.subr.bf16.mxu1 %v5555_v2  ;;  %v5484_v43 = vcombine.low %v414_v32, %v418_v33  ;;  %v5493_v45 = vcombine.high %v422_v40, %v426_v41  ;;  %v5492_v50 = vcombine.low %v422_v40, %v426_v41  ;;  %v450_v1 = vld [vmem:[#allocation5 + $0x270] sm:$0xff]  ;;  %v459_v32 = vld [vmem:[#allocation5 + $0x2b8] sm:$0xff] }
  0xed   : > { %v5486_v2 = vcombine.low %v415_v53, %v419_v54  ;;  %v5517_v5 = vcombine.high %v446_v63, %v450_v1  ;;  %v478_v33 = vld [vmem:[#allocation5 + $0x350] sm:$0xff]  ;;  %v467_v40 = vld [vmem:[#allocation5 + $0x2f8] sm:$0xff] }
  0xee   : > { %v486_v41 = vld [vmem:[#allocation5 + $0x390] sm:$0xff]  ;;  %v479_v54 = vld [vmem:[#allocation5 + $0x358] sm:$0xff] }
  0xef   : > { %1221 = vmatpush1.bf16.msra.mxu0 %v5552_v49  ;;  %1264 = vmatpush1.bf16.msra.mxu1 %v5554_v9  ;;  %v5470_v49 = vcombine.low %v399_v38, %v403_v39  ;;  %v458_v9 = vld [vmem:[#allocation5 + $0x2b0] sm:$0xff]  ;;  %v463_v39 = vld [vmem:[#allocation5 + $0x2d8] sm:$0xff] }
  0xf0   : > { %1222 = vmatprep.subr.bf16.mxu0 %v5561_v51  ;;  %1265 = vmatprep.subr.bf16.mxu1 %v5563_v10  ;;  %v5525_v13 = vcombine.high %v454_v8, %v458_v9 }
  0xf3   : > { %1223 = vmatpush1.bf16.msra.mxu0 %v5560_v57  ;;  %1266 = vmatpush1.bf16.msra.mxu1 %v5562_v17  ;;  %v466_v17 = vld [vmem:[#allocation5 + $0x2f0] sm:$0xff] }
  0xf4   : > { %1278 = vmatprep.subr.bf16.mxu0 %v5445_v61  ;;  %1321 = vmatprep.subr.bf16.mxu1 %v5447_v19  ;;  %v423_v61 = vld [vmem:[#allocation5 + $0x198] sm:$0xff]  ;;  %v5524_v19 = vcombine.low %v454_v8, %v458_v9  ;;  %v5533_v21 = vcombine.high %v462_v16, %v466_v17  ;;  %v1404_v9 = vld [vmem:[#allocation8 + $0x80] sm:$0xff] }
  0xf5   : > { %v5495_v4 = vcombine.high %v423_v61, %v427_v62  ;;  %v5494_v10 = vcombine.low %v423_v61, %v427_v62  ;;  %v487_v61 = vld [vmem:[#allocation5 + $0x398] sm:$0xff] }
  0xf6   : > { %1225 = vmatmul.mubr.bf16.vlgmr.msra.gmra.mrb[0].mxu0 %v6776_v0  ;;  %1268 = vmatmul.mubr.bf16.vlgmr.msra.gmra.mrb[0].mxu1 %v6776_v0  ;;  %v491_v62 = vld [vmem:[#allocation5 + $0x3b8] sm:$0xff] }
  0xf7   : > { %1279 = vmatpush1.bf16.msra.mxu0 %v5444_v3  ;;  %1310 = vmatprep.mubr.bf16.mxu0 %v6770_v22  ;;  %v5508_v3 = vcombine.low %v438_v55, %v442_v56  ;;  %v483_v55 = vld [vmem:[#allocation5 + $0x378] sm:$0xff]  ;;  %v1388_v56 = vld [vmem:[#allocation8] sm:$0xff] }
  0xf8   : > { %1280 = vmatprep.subr.bf16.mxu0 %v5453_v6  ;;  %1322 = vmatpush1.bf16.msra.mxu1 %v5446_v26  ;;  %v431_v6 = vld [vmem:[#allocation5 + $0x1d8] sm:$0xff]  ;;  %v474_v26 = vld [vmem:[#allocation5 + $0x330] sm:$0xff] }
  0xf9   : > { %1353 = vmatprep.mubr.bf16.mxu1 %v6770_v22  ;;  %1323 = vmatprep.subr.bf16.mxu1 %v5455_v28  ;;  %v411_v22 = vld [vmem:[#allocation5 + $0x138] sm:$0xff]  ;;  %v5532_v28 = vcombine.low %v462_v16, %v466_v17  ;;  %v5541_v30 = vcombine.high %v470_v25, %v474_v26  ;;  %v1412_v17 = vld [vmem:[#allocation8 + $0xc0] sm:$0xff] }
  0xfa   : > { %v5479_v51 = vcombine.high %v407_v46, %v411_v22  ;;  %v5478_v57 = vcombine.low %v407_v46, %v411_v22  ;;  %v471_v22 = vld [vmem:[#allocation5 + $0x318] sm:$0xff] }
  0xfb   : > { %1281 = vmatpush1.bf16.msra.mxu0 %v5452_v11  ;;  %v5516_v11 = vcombine.low %v446_v63, %v450_v1  ;;  %v1396_v1 = vld [vmem:[#allocation8 + $0x40] sm:$0xff] }
  0xfc   : > { %1282 = vmatprep.subr.bf16.mxu0 %v5461_v12  ;;  %1324 = vmatpush1.bf16.msra.mxu1 %v5454_v34  ;;  %v5503_v12 = vcombine.high %v431_v6, %v435_v7  ;;  %v482_v34 = vld [vmem:[#allocation5 + $0x370] sm:$0xff] }
  0xfd   : > { %1325 = vmatprep.subr.bf16.mxu1 %v5463_v36  ;;  %v5540_v36 = vcombine.low %v470_v25, %v474_v26  ;;  %v5549_v38 = vcombine.high %v478_v33, %v482_v34  ;;  %v1420_v26 = vld [vmem:[#allocation8 + $0x100] sm:$0xff] }
  0xff   : > { %1283 = vmatpush1.bf16.msra.mxu0 %v5460_v18  ;;  %v5502_v18 = vcombine.low %v431_v6, %v435_v7  ;;  %v495_v6 = vld [vmem:[#allocation5 + $0x3d8] sm:$0xff] }
 0x100   : > { %1284 = vmatprep.subr.bf16.mxu0 %v5469_v20  ;;  %1326 = vmatpush1.bf16.msra.mxu1 %v5462_v42  ;;  %v5511_v20 = vcombine.high %v439_v14, %v443_v15  ;;  %v490_v42 = vld [vmem:[#allocation5 + $0x3b0] sm:$0xff]  ;;  %v499_v7 = vld [vmem:[#allocation5 + $0x3f8] sm:$0xff] }
 0x101   : > { %1327 = vmatprep.subr.bf16.mxu1 %v5471_v44  ;;  %v5548_v44 = vcombine.low %v478_v33, %v482_v34  ;;  %v5557_v46 = vcombine.high %v486_v41, %v490_v42  ;;  %v1428_v34 = vld [vmem:[#allocation8 + $0x140] sm:$0xff] }
 0x103   : > { %1285 = vmatpush1.bf16.msra.mxu0 %v5468_v27  ;;  %v5510_v27 = vcombine.low %v439_v14, %v443_v15  ;;  %v1389_v14 = vld [vmem:[#allocation8 + $0x8] sm:$0xff] }
 0x104   : > { %1286 = vmatprep.subr.bf16.mxu0 %v5477_v29  ;;  %1328 = vmatpush1.bf16.msra.mxu1 %v5470_v49  ;;  %v5519_v29 = vcombine.high %v447_v23, %v451_v24  ;;  %v498_v49 = vld [vmem:[#allocation5 + $0x3f0] sm:$0xff] }
 0x105   : > { %1329 = vmatprep.subr.bf16.mxu1 %v5479_v51  ;;  %v5556_v51 = vcombine.low %v486_v41, %v490_v42  ;;  %v5565_v53 = vcombine.high %v494_v48, %v498_v49  ;;  %v1393_v15 = vld [vmem:[#allocation8 + $0x28] sm:$0xff]  ;;  %v1436_v42 = vld [vmem:[#allocation8 + $0x180] sm:$0xff] }
 0x107   : > { %1287 = vmatpush1.bf16.msra.mxu0 %v5476_v35  ;;  %v5518_v35 = vcombine.low %v447_v23, %v451_v24  ;;  %v1397_v23 = vld [vmem:[#allocation8 + $0x48] sm:$0xff] }
 0x108   : > { %1288 = vmatprep.subr.bf16.mxu0 %v5485_v37  ;;  %1330 = vmatpush1.bf16.msra.mxu1 %v5478_v57  ;;  %v5527_v37 = vcombine.high %v455_v31, %v459_v32  ;;  %v1392_v57 = vld [vmem:[#allocation8 + $0x20] sm:$0xff]  ;;  %v1401_v24 = vld [vmem:[#allocation8 + $0x68] sm:$0xff] }
 0x109   : > { %1331 = vmatprep.subr.bf16.mxu1 %v5487_v59  ;;  %v5564_v59 = vcombine.low %v494_v48, %v498_v49  ;;  %v5569_v63 = vcombine.high %v1388_v56, %v1392_v57  ;;  %v1444_v48 = vld [vmem:[#allocation8 + $0x1c0] sm:$0xff] }
 0x10a   : > { %v1448_v49 = vld [vmem:[#allocation8 + $0x1e0] sm:$0xff] }
 0x10b   : > { %1289 = vmatpush1.bf16.msra.mxu0 %v5484_v43  ;;  %v5526_v43 = vcombine.low %v455_v31, %v459_v32  ;;  %v1405_v31 = vld [vmem:[#allocation8 + $0x88] sm:$0xff] }
 0x10c   : > { %1290 = vmatprep.subr.bf16.mxu0 %v5493_v45  ;;  %1332 = vmatpush1.bf16.msra.mxu1 %v5486_v2  ;;  %v5535_v45 = vcombine.high %v463_v39, %v467_v40  ;;  %v1400_v2 = vld [vmem:[#allocation8 + $0x60] sm:$0xff]  ;;  %v1409_v32 = vld [vmem:[#allocation8 + $0xa8] sm:$0xff] }
 0x10d   : > { %1333 = vmatprep.subr.bf16.mxu1 %v5495_v4  ;;  %v5559_v4 = vcombine.high %v487_v61, %v491_v62  ;;  %v5577_v8 = vcombine.high %v1396_v1, %v1400_v2 }
 0x10f   : > { %1291 = vmatpush1.bf16.msra.mxu0 %v5492_v50  ;;  %v5534_v50 = vcombine.low %v463_v39, %v467_v40  ;;  %v1413_v39 = vld [vmem:[#allocation8 + $0xc8] sm:$0xff] }
 0x110   : > { %1292 = vmatprep.subr.bf16.mxu0 %v5501_v52  ;;  %1334 = vmatpush1.bf16.msra.mxu1 %v5494_v10  ;;  %v5543_v52 = vcombine.high %v471_v22, %v475_v47  ;;  %v1408_v10 = vld [vmem:[#allocation8 + $0xa0] sm:$0xff]  ;;  %v1417_v40 = vld [vmem:[#allocation8 + $0xe8] sm:$0xff] }
 0x111   : > { %1335 = vmatprep.subr.bf16.mxu1 %v5503_v12  ;;  %v5567_v12 = vcombine.high %v495_v6, %v499_v7  ;;  %v5585_v16 = vcombine.high %v1404_v9, %v1408_v10 }
 0x113   : > { %1293 = vmatpush1.bf16.msra.mxu0 %v5500_v58  ;;  %v5542_v58 = vcombine.low %v471_v22, %v475_v47  ;;  %v1425_v22 = vld [vmem:[#allocation8 + $0x128] sm:$0xff] }
 0x114   : > { %1294 = vmatprep.subr.bf16.mxu0 %v5509_v60  ;;  %1336 = vmatpush1.bf16.msra.mxu1 %v5502_v18  ;;  %v5551_v60 = vcombine.high %v479_v54, %v483_v55  ;;  %v1416_v18 = vld [vmem:[#allocation8 + $0xe0] sm:$0xff] }
 0x115   : > { %1337 = vmatprep.subr.bf16.mxu1 %v5511_v20  ;;  %v5571_v20 = vcombine.high %v1389_v14, %v1393_v15  ;;  %v5593_v25 = vcombine.high %v1412_v17, %v1416_v18 }
 0x117   : > { %1295 = vmatpush1.bf16.msra.mxu0 %v5508_v3  ;;  %v5550_v3 = vcombine.low %v479_v54, %v483_v55  ;;  %v1433_v54 = vld [vmem:[#allocation8 + $0x168] sm:$0xff]  ;;  %v5625_v55 = vcombine.high %v1444_v48, %v1448_v49 }
 0x118   : > { %1296 = vmatprep.subr.bf16.mxu0 %v5517_v5  ;;  %1338 = vmatpush1.bf16.msra.mxu1 %v5510_v27  ;;  %v5568_v5 = vcombine.low %v1388_v56, %v1392_v57  ;;  %v1424_v27 = vld [vmem:[#allocation8 + $0x120] sm:$0xff] }
 0x119   : > { %1339 = vmatprep.subr.bf16.mxu1 %v5519_v29  ;;  %v5579_v29 = vcombine.high %v1397_v23, %v1401_v24  ;;  %v5601_v33 = vcombine.high %v1420_v26, %v1424_v27  ;;  %v1452_v56 = vld [vmem:[#allocation8 + $0x200] sm:$0xff] }
 0x11a   : > { %v1456_v57 = vld [vmem:[#allocation8 + $0x220] sm:$0xff] }
 0x11b   : > { %1297 = vmatpush1.bf16.msra.mxu0 %v5516_v11  ;;  %v5558_v11 = vcombine.low %v487_v61, %v491_v62  ;;  %v1441_v61 = vld [vmem:[#allocation8 + $0x1a8] sm:$0xff]  ;;  %v5624_v62 = vcombine.low %v1444_v48, %v1448_v49 }
 0x11c   : > { %1298 = vmatprep.subr.bf16.mxu0 %v5525_v13  ;;  %1340 = vmatpush1.bf16.msra.mxu1 %v5518_v35  ;;  %v5576_v13 = vcombine.low %v1396_v1, %v1400_v2  ;;  %v1432_v35 = vld [vmem:[#allocation8 + $0x160] sm:$0xff] }
 0x11d   : > { %1341 = vmatprep.subr.bf16.mxu1 %v5527_v37  ;;  %v5587_v37 = vcombine.high %v1405_v31, %v1409_v32  ;;  %v5609_v41 = vcombine.high %v1428_v34, %v1432_v35  ;;  %v6784_v1 = vld [vmem:[#allocation8 + $0x400] sm:$0xff] }
 0x11e   : > { %v6786_v2 = vld [vmem:[#allocation8 + $0x420] sm:$0xff] }
 0x11f   : > { %1299 = vmatpush1.bf16.msra.mxu0 %v5524_v19  ;;  %v5566_v19 = vcombine.low %v495_v6, %v499_v7  ;;  %v6790_v6 = vld [vmem:[#allocation8 + $0x428] sm:$0xff] }
 0x120   : > { %1300 = vmatprep.subr.bf16.mxu0 %v5533_v21  ;;  %1342 = vmatpush1.bf16.msra.mxu1 %v5526_v43  ;;  %v5584_v21 = vcombine.low %v1404_v9, %v1408_v10  ;;  %v1440_v43 = vld [vmem:[#allocation8 + $0x1a0] sm:$0xff] }
 0x121   : > { %1343 = vmatprep.subr.bf16.mxu1 %v5535_v45  ;;  %v5595_v45 = vcombine.high %v1413_v39, %v1417_v40  ;;  %v5617_v47 = vcombine.high %v1436_v42, %v1440_v43 }
 0x123   : > { %1301 = vmatpush1.bf16.msra.mxu0 %v5532_v28  ;;  %v5570_v28 = vcombine.low %v1389_v14, %v1393_v15  ;;  %v1468_v15 = vld [vmem:[#allocation8 + $0x280] sm:$0xff] }
 0x124   : > { %1302 = vmatprep.subr.bf16.mxu0 %v5541_v30  ;;  %1344 = vmatpush1.bf16.msra.mxu1 %v5534_v50  ;;  %v5592_v30 = vcombine.low %v1412_v17, %v1416_v18  ;;  %v5594_v50 = vcombine.low %v1413_v39, %v1417_v40  ;;  %v1492_v40 = vld [vmem:[#allocation8 + $0x340] sm:$0xff] }
 0x125   : > { %1345 = vmatprep.subr.bf16.mxu1 %v5543_v52  ;;  %v5616_v52 = vcombine.low %v1436_v42, %v1440_v43 }
 0x127   : > { %1303 = vmatpush1.bf16.msra.mxu0 %v5540_v36  ;;  %v5578_v36 = vcombine.low %v1397_v23, %v1401_v24  ;;  %v1476_v24 = vld [vmem:[#allocation8 + $0x2c0] sm:$0xff] }
 0x128   : > { %1304 = vmatprep.subr.bf16.mxu0 %v5549_v38  ;;  %1346 = vmatpush1.bf16.msra.mxu1 %v5542_v58  ;;  %v5600_v38 = vcombine.low %v1420_v26, %v1424_v27 }
 0x129   : > { %1347 = vmatprep.subr.bf16.mxu1 %v5551_v60  ;;  %v1437_v60 = vld [vmem:[#allocation8 + $0x188] sm:$0xff] }
 0x12a   : > { %v5619_v10 = vcombine.high %v1437_v60, %v1441_v61  ;;  %v5618_v17 = vcombine.low %v1437_v60, %v1441_v61  ;;  %v1497_v60 = vld [vmem:[#allocation8 + $0x368] sm:$0xff] }
 0x12b   : > { %1305 = vmatpush1.bf16.msra.mxu0 %v5548_v44  ;;  %v5586_v44 = vcombine.low %v1405_v31, %v1409_v32  ;;  %v1484_v32 = vld [vmem:[#allocation8 + $0x300] sm:$0xff] }
 0x12c   : > { %1306 = vmatprep.subr.bf16.mxu0 %v5557_v46  ;;  %1348 = vmatpush1.bf16.msra.mxu1 %v5550_v3  ;;  %v1421_v46 = vld [vmem:[#allocation8 + $0x108] sm:$0xff] }
 0x12d   : > { %1349 = vmatprep.subr.bf16.mxu1 %v5559_v4  ;;  %v5602_v58 = vcombine.low %v1421_v46, %v1425_v22  ;;  %v6788_v3 = vld [vmem:[#allocation8 + $0x408] sm:$0xff]  ;;  %v1460_v4 = vld [vmem:[#allocation8 + $0x240] sm:$0xff] }
 0x12e   : > { %v5698_v9 = vcombine.low %v6788_v3, %v6790_v6 }
 0x12f   : > { %1307 = vmatpush1.bf16.msra.mxu0 %v5556_v51  ;;  %v5603_v51 = vcombine.high %v1421_v46, %v1425_v22  ;;  %v1500_v22 = vld [vmem:[#allocation8 + $0x380] sm:$0xff] }
 0x130   : > { %1308 = vmatprep.subr.bf16.mxu0 %v5565_v53  ;;  %1350 = vmatpush1.bf16.msra.mxu1 %v5558_v11  ;;  %v1429_v53 = vld [vmem:[#allocation8 + $0x148] sm:$0xff]  ;;  %v5632_v11 = vcombine.low %v1452_v56, %v1456_v57 }
 0x131   : > { %1351 = vmatprep.subr.bf16.mxu1 %v5567_v12  ;;  %v5610_v7 = vcombine.low %v1429_v53, %v1433_v54  ;;  %v1445_v12 = vld [vmem:[#allocation8 + $0x1c8] sm:$0xff] }
 0x133   : > { %1309 = vmatpush1.bf16.msra.mxu0 %v5564_v59  ;;  %v5611_v59 = vcombine.high %v1429_v53, %v1433_v54  ;;  %v1508_v54 = vld [vmem:[#allocation8 + $0x3c0] sm:$0xff] }
 0x134   : > { %4502 = vmatprep.subr.bf16.mxu0 %v5569_v63  ;;  %1352 = vmatpush1.bf16.msra.mxu1 %v5566_v19  ;;  %v5633_v63 = vcombine.high %v1452_v56, %v1456_v57 }
 0x135   : > { %4674 = vmatprep.subr.bf16.mxu1 %v5571_v20  ;;  %v1453_v20 = vld [vmem:[#allocation8 + $0x208] sm:$0xff] }
 0x136   : > { %1311 = vmatmul.mubr.bf16.vlgmr.msra.gmra.mrb[4].mxu0 %v6776_v0 }
 0x137   : > { %4503 = vmatpush1.bf16.msra.mxu0 %v5568_v5  ;;  %1354 = vmatmul.mubr.bf16.vlgmr.msra.gmra.mrb[4].mxu1 %v6776_v0  ;;  %v5608_v0 = vcombine.low %v1428_v34, %v1432_v35  ;;  %v1464_v5 = vld [vmem:[#allocation8 + $0x260] sm:$0xff] }
 0x138   : > { %4504 = vmatprep.subr.bf16.mxu0 %v5577_v8  ;;  %4675 = vmatpush1.bf16.msra.mxu1 %v5570_v28  ;;  %v5696_v8 = vcombine.low %v6784_v1, %v6786_v2  ;;  %v5641_v14 = vcombine.high %v1460_v4, %v1464_v5  ;;  %v5640_v19 = vcombine.low %v1460_v4, %v1464_v5  ;;  %v1501_v5 = vld [vmem:[#allocation8 + $0x388] sm:$0xff] }
 0x139   : > { %4676 = vmatprep.subr.bf16.mxu1 %v5579_v29  ;;  %v1461_v29 = vld [vmem:[#allocation8 + $0x248] sm:$0xff] }
 0x13b   : > { %4505 = vmatpush1.bf16.msra.mxu0 %v5576_v13  ;;  %v1449_v13 = vld [vmem:[#allocation8 + $0x1e8] sm:$0xff] }
 0x13c   : > { %4506 = vmatprep.subr.bf16.mxu0 %v5585_v16  ;;  %4677 = vmatpush1.bf16.msra.mxu1 %v5578_v36  ;;  %v1472_v16 = vld [vmem:[#allocation8 + $0x2a0] sm:$0xff]  ;;  %v5627_v18 = vcombine.high %v1445_v12, %v1449_v13  ;;  %v5626_v26 = vcombine.low %v1445_v12, %v1449_v13  ;;  %v1509_v13 = vld [vmem:[#allocation8 + $0x3c8] sm:$0xff] }
 0x13d   : > { %4678 = vmatprep.subr.bf16.mxu1 %v5587_v37  ;;  %v5649_v23 = vcombine.high %v1468_v15, %v1472_v16  ;;  %v5648_v28 = vcombine.low %v1468_v15, %v1472_v16  ;;  %v1469_v37 = vld [vmem:[#allocation8 + $0x288] sm:$0xff] }
 0x13f   : > { %4507 = vmatpush1.bf16.msra.mxu0 %v5584_v21  ;;  %v1457_v21 = vld [vmem:[#allocation8 + $0x228] sm:$0xff] }
 0x140   : > { %4508 = vmatprep.subr.bf16.mxu0 %v5593_v25  ;;  %4679 = vmatpush1.bf16.msra.mxu1 %v5586_v44  ;;  %v1480_v25 = vld [vmem:[#allocation8 + $0x2e0] sm:$0xff]  ;;  %v5635_v27 = vcombine.high %v1453_v20, %v1457_v21  ;;  %v5634_v34 = vcombine.low %v1453_v20, %v1457_v21 }
 0x141   : > { %4680 = vmatprep.subr.bf16.mxu1 %v5595_v45  ;;  %v5657_v31 = vcombine.high %v1476_v24, %v1480_v25  ;;  %v5656_v36 = vcombine.low %v1476_v24, %v1480_v25  ;;  %v1477_v45 = vld [vmem:[#allocation8 + $0x2c8] sm:$0xff] }
 0x143   : > { %4509 = vmatpush1.bf16.msra.mxu0 %v5592_v30  ;;  %v1465_v30 = vld [vmem:[#allocation8 + $0x268] sm:$0xff] }
 0x144   : > { %4510 = vmatprep.subr.bf16.mxu0 %v5601_v33  ;;  %4681 = vmatpush1.bf16.msra.mxu1 %v5594_v50  ;;  %v1488_v33 = vld [vmem:[#allocation8 + $0x320] sm:$0xff]  ;;  %v5643_v35 = vcombine.high %v1461_v29, %v1465_v30  ;;  %v5642_v42 = vcombine.low %v1461_v29, %v1465_v30 }
 0x145   : > { %4682 = vmatprep.subr.bf16.mxu1 %v5603_v51  ;;  %v5665_v39 = vcombine.high %v1484_v32, %v1488_v33  ;;  %v5664_v44 = vcombine.low %v1484_v32, %v1488_v33  ;;  %v1485_v51 = vld [vmem:[#allocation8 + $0x308] sm:$0xff] }
 0x147   : > { %4511 = vmatpush1.bf16.msra.mxu0 %v5600_v38  ;;  %v1473_v38 = vld [vmem:[#allocation8 + $0x2a8] sm:$0xff] }
 0x148   : > { %4512 = vmatprep.subr.bf16.mxu0 %v5609_v41  ;;  %4683 = vmatpush1.bf16.msra.mxu1 %v5602_v58  ;;  %v1496_v41 = vld [vmem:[#allocation8 + $0x360] sm:$0xff]  ;;  %v5651_v43 = vcombine.high %v1469_v37, %v1473_v38  ;;  %v5650_v48 = vcombine.low %v1469_v37, %v1473_v38 }
 0x149   : > { %4684 = vmatprep.subr.bf16.mxu1 %v5611_v59  ;;  %v5673_v46 = vcombine.high %v1492_v40, %v1496_v41  ;;  %v5672_v50 = vcombine.low %v1492_v40, %v1496_v41  ;;  %v1493_v59 = vld [vmem:[#allocation8 + $0x348] sm:$0xff]  ;;  %v1524_v38 = vld [vmem:[#allocation8 + $0x440] sm:$0xff] }
 0x14b   : > { %4513 = vmatpush1.bf16.msra.mxu0 %v5608_v0  ;;  %v1481_v0 = vld [vmem:[#allocation8 + $0x2e8] sm:$0xff] }
 0x14c   : > { %4514 = vmatprep.subr.bf16.mxu0 %v5617_v47  ;;  %4685 = vmatpush1.bf16.msra.mxu1 %v5610_v7  ;;  %v1504_v47 = vld [vmem:[#allocation8 + $0x3a0] sm:$0xff]  ;;  %v5659_v49 = vcombine.high %v1477_v45, %v1481_v0  ;;  %v5658_v56 = vcombine.low %v1477_v45, %v1481_v0  ;;  %v1505_v7 = vld [vmem:[#allocation8 + $0x3a8] sm:$0xff] }
 0x14d   : > { %4686 = vmatprep.subr.bf16.mxu1 %v5619_v10  ;;  %v5681_v53 = vcombine.high %v1500_v22, %v1504_v47  ;;  %v5680_v58 = vcombine.low %v1500_v22, %v1504_v47  ;;  %v5697_v10 = vcombine.high %v6784_v1, %v6786_v2  ;;  %v5683_v12 = vcombine.high %v1501_v5, %v1505_v7 }
 0x14e   : > { %v5682_v15 = vcombine.low %v1501_v5, %v1505_v7  ;;  %v1545_v5 = vld [vmem:[#allocation8 + $0x4e8] sm:$0xff] }
 0x14f   : > { %4515 = vmatpush1.bf16.msra.mxu0 %v5616_v52  ;;  %v1489_v52 = vld [vmem:[#allocation8 + $0x328] sm:$0xff] }
 0x150   : > { %4516 = vmatprep.subr.bf16.mxu0 %v5625_v55  ;;  %4687 = vmatpush1.bf16.msra.mxu1 %v5618_v17  ;;  %v1512_v55 = vld [vmem:[#allocation8 + $0x3e0] sm:$0xff]  ;;  %v5667_v57 = vcombine.high %v1485_v51, %v1489_v52 }
 0x151   : > { %4688 = vmatprep.subr.bf16.mxu1 %v5627_v18  ;;  %v5689_v61 = vcombine.high %v1508_v54, %v1512_v55  ;;  %v5688_v4 = vcombine.low %v1508_v54, %v1512_v55  ;;  %v5699_v18 = vcombine.high %v6788_v3, %v6790_v6 }
 0x153   : > { %4517 = vmatpush1.bf16.msra.mxu0 %v5624_v62  ;;  %v5666_v62 = vcombine.low %v1485_v51, %v1489_v52  ;;  %v1533_v51 = vld [vmem:[#allocation8 + $0x488] sm:$0xff] }
 0x154   : > { %4518 = vmatprep.subr.bf16.mxu0 %v5633_v63  ;;  %4689 = vmatpush1.bf16.msra.mxu1 %v5626_v26  ;;  %v5675_v63 = vcombine.high %v1493_v59, %v1497_v60  ;;  %v1537_v52 = vld [vmem:[#allocation8 + $0x4a8] sm:$0xff] }
 0x155   : > { %4690 = vmatprep.subr.bf16.mxu1 %v5635_v27 }
 0x157   : > { %4519 = vmatpush1.bf16.msra.mxu0 %v5632_v11  ;;  %v5674_v11 = vcombine.low %v1493_v59, %v1497_v60  ;;  %v5715_v59 = vcombine.high %v1533_v51, %v1537_v52  ;;  %v1540_v60 = vld [vmem:[#allocation8 + $0x4c0] sm:$0xff] }
 0x158   : > { %4520 = vmatprep.subr.bf16.mxu0 %v5641_v14  ;;  %4691 = vmatpush1.bf16.msra.mxu1 %v5634_v34  ;;  %v1513_v14 = vld [vmem:[#allocation8 + $0x3e8] sm:$0xff] }
 0x159   : > { %4692 = vmatprep.subr.bf16.mxu1 %v5643_v35  ;;  %v5691_v16 = vcombine.high %v1509_v13, %v1513_v14  ;;  %v5690_v17 = vcombine.low %v1509_v13, %v1513_v14  ;;  %v1548_v13 = vld [vmem:[#allocation8 + $0x500] sm:$0xff] }
 0x15b   : > { %4521 = vmatpush1.bf16.msra.mxu0 %v5640_v19  ;;  %v502_v19 = vlaneseq }
 0x15c   : > { %4522 = vmatprep.subr.bf16.mxu0 %v5649_v23  ;;  %4693 = vmatpush1.bf16.msra.mxu1 %v5642_v42  ;;  %v6805_v23 = vld [vmem:[#allocation7] sm:$0xff]  ;;  %v1528_v42 = vld [vmem:[#allocation8 + $0x460] sm:$0xff] }
 0x15d   : > { %4694 = vmatprep.subr.bf16.mxu1 %v5651_v43  ;;  %v6800_v20 = vshrl.u32 %v502_v19, 7  ;;  %v1525_v43 = vld [vmem:[#allocation8 + $0x448] sm:$0xff]  ;;  %v5705_v22 = vcombine.high %v1524_v38, %v1528_v42  ;;  %v5704_v54 = vcombine.low %v1524_v38, %v1528_v42  ;;  %v1564_v38 = vld [vmem:[#allocation8 + $0x580] sm:$0xff] }
 0x15e   : > { %v1569_v42 = vld [vmem:[#allocation8 + $0x5a8] sm:$0xff] }
 0x15f   : > { %4523 = vmatpush1.bf16.msra.mxu0 %v5648_v28  ;;  %v6803_v21 = vsub.s32 0, %v6800_v20  ;;  %v6808_v24 = vsub.s32 1, %v6800_v20  ;;  %v6815_v35 = vsub.s32 2, %v6800_v20 }
 0x160   : > { %4524 = vmatprep.subr.bf16.mxu0 %v5657_v31  ;;  %4695 = vmatpush1.bf16.msra.mxu1 %v5650_v48  ;;  %v1532_v48 = vld [vmem:[#allocation8 + $0x480] sm:$0xff] }
 0x161   : > { %4696 = vmatprep.subr.bf16.mxu1 %v5659_v49  ;;  %v505_v25 = vrot.slane %v6805_v23, %v6803_v21  ;;  %v509_v26 = vrot.slane %v6805_v23, %v6808_v24 }
 0x163   : > { %4525 = vmatpush1.bf16.msra.mxu0 %v5656_v36 }
 0x164   : > { %4526 = vmatprep.subr.bf16.mxu0 %v5665_v39  ;;  %4697 = vmatpush1.bf16.msra.mxu1 %v5658_v56  ;;  %v6818_v39 = vsub.s32 3, %v6800_v20 }
 0x165   : > { %4698 = vmatprep.subr.bf16.mxu1 %v5667_v57 }
 0x166   : > { %v517_v49 = vrot.slane %v6805_v23, %v6818_v39 }
 0x167   : > { %4527 = vmatpush1.bf16.msra.mxu0 %v5664_v44  ;;  %v1529_v44 = vld [vmem:[#allocation8 + $0x468] sm:$0xff] }
 0x168   : > { %4528 = vmatprep.subr.bf16.mxu0 %v5673_v46  ;;  %4699 = vmatpush1.bf16.msra.mxu1 %v5666_v62  ;;  %v513_v46 = vrot.slane %v6805_v23, %v6815_v35  ;;  %v5707_v47 = vcombine.high %v1525_v43, %v1529_v44  ;;  %v5706_v55 = vcombine.low %v1525_v43, %v1529_v44 }
 0x169   : > { %4700 = vmatprep.subr.bf16.mxu1 %v5675_v63  ;;  %v1544_v63 = vld [vmem:[#allocation8 + $0x4e0] sm:$0xff] }
 0x16b   : > { %4529 = vmatpush1.bf16.msra.mxu0 %v5672_v50  ;;  %v1536_v50 = vld [vmem:[#allocation8 + $0x4a0] sm:$0xff] }
 0x16c   : > { %4530 = vmatprep.subr.bf16.mxu0 %v5681_v53  ;;  %4701 = vmatpush1.bf16.msra.mxu1 %v5674_v11  ;;  %v5712_v6 = vcombine.low %v1532_v48, %v1536_v50  ;;  %v5721_v11 = vcombine.high %v1540_v60, %v1544_v63 }
 0x16d   : > { %4702 = vmatprep.subr.bf16.mxu1 %v5683_v12 }
 0x16f   : > { %4531 = vmatpush1.bf16.msra.mxu0 %v5680_v58  ;;  %v5713_v58 = vcombine.high %v1532_v48, %v1536_v50  ;;  %v1576_v48 = vld [vmem:[#allocation8 + $0x5e0] sm:$0xff]  ;;  %v1577_v50 = vld [vmem:[#allocation8 + $0x5e8] sm:$0xff] }
 0x170   : > { %4532 = vmatprep.subr.bf16.mxu0 %v5689_v61  ;;  %4703 = vmatpush1.bf16.msra.mxu1 %v5682_v15  ;;  %v1552_v15 = vld [vmem:[#allocation8 + $0x520] sm:$0xff] }
 0x171   : > { %4704 = vmatprep.subr.bf16.mxu1 %v5691_v16  ;;  %v1549_v16 = vld [vmem:[#allocation8 + $0x508] sm:$0xff] }
 0x173   : > { %4533 = vmatpush1.bf16.msra.mxu0 %v5688_v4  ;;  %v1541_v4 = vld [vmem:[#allocation8 + $0x4c8] sm:$0xff] }
 0x174   : > { %4545 = vmatprep.subr.bf16.mxu0 %v5697_v10  ;;  %4705 = vmatpush1.bf16.msra.mxu1 %v5690_v17  ;;  %v5723_v12 = vcombine.high %v1541_v4, %v1545_v5  ;;  %v1553_v17 = vld [vmem:[#allocation8 + $0x528] sm:$0xff] }
 0x175   : > { %4717 = vmatprep.subr.bf16.mxu1 %v5699_v18 }
 0x1c9   : > { %v1226_v27 = vpop.f32.mrb[0].mxu0  ;;  %v1269_v53 = vpop.f32.mrb[0].mxu1 }
 0x1ca   : > { %v1227_v28 = vadd.f32 %v1226_v27, %v505_v25  ;;  %v1228_v29 = vpop.f32.mrb[1].mxu0  ;;  %v1270_v56 = vadd.f32 %v1269_v53, %v513_v46  ;;  %v1271_v57 = vpop.f32.mrb[1].mxu1  ;;  %v5729_v27 = vcombine.high %v1548_v13, %v1552_v15 }
 0x1cb   : > { %v1229_v30 = vadd.f32 %v1228_v29, %v509_v26  ;;  %v1230_v31 = vpop.f32.mrb[2].mxu0  ;;  %v1272_v61 = vadd.f32 %v1271_v57, %v517_v49  ;;  %v1273_v62 = vpop.f32.mrb[2].mxu1  ;;  %v1556_v29 = vld [vmem:[#allocation8 + $0x540] sm:$0xff]  ;;  %v1581_v57 = vld [vmem:[#allocation8 + $0x608] sm:$0xff] }
 0x1cc   : > { %v1231_v32 = vadd.f32 %v1230_v31, %v505_v25  ;;  %v1232_v33 = vpop.f32.mrb[3].mxu0  ;;  %v1364_v36 = vmax.f32 %v1227_v28, 0.0  ;;  %v1366_v1 = vmax.f32 %v1270_v56, 0.0  ;;  %v1274_v2 = vadd.f32 %v1273_v62, %v513_v46  ;;  %v1557_v31 = vld [vmem:[#allocation8 + $0x548] sm:$0xff]  ;;  %v1584_v56 = vld [vmem:[#allocation8 + $0x620] sm:$0xff] }
 0x1cd   : > { %v1233_v34 = vadd.f32 %v1232_v33, %v509_v26  ;;  %v1365_v40 = vmax.f32 %v1229_v30, 0.0  ;;  %v1367_v7 = vmax.f32 %v1272_v61, 0.0  ;;  %v5720_v25 = vcombine.low %v1540_v60, %v1544_v63  ;;  %v1560_v30 = vld [vmem:[#allocation8 + $0x560] sm:$0xff] }
 0x1ce   : > { %v1372_v37 = vmax.f32 %v1231_v32, 0.0  ;;  %v1374_v10 = vmax.f32 %v1274_v2, 0.0  ;;  %v5722_v26 = vcombine.low %v1541_v4, %v1545_v5  ;;  %v5731_v28 = vcombine.high %v1549_v16, %v1553_v17  ;;  %v1561_v32 = vld [vmem:[#allocation8 + $0x568] sm:$0xff]  ;;  %v1588_v63 = vld [vmem:[#allocation8 + $0x640] sm:$0xff] }
 0x1cf   : > { %v1373_v41 = vmax.f32 %v1233_v34, 0.0  ;;  %v5728_v33 = vcombine.low %v1548_v13, %v1552_v15  ;;  %v5730_v34 = vcombine.low %v1549_v16, %v1553_v17  ;;  %v5736_v43 = vcombine.low %v1556_v29, %v1560_v30  ;;  %v1592_v4 = vld [vmem:[#allocation8 + $0x660] sm:$0xff]  ;;  %v1589_v5 = vld [vmem:[#allocation8 + $0x648] sm:$0xff] }
 0x1d0   : > { %v6820_v45 = vpack.c.bf16 %v1372_v37, %v1364_v36  ;;  %v6838_v18 = vpack.c.bf16 %v1374_v10, %v1366_v1  ;;  %v5737_v36 = vcombine.high %v1556_v29, %v1560_v30  ;;  %v5739_v37 = vcombine.high %v1557_v31, %v1561_v32  ;;  %v1593_v1 = vld [vmem:[#allocation8 + $0x668] sm:$0xff]  ;;  %v1604_v16 = vld [vmem:[#allocation8 + $0x6c0] sm:$0xff] }
 0x1d1   : > { %v6822_v0 = vpack.c.bf16 %v1373_v41, %v1365_v40  ;;  %v1568_v40 = vld [vmem:[#allocation8 + $0x5a0] sm:$0xff]  ;;  %v1565_v41 = vld [vmem:[#allocation8 + $0x588] sm:$0xff]  ;;  %v5738_v44 = vcombine.low %v1557_v31, %v1561_v32  ;;  %v5770_v13 = vcombine.low %v1589_v5, %v1593_v1 }
 0x1d2   : > { %v5745_v46 = vcombine.high %v1564_v38, %v1568_v40  ;;  %v1597_v10 = vld [vmem:[#allocation8 + $0x688] sm:$0xff]  ;;  %v1608_v17 = vld [vmem:[#allocation8 + $0x6e0] sm:$0xff] }
 0x1d3   : > { %4534 = vmatprep.mubr.bf16.mxu0 %v6822_v0  ;;  %4706 = vmatprep.mubr.bf16.mxu1 %v6822_v0  ;;  %v5785_v29 = vcombine.high %v1604_v16, %v1608_v17  ;;  %v1612_v31 = vld [vmem:[#allocation8 + $0x700] sm:$0xff] }
 0x1d4   : > { %4535 = vmatmul.mubr.bf16.vlgmr.msra.gmra.mrb[8].mxu0 %v6820_v45  ;;  %4707 = vmatmul.mubr.bf16.vlgmr.msra.gmra.mrb[8].mxu1 %v6820_v45  ;;  %v1616_v32 = vld [vmem:[#allocation8 + $0x720] sm:$0xff] }
 0x1d5   : > { %4546 = vmatpush1.bf16.msra.mxu0 %v5696_v8  ;;  %4718 = vmatpush1.bf16.msra.mxu1 %v5698_v9  ;;  %v1275_v8 = vpop.f32.mrb[3].mxu1  ;;  %v5714_v9 = vcombine.low %v1533_v51, %v1537_v52  ;;  %v5744_v51 = vcombine.low %v1564_v38, %v1568_v40  ;;  %v5746_v52 = vcombine.low %v1565_v41, %v1569_v42 }
 0x1d6   : > { %4547 = vmatprep.subr.bf16.mxu0 %v5705_v22  ;;  %4719 = vmatprep.subr.bf16.mxu1 %v5707_v47  ;;  %v1276_v3 = vadd.f32 %v1275_v8, %v517_v49  ;;  %v5747_v22 = vcombine.high %v1565_v41, %v1569_v42  ;;  %v1572_v47 = vld [vmem:[#allocation8 + $0x5c0] sm:$0xff]  ;;  %v1573_v49 = vld [vmem:[#allocation8 + $0x5c8] sm:$0xff]  ;;  %v5793_v38 = vcombine.high %v1612_v31, %v1616_v32 }
 0x1d7   : > { %v5753_v53 = vcombine.high %v1572_v47, %v1576_v48  ;;  %v5754_v60 = vcombine.low %v1573_v49, %v1577_v50  ;;  %v1620_v41 = vld [vmem:[#allocation8 + $0x740] sm:$0xff] }
 0x1d8   : > { %v1375_v14 = vmax.f32 %v1276_v3, 0.0  ;;  %v5771_v3 = vcombine.high %v1589_v5, %v1593_v1  ;;  %v1624_v42 = vld [vmem:[#allocation8 + $0x760] sm:$0xff] }
 0x1d9   : > { %4548 = vmatpush1.bf16.msra.mxu0 %v5704_v54  ;;  %4720 = vmatpush1.bf16.msra.mxu1 %v5706_v55  ;;  %v5755_v54 = vcombine.high %v1573_v49, %v1577_v50  ;;  %v1580_v55 = vld [vmem:[#allocation8 + $0x600] sm:$0xff]  ;;  %v6845_v50 = vsub.s32 4, %v6800_v20 }
 0x1da   : > { %4549 = vmatprep.subr.bf16.mxu0 %v5713_v58  ;;  %4721 = vmatprep.subr.bf16.mxu1 %v5715_v59  ;;  %v6840_v19 = vpack.c.bf16 %v1375_v14, %v1367_v7  ;;  %v1585_v58 = vld [vmem:[#allocation8 + $0x628] sm:$0xff]  ;;  %v5752_v59 = vcombine.low %v1572_v47, %v1576_v48  ;;  %v5761_v61 = vcombine.high %v1580_v55, %v1584_v56  ;;  %v1628_v49 = vld [vmem:[#allocation8 + $0x780] sm:$0xff] }
 0x1db   : > { %v5763_v62 = vcombine.high %v1581_v57, %v1585_v58  ;;  %v5760_v2 = vcombine.low %v1580_v55, %v1584_v56  ;;  %v5762_v8 = vcombine.low %v1581_v57, %v1585_v58  ;;  %v5769_v7 = vcombine.high %v1588_v63, %v1592_v4 }
 0x1dc   : > { %4577 = vmatprep.mubr.bf16.mxu0 %v6840_v19  ;;  %4749 = vmatprep.mubr.bf16.mxu1 %v6840_v19  ;;  %v5801_v47 = vcombine.high %v1620_v41, %v1624_v42  ;;  %v5800_v55 = vcombine.low %v1620_v41, %v1624_v42 }
 0x1dd   : > { %4550 = vmatpush1.bf16.msra.mxu0 %v5712_v6  ;;  %4722 = vmatpush1.bf16.msra.mxu1 %v5714_v9  ;;  %v1596_v6 = vld [vmem:[#allocation8 + $0x680] sm:$0xff] }
 0x1de   : > { %4551 = vmatprep.subr.bf16.mxu0 %v5721_v11  ;;  %4723 = vmatprep.subr.bf16.mxu1 %v5723_v12  ;;  %v1600_v9 = vld [vmem:[#allocation8 + $0x6a0] sm:$0xff]  ;;  %v1601_v11 = vld [vmem:[#allocation8 + $0x6a8] sm:$0xff]  ;;  %v5768_v12 = vcombine.low %v1588_v63, %v1592_v4 }
 0x1df   : > { %v5777_v14 = vcombine.high %v1596_v6, %v1600_v9  ;;  %v5779_v15 = vcombine.high %v1597_v10, %v1601_v11  ;;  %v1641_v63 = vld [vmem:[#allocation8 + $0x7e8] sm:$0xff] }
 0x1e1   : > { %4552 = vmatpush1.bf16.msra.mxu0 %v5720_v25  ;;  %4724 = vmatpush1.bf16.msra.mxu1 %v5722_v26  ;;  %v1605_v25 = vld [vmem:[#allocation8 + $0x6c8] sm:$0xff] }
 0x1e2   : > { %4553 = vmatprep.subr.bf16.mxu0 %v5729_v27  ;;  %4725 = vmatprep.subr.bf16.mxu1 %v5731_v28  ;;  %v1609_v26 = vld [vmem:[#allocation8 + $0x6e8] sm:$0xff]  ;;  %v5776_v27 = vcombine.low %v1596_v6, %v1600_v9  ;;  %v5778_v28 = vcombine.low %v1597_v10, %v1601_v11  ;;  %v1648_v10 = vld [vmem:[#allocation8 + $0x820] sm:$0xff] }
 0x1e3   : > { %v5787_v30 = vcombine.high %v1605_v25, %v1609_v26  ;;  %v1645_v11 = vld [vmem:[#allocation8 + $0x808] sm:$0xff] }
 0x1e5   : > { %4554 = vmatpush1.bf16.msra.mxu0 %v5728_v33  ;;  %4726 = vmatpush1.bf16.msra.mxu1 %v5730_v34  ;;  %v1613_v33 = vld [vmem:[#allocation8 + $0x708] sm:$0xff] }
 0x1e6   : > { %4555 = vmatprep.subr.bf16.mxu0 %v5737_v36  ;;  %4727 = vmatprep.subr.bf16.mxu1 %v5739_v37  ;;  %v1617_v34 = vld [vmem:[#allocation8 + $0x728] sm:$0xff]  ;;  %v5784_v36 = vcombine.low %v1604_v16, %v1608_v17  ;;  %v5786_v37 = vcombine.low %v1605_v25, %v1609_v26 }
 0x1e7   : > { %v5795_v40 = vcombine.high %v1613_v33, %v1617_v34 }
 0x1e9   : > { %4556 = vmatpush1.bf16.msra.mxu0 %v5736_v43  ;;  %4728 = vmatpush1.bf16.msra.mxu1 %v5738_v44  ;;  %v1621_v43 = vld [vmem:[#allocation8 + $0x748] sm:$0xff] }
 0x1ea   : > { %4557 = vmatprep.subr.bf16.mxu0 %v5745_v46  ;;  %4729 = vmatprep.subr.bf16.mxu1 %v5747_v22  ;;  %v1625_v44 = vld [vmem:[#allocation8 + $0x768] sm:$0xff]  ;;  %v5792_v46 = vcombine.low %v1612_v31, %v1616_v32  ;;  %v5794_v22 = vcombine.low %v1613_v33, %v1617_v34  ;;  %v1652_v32 = vld [vmem:[#allocation8 + $0x840] sm:$0xff]  ;;  %v6858_v34 = vsub.s32 7, %v6800_v20 }
 0x1eb   : > { %v5803_v48 = vcombine.high %v1621_v43, %v1625_v44  ;;  %v5802_v56 = vcombine.low %v1621_v43, %v1625_v44 }
 0x1ed   : > { %4558 = vmatpush1.bf16.msra.mxu0 %v5744_v51  ;;  %4730 = vmatpush1.bf16.msra.mxu1 %v5746_v52  ;;  %v1632_v51 = vld [vmem:[#allocation8 + $0x7a0] sm:$0xff]  ;;  %v1629_v52 = vld [vmem:[#allocation8 + $0x788] sm:$0xff] }
 0x1ee   : > { %4559 = vmatprep.subr.bf16.mxu0 %v5753_v53  ;;  %4731 = vmatprep.subr.bf16.mxu1 %v5755_v54  ;;  %v1633_v53 = vld [vmem:[#allocation8 + $0x7a8] sm:$0xff]  ;;  %v6848_v54 = vsub.s32 5, %v6800_v20  ;;  %v5809_v57 = vcombine.high %v1628_v49, %v1632_v51  ;;  %v5808_v5 = vcombine.low %v1628_v49, %v1632_v51  ;;  %v1664_v49 = vld [vmem:[#allocation8 + $0x8a0] sm:$0xff] }
 0x1ef   : > { %v5811_v58 = vcombine.high %v1629_v52, %v1633_v53  ;;  %v5810_v1 = vcombine.low %v1629_v52, %v1633_v53  ;;  %v1661_v51 = vld [vmem:[#allocation8 + $0x888] sm:$0xff] }
 0x1f0   : > { %v525_v4 = vrot.slane %v6805_v23, %v6848_v54  ;;  %v1665_v52 = vld [vmem:[#allocation8 + $0x8a8] sm:$0xff] }
 0x1f1   : > { %4560 = vmatpush1.bf16.msra.mxu0 %v5752_v59  ;;  %4732 = vmatpush1.bf16.msra.mxu1 %v5754_v60  ;;  %v1636_v59 = vld [vmem:[#allocation8 + $0x7c0] sm:$0xff]  ;;  %v521_v60 = vrot.slane %v6805_v23, %v6845_v50 }
 0x1f2   : > { %4561 = vmatprep.subr.bf16.mxu0 %v5761_v61  ;;  %4733 = vmatprep.subr.bf16.mxu1 %v5763_v62  ;;  %v1640_v61 = vld [vmem:[#allocation8 + $0x7e0] sm:$0xff]  ;;  %v1637_v62 = vld [vmem:[#allocation8 + $0x7c8] sm:$0xff] }
 0x1f3   : > { %v5818_v26 = vcombine.low %v1637_v62, %v1641_v63 }
 0x1f5   : > { %4562 = vmatpush1.bf16.msra.mxu0 %v5760_v2  ;;  %4734 = vmatpush1.bf16.msra.mxu1 %v5762_v8  ;;  %v5817_v8 = vcombine.high %v1636_v59, %v1640_v61 }
 0x1f6   : > { %4563 = vmatprep.subr.bf16.mxu0 %v5769_v7  ;;  %4735 = vmatprep.subr.bf16.mxu1 %v5771_v3  ;;  %v5819_v7 = vcombine.high %v1637_v62, %v1641_v63  ;;  %v1644_v3 = vld [vmem:[#allocation8 + $0x800] sm:$0xff] }
 0x1f7   : > { %v5824_v41 = vcombine.low %v1644_v3, %v1648_v10  ;;  %v1672_v63 = vld [vmem:[#allocation8 + $0x8e0] sm:$0xff] }
 0x1f9   : > { %4564 = vmatpush1.bf16.msra.mxu0 %v5768_v12  ;;  %4736 = vmatpush1.bf16.msra.mxu1 %v5770_v13  ;;  %v1649_v12 = vld [vmem:[#allocation8 + $0x828] sm:$0xff] }
 0x1fa   : > { %4565 = vmatprep.subr.bf16.mxu0 %v5777_v14  ;;  %4737 = vmatprep.subr.bf16.mxu1 %v5779_v15  ;;  %v5816_v15 = vcombine.low %v1636_v59, %v1640_v61  ;;  %v5827_v31 = vcombine.high %v1645_v11, %v1649_v12  ;;  %v5826_v43 = vcombine.low %v1645_v11, %v1649_v12  ;;  %v1668_v61 = vld [vmem:[#allocation8 + $0x8c0] sm:$0xff] }
 0x1fb   : > { %v5849_v11 = vcombine.high %v1668_v61, %v1672_v63 }
 0x1fd   : > { %4566 = vmatpush1.bf16.msra.mxu0 %v5776_v27  ;;  %4738 = vmatpush1.bf16.msra.mxu1 %v5778_v28 }
 0x1fe   : > { %4567 = vmatprep.subr.bf16.mxu0 %v5785_v29  ;;  %4739 = vmatprep.subr.bf16.mxu1 %v5787_v30  ;;  %v6855_v29 = vsub.s32 6, %v6800_v20  ;;  %v5825_v30 = vcombine.high %v1644_v3, %v1648_v10 }
 0x201   : > { %4568 = vmatpush1.bf16.msra.mxu0 %v5784_v36  ;;  %4740 = vmatpush1.bf16.msra.mxu1 %v5786_v37  ;;  %v1656_v36 = vld [vmem:[#allocation8 + $0x860] sm:$0xff]  ;;  %v1653_v37 = vld [vmem:[#allocation8 + $0x848] sm:$0xff] }
 0x202   : > { %4569 = vmatprep.subr.bf16.mxu0 %v5793_v38  ;;  %4741 = vmatprep.subr.bf16.mxu1 %v5795_v40  ;;  %v1657_v38 = vld [vmem:[#allocation8 + $0x868] sm:$0xff] }
 0x203   : > { %v5835_v20 = vcombine.high %v1653_v37, %v1657_v38 }
 0x205   : > { %4570 = vmatpush1.bf16.msra.mxu0 %v5792_v46  ;;  %4742 = vmatpush1.bf16.msra.mxu1 %v5794_v22  ;;  %v529_v46 = vrot.slane %v6805_v23, %v6855_v29  ;;  %v5833_v22 = vcombine.high %v1652_v32, %v1656_v36 }
 0x206   : > { %4571 = vmatprep.subr.bf16.mxu0 %v5801_v47  ;;  %4743 = vmatprep.subr.bf16.mxu1 %v5803_v48  ;;  %v1660_v47 = vld [vmem:[#allocation8 + $0x880] sm:$0xff]  ;;  %v533_v48 = vrot.slane %v6805_v23, %v6858_v34 }
 0x207   : > { %v5841_v59 = vcombine.high %v1660_v47, %v1664_v49 }
 0x209   : > { %4572 = vmatpush1.bf16.msra.mxu0 %v5800_v55  ;;  %4744 = vmatpush1.bf16.msra.mxu1 %v5802_v56  ;;  %v1312_v2 = vpop.f32.mrb[4].mxu0  ;;  %v5832_v55 = vcombine.low %v1652_v32, %v1656_v36  ;;  %v5834_v56 = vcombine.low %v1653_v37, %v1657_v38  ;;  %v1684_v32 = vld [vmem:[#allocation8 + $0x940] sm:$0xff]  ;;  %v1685_v36 = vld [vmem:[#allocation8 + $0x948] sm:$0xff] }
 0x20a   : > { %4573 = vmatprep.subr.bf16.mxu0 %v5809_v57  ;;  %4745 = vmatprep.subr.bf16.mxu1 %v5811_v58  ;;  %v1313_v6 = vadd.f32 %v1312_v2, %v521_v60  ;;  %v1314_v9 = vpop.f32.mrb[5].mxu0  ;;  %v1355_v53 = vpop.f32.mrb[4].mxu1  ;;  %v1689_v37 = vld [vmem:[#allocation8 + $0x968] sm:$0xff] }
 0x20b   : > { %v1315_v13 = vadd.f32 %v1314_v9, %v525_v4  ;;  %v1316_v14 = vpop.f32.mrb[6].mxu0  ;;  %v1356_v57 = vadd.f32 %v1355_v53, %v529_v46  ;;  %v1357_v58 = vpop.f32.mrb[5].mxu1  ;;  %v5842_v9 = vcombine.low %v1661_v51, %v1665_v52  ;;  %v1700_v53 = vld [vmem:[#allocation8 + $0x9c0] sm:$0xff] }
 0x20c   : > { %v1368_v16 = vmax.f32 %v1313_v6, 0.0  ;;  %v1317_v17 = vadd.f32 %v1316_v14, %v521_v60  ;;  %v1318_v25 = vpop.f32.mrb[7].mxu0  ;;  %v5843_v60 = vcombine.high %v1661_v51, %v1665_v52  ;;  %v1358_v23 = vadd.f32 %v1357_v58, %v533_v48  ;;  %v1359_v62 = vpop.f32.mrb[6].mxu1 }
 0x20d   : > { %4574 = vmatpush1.bf16.msra.mxu0 %v5808_v5  ;;  %4746 = vmatpush1.bf16.msra.mxu1 %v5810_v1  ;;  %v1369_v27 = vmax.f32 %v1315_v13, 0.0  ;;  %v1319_v28 = vadd.f32 %v1318_v25, %v525_v4  ;;  %v1669_v4 = vld [vmem:[#allocation8 + $0x8c8] sm:$0xff]  ;;  %v1370_v1 = vmax.f32 %v1356_v57, 0.0  ;;  %v1360_v2 = vadd.f32 %v1359_v62, %v529_v46  ;;  %v1676_v13 = vld [vmem:[#allocation8 + $0x900] sm:$0xff] }
 0x20e   : > { %4575 = vmatprep.subr.bf16.mxu0 %v5817_v8  ;;  %4747 = vmatprep.subr.bf16.mxu1 %v5819_v7  ;;  %v1376_v33 = vmax.f32 %v1317_v17, 0.0  ;;  %v1673_v5 = vld [vmem:[#allocation8 + $0x8e8] sm:$0xff]  ;;  %v1361_v8 = vpop.f32.mrb[7].mxu1  ;;  %v1371_v7 = vmax.f32 %v1358_v23, 0.0  ;;  %v5840_v6 = vcombine.low %v1660_v47, %v1664_v49  ;;  %v1692_v46 = vld [vmem:[#allocation8 + $0x980] sm:$0xff]  ;;  %v5866_v49 = vcombine.low %v1685_v36, %v1689_v37 }
 0x20f   : > { %v1377_v40 = vmax.f32 %v1319_v28, 0.0  ;;  %v1362_v3 = vadd.f32 %v1361_v8, %v533_v48  ;;  %v1378_v10 = vmax.f32 %v1360_v2, 0.0  ;;  %v5851_v12 = vcombine.high %v1669_v4, %v1673_v5  ;;  %v1681_v17 = vld [vmem:[#allocation8 + $0x928] sm:$0xff]  ;;  %v1708_v23 = vld [vmem:[#allocation8 + $0xa00] sm:$0xff] }
 0x210   : > { %v6860_v42 = vpack.c.bf16 %v1376_v33, %v1368_v16  ;;  %v1677_v16 = vld [vmem:[#allocation8 + $0x908] sm:$0xff]  ;;  %v5850_v28 = vcombine.low %v1669_v4, %v1673_v5  ;;  %v1688_v33 = vld [vmem:[#allocation8 + $0x960] sm:$0xff] }
 0x211   : > { %4576 = vmatpush1.bf16.msra.mxu0 %v5816_v15  ;;  %4748 = vmatpush1.bf16.msra.mxu1 %v5818_v26  ;;  %v6862_v44 = vpack.c.bf16 %v1377_v40, %v1369_v27  ;;  %v1379_v14 = vmax.f32 %v1362_v3, 0.0  ;;  %v1680_v15 = vld [vmem:[#allocation8 + $0x920] sm:$0xff]  ;;  %v6872_v25 = vpack.c.bf16 %v1378_v10, %v1370_v1  ;;  %v5848_v27 = vcombine.low %v1668_v61, %v1672_v63  ;;  %v1697_v47 = vld [vmem:[#allocation8 + $0x9a8] sm:$0xff] }
 0x212   : > { %4588 = vmatprep.subr.bf16.mxu0 %v5825_v30  ;;  %4760 = vmatprep.subr.bf16.mxu1 %v5827_v31  ;;  %v5857_v30 = vcombine.high %v1676_v13, %v1680_v15  ;;  %v5859_v31 = vcombine.high %v1677_v16, %v1681_v17  ;;  %v5856_v38 = vcombine.low %v1676_v13, %v1680_v15  ;;  %v1705_v57 = vld [vmem:[#allocation8 + $0x9e8] sm:$0xff]  ;;  %v1712_v62 = vld [vmem:[#allocation8 + $0xa20] sm:$0xff] }
 0x213   : > { %v6874_v26 = vpack.c.bf16 %v1379_v14, %v1371_v7  ;;  %v5858_v40 = vcombine.low %v1677_v16, %v1681_v17  ;;  %v5864_v48 = vcombine.low %v1684_v32, %v1688_v33  ;;  %v1709_v63 = vld [vmem:[#allocation8 + $0xa08] sm:$0xff]  ;;  %v5889_v2 = vcombine.high %v1708_v23, %v1712_v62  ;;  %v1716_v7 = vld [vmem:[#allocation8 + $0xa40] sm:$0xff] }
 0x214   : > { %4578 = vmatmul.mubr.bf16.vlgmr.msra.gmra.mrb[8].mxu0 %v6838_v18  ;;  %4750 = vmatmul.mubr.bf16.vlgmr.msra.gmra.mrb[8].mxu1 %v6838_v18  ;;  %v1713_v4 = vld [vmem:[#allocation8 + $0xa28] sm:$0xff]  ;;  %v1720_v3 = vld [vmem:[#allocation8 + $0xa60] sm:$0xff]  ;;  %v5888_v10 = vcombine.low %v1708_v23, %v1712_v62 }
 0x215   : > { %4589 = vmatpush1.bf16.msra.mxu0 %v5824_v41  ;;  %4761 = vmatpush1.bf16.msra.mxu1 %v5826_v43  ;;  %v5865_v41 = vcombine.high %v1684_v32, %v1688_v33  ;;  %v5867_v43 = vcombine.high %v1685_v36, %v1689_v37  ;;  %v5891_v8 = vcombine.high %v1709_v63, %v1713_v4  ;;  %v1724_v14 = vld [vmem:[#allocation8 + $0xa80] sm:$0xff]  ;;  %v1725_v16 = vld [vmem:[#allocation8 + $0xa88] sm:$0xff] }
 0x216   : > { %4590 = vmatprep.subr.bf16.mxu0 %v5833_v22  ;;  %4762 = vmatprep.subr.bf16.mxu1 %v5835_v20  ;;  %v1696_v22 = vld [vmem:[#allocation8 + $0x9a0] sm:$0xff]  ;;  %v1693_v20 = vld [vmem:[#allocation8 + $0x988] sm:$0xff] }
 0x217   : > { %4620 = vmatprep.mubr.bf16.mxu0 %v6862_v44  ;;  %4792 = vmatprep.mubr.bf16.mxu1 %v6862_v44  ;;  %v5873_v51 = vcombine.high %v1692_v46, %v1696_v22  ;;  %v5875_v52 = vcombine.high %v1693_v20, %v1697_v47  ;;  %v5872_v58 = vcombine.low %v1692_v46, %v1696_v22  ;;  %v1728_v15 = vld [vmem:[#allocation8 + $0xaa0] sm:$0xff]  ;;  %v1729_v17 = vld [vmem:[#allocation8 + $0xaa8] sm:$0xff] }
 0x218   : > { %v1732_v32 = vld [vmem:[#allocation8 + $0xac0] sm:$0xff]  ;;  %v1733_v36 = vld [vmem:[#allocation8 + $0xac8] sm:$0xff] }
 0x219   : > { %4591 = vmatpush1.bf16.msra.mxu0 %v5832_v55  ;;  %4763 = vmatpush1.bf16.msra.mxu1 %v5834_v56  ;;  %v1704_v55 = vld [vmem:[#allocation8 + $0x9e0] sm:$0xff]  ;;  %v1701_v56 = vld [vmem:[#allocation8 + $0x9c8] sm:$0xff] }
 0x21a   : > { %4592 = vmatprep.subr.bf16.mxu0 %v5841_v59  ;;  %4764 = vmatprep.subr.bf16.mxu1 %v5843_v60  ;;  %v5874_v59 = vcombine.low %v1693_v20, %v1697_v47  ;;  %v5881_v60 = vcombine.high %v1700_v53, %v1704_v55  ;;  %v5883_v61 = vcombine.high %v1701_v56, %v1705_v57  ;;  %v1736_v33 = vld [vmem:[#allocation8 + $0xae0] sm:$0xff]  ;;  %v1737_v37 = vld [vmem:[#allocation8 + $0xae8] sm:$0xff] }
 0x21b   : > { %v5880_v5 = vcombine.low %v1700_v53, %v1704_v55  ;;  %v5882_v1 = vcombine.low %v1701_v56, %v1705_v57  ;;  %v1740_v46 = vld [vmem:[#allocation8 + $0xb00] sm:$0xff]  ;;  %v1741_v20 = vld [vmem:[#allocation8 + $0xb08] sm:$0xff] }
 0x21c   : > { %v1744_v22 = vld [vmem:[#allocation8 + $0xb20] sm:$0xff]  ;;  %v1745_v47 = vld [vmem:[#allocation8 + $0xb28] sm:$0xff] }
 0x21d   : > { %4593 = vmatpush1.bf16.msra.mxu0 %v5840_v6  ;;  %4765 = vmatpush1.bf16.msra.mxu1 %v5842_v9  ;;  %v1717_v6 = vld [vmem:[#allocation8 + $0xa48] sm:$0xff]  ;;  %v1748_v53 = vld [vmem:[#allocation8 + $0xb40] sm:$0xff] }
 0x21e   : > { %4594 = vmatprep.subr.bf16.mxu0 %v5849_v11  ;;  %4766 = vmatprep.subr.bf16.mxu1 %v5851_v12  ;;  %v1721_v9 = vld [vmem:[#allocation8 + $0xa68] sm:$0xff]  ;;  %v5890_v11 = vcombine.low %v1709_v63, %v1713_v4  ;;  %v5897_v12 = vcombine.high %v1716_v7, %v1720_v3  ;;  %v1752_v55 = vld [vmem:[#allocation8 + $0xb60] sm:$0xff] }
 0x21f   : > { %v5899_v13 = vcombine.high %v1717_v6, %v1721_v9  ;;  %v1749_v56 = vld [vmem:[#allocation8 + $0xb48] sm:$0xff]  ;;  %v1756_v23 = vld [vmem:[#allocation8 + $0xb80] sm:$0xff] }
 0x220   : > { %v1753_v57 = vld [vmem:[#allocation8 + $0xb68] sm:$0xff]  ;;  %v1760_v62 = vld [vmem:[#allocation8 + $0xba0] sm:$0xff] }
 0x221   : > { %4595 = vmatpush1.bf16.msra.mxu0 %v5848_v27  ;;  %4767 = vmatpush1.bf16.msra.mxu1 %v5850_v28  ;;  %v5896_v27 = vcombine.low %v1716_v7, %v1720_v3  ;;  %v5898_v28 = vcombine.low %v1717_v6, %v1721_v9  ;;  %v1757_v63 = vld [vmem:[#allocation8 + $0xb88] sm:$0xff]  ;;  %v1764_v7 = vld [vmem:[#allocation8 + $0xbc0] sm:$0xff] }
 0x222   : > { %4596 = vmatprep.subr.bf16.mxu0 %v5857_v30  ;;  %4768 = vmatprep.subr.bf16.mxu1 %v5859_v31  ;;  %v5905_v30 = vcombine.high %v1724_v14, %v1728_v15  ;;  %v5907_v31 = vcombine.high %v1725_v16, %v1729_v17  ;;  %v1761_v4 = vld [vmem:[#allocation8 + $0xba8] sm:$0xff]  ;;  %v1768_v3 = vld [vmem:[#allocation8 + $0xbe0] sm:$0xff] }
 0x223   : > { %v1765_v6 = vld [vmem:[#allocation8 + $0xbc8] sm:$0xff] }
 0x224   : > { %v1769_v9 = vld [vmem:[#allocation8 + $0xbe8] sm:$0xff] }
 0x225   : > { %4597 = vmatpush1.bf16.msra.mxu0 %v5856_v38  ;;  %4769 = vmatpush1.bf16.msra.mxu1 %v5858_v40  ;;  %v5904_v38 = vcombine.low %v1724_v14, %v1728_v15  ;;  %v5906_v40 = vcombine.low %v1725_v16, %v1729_v17  ;;  %v1772_v14 = vld [vmem:[#allocation8 + $0xc00] sm:$0xff]  ;;  %v1773_v16 = vld [vmem:[#allocation8 + $0xc08] sm:$0xff] }
 0x226   : > { %4598 = vmatprep.subr.bf16.mxu0 %v5865_v41  ;;  %4770 = vmatprep.subr.bf16.mxu1 %v5867_v43  ;;  %v5913_v41 = vcombine.high %v1732_v32, %v1736_v33  ;;  %v5915_v43 = vcombine.high %v1733_v36, %v1737_v37  ;;  %v1776_v15 = vld [vmem:[#allocation8 + $0xc20] sm:$0xff]  ;;  %v1777_v17 = vld [vmem:[#allocation8 + $0xc28] sm:$0xff] }
 0x229   : > { %4599 = vmatpush1.bf16.msra.mxu0 %v5864_v48  ;;  %4771 = vmatpush1.bf16.msra.mxu1 %v5866_v49  ;;  %v5912_v48 = vcombine.low %v1732_v32, %v1736_v33  ;;  %v5914_v49 = vcombine.low %v1733_v36, %v1737_v37  ;;  %v1780_v32 = vld [vmem:[#allocation8 + $0xc40] sm:$0xff]  ;;  %v1781_v36 = vld [vmem:[#allocation8 + $0xc48] sm:$0xff] }
 0x22a   : > { %4600 = vmatprep.subr.bf16.mxu0 %v5873_v51  ;;  %4772 = vmatprep.subr.bf16.mxu1 %v5875_v52  ;;  %v5921_v51 = vcombine.high %v1740_v46, %v1744_v22  ;;  %v5923_v52 = vcombine.high %v1741_v20, %v1745_v47  ;;  %v1784_v33 = vld [vmem:[#allocation8 + $0xc60] sm:$0xff]  ;;  %v1785_v37 = vld [vmem:[#allocation8 + $0xc68] sm:$0xff] }
 0x22d   : > { %4601 = vmatpush1.bf16.msra.mxu0 %v5872_v58  ;;  %4773 = vmatpush1.bf16.msra.mxu1 %v5874_v59  ;;  %v5920_v58 = vcombine.low %v1740_v46, %v1744_v22  ;;  %v5922_v59 = vcombine.low %v1741_v20, %v1745_v47  ;;  %v1788_v46 = vld [vmem:[#allocation8 + $0xc80] sm:$0xff]  ;;  %v1789_v20 = vld [vmem:[#allocation8 + $0xc88] sm:$0xff] }
 0x22e   : > { %4602 = vmatprep.subr.bf16.mxu0 %v5881_v60  ;;  %4774 = vmatprep.subr.bf16.mxu1 %v5883_v61  ;;  %v5929_v60 = vcombine.high %v1748_v53, %v1752_v55  ;;  %v5931_v61 = vcombine.high %v1749_v56, %v1753_v57  ;;  %v1792_v22 = vld [vmem:[#allocation8 + $0xca0] sm:$0xff]  ;;  %v1793_v47 = vld [vmem:[#allocation8 + $0xca8] sm:$0xff] }
 0x231   : > { %4603 = vmatpush1.bf16.msra.mxu0 %v5880_v5  ;;  %4775 = vmatpush1.bf16.msra.mxu1 %v5882_v1  ;;  %v5928_v5 = vcombine.low %v1748_v53, %v1752_v55  ;;  %v5930_v1 = vcombine.low %v1749_v56, %v1753_v57  ;;  %v1796_v53 = vld [vmem:[#allocation8 + $0xcc0] sm:$0xff]  ;;  %v1797_v56 = vld [vmem:[#allocation8 + $0xcc8] sm:$0xff] }
 0x232   : > { %4604 = vmatprep.subr.bf16.mxu0 %v5889_v2  ;;  %4776 = vmatprep.subr.bf16.mxu1 %v5891_v8  ;;  %v5937_v2 = vcombine.high %v1756_v23, %v1760_v62  ;;  %v5939_v8 = vcombine.high %v1757_v63, %v1761_v4  ;;  %v1800_v55 = vld [vmem:[#allocation8 + $0xce0] sm:$0xff]  ;;  %v1801_v57 = vld [vmem:[#allocation8 + $0xce8] sm:$0xff] }
 0x235   : > { %4605 = vmatpush1.bf16.msra.mxu0 %v5888_v10  ;;  %4777 = vmatpush1.bf16.msra.mxu1 %v5890_v11  ;;  %v5936_v10 = vcombine.low %v1756_v23, %v1760_v62  ;;  %v5938_v11 = vcombine.low %v1757_v63, %v1761_v4  ;;  %v1804_v23 = vld [vmem:[#allocation8 + $0xd00] sm:$0xff]  ;;  %v1805_v63 = vld [vmem:[#allocation8 + $0xd08] sm:$0xff] }
 0x236   : > { %4606 = vmatprep.subr.bf16.mxu0 %v5897_v12  ;;  %4778 = vmatprep.subr.bf16.mxu1 %v5899_v13  ;;  %v5945_v12 = vcombine.high %v1764_v7, %v1768_v3  ;;  %v5947_v13 = vcombine.high %v1765_v6, %v1769_v9  ;;  %v1808_v62 = vld [vmem:[#allocation8 + $0xd20] sm:$0xff]  ;;  %v1809_v4 = vld [vmem:[#allocation8 + $0xd28] sm:$0xff] }
 0x239   : > { %4607 = vmatpush1.bf16.msra.mxu0 %v5896_v27  ;;  %4779 = vmatpush1.bf16.msra.mxu1 %v5898_v28  ;;  %v5944_v27 = vcombine.low %v1764_v7, %v1768_v3  ;;  %v5946_v28 = vcombine.low %v1765_v6, %v1769_v9  ;;  %v1812_v7 = vld [vmem:[#allocation8 + $0xd40] sm:$0xff]  ;;  %v1813_v6 = vld [vmem:[#allocation8 + $0xd48] sm:$0xff] }
 0x23a   : > { %4608 = vmatprep.subr.bf16.mxu0 %v5905_v30  ;;  %4780 = vmatprep.subr.bf16.mxu1 %v5907_v31  ;;  %v5953_v30 = vcombine.high %v1772_v14, %v1776_v15  ;;  %v5955_v31 = vcombine.high %v1773_v16, %v1777_v17  ;;  %v1816_v3 = vld [vmem:[#allocation8 + $0xd60] sm:$0xff]  ;;  %v1817_v9 = vld [vmem:[#allocation8 + $0xd68] sm:$0xff] }
 0x23d   : > { %4609 = vmatpush1.bf16.msra.mxu0 %v5904_v38  ;;  %4781 = vmatpush1.bf16.msra.mxu1 %v5906_v40  ;;  %v5952_v38 = vcombine.low %v1772_v14, %v1776_v15  ;;  %v5954_v40 = vcombine.low %v1773_v16, %v1777_v17  ;;  %v1820_v14 = vld [vmem:[#allocation8 + $0xd80] sm:$0xff]  ;;  %v1821_v16 = vld [vmem:[#allocation8 + $0xd88] sm:$0xff] }
 0x23e   : > { %4610 = vmatprep.subr.bf16.mxu0 %v5913_v41  ;;  %4782 = vmatprep.subr.bf16.mxu1 %v5915_v43  ;;  %v5961_v41 = vcombine.high %v1780_v32, %v1784_v33  ;;  %v5963_v43 = vcombine.high %v1781_v36, %v1785_v37  ;;  %v1824_v15 = vld [vmem:[#allocation8 + $0xda0] sm:$0xff]  ;;  %v1825_v17 = vld [vmem:[#allocation8 + $0xda8] sm:$0xff] }
 0x241   : > { %4611 = vmatpush1.bf16.msra.mxu0 %v5912_v48  ;;  %4783 = vmatpush1.bf16.msra.mxu1 %v5914_v49  ;;  %v5960_v48 = vcombine.low %v1780_v32, %v1784_v33  ;;  %v5962_v49 = vcombine.low %v1781_v36, %v1785_v37  ;;  %v1828_v32 = vld [vmem:[#allocation8 + $0xdc0] sm:$0xff]  ;;  %v1829_v36 = vld [vmem:[#allocation8 + $0xdc8] sm:$0xff] }
 0x242   : > { %4612 = vmatprep.subr.bf16.mxu0 %v5921_v51  ;;  %4784 = vmatprep.subr.bf16.mxu1 %v5923_v52  ;;  %v5969_v51 = vcombine.high %v1788_v46, %v1792_v22  ;;  %v5971_v52 = vcombine.high %v1789_v20, %v1793_v47  ;;  %v1832_v33 = vld [vmem:[#allocation8 + $0xde0] sm:$0xff]  ;;  %v1833_v37 = vld [vmem:[#allocation8 + $0xde8] sm:$0xff] }
 0x245   : > { %4613 = vmatpush1.bf16.msra.mxu0 %v5920_v58  ;;  %4785 = vmatpush1.bf16.msra.mxu1 %v5922_v59  ;;  %v5968_v58 = vcombine.low %v1788_v46, %v1792_v22  ;;  %v5970_v59 = vcombine.low %v1789_v20, %v1793_v47  ;;  %v1836_v46 = vld [vmem:[#allocation8 + $0xe00] sm:$0xff]  ;;  %v1837_v20 = vld [vmem:[#allocation8 + $0xe08] sm:$0xff] }
 0x246   : > { %4614 = vmatprep.subr.bf16.mxu0 %v5929_v60  ;;  %4786 = vmatprep.subr.bf16.mxu1 %v5931_v61  ;;  %v5977_v60 = vcombine.high %v1796_v53, %v1800_v55  ;;  %v5979_v61 = vcombine.high %v1797_v56, %v1801_v57  ;;  %v1840_v22 = vld [vmem:[#allocation8 + $0xe20] sm:$0xff]  ;;  %v1841_v47 = vld [vmem:[#allocation8 + $0xe28] sm:$0xff] }
 0x249   : > { %4615 = vmatpush1.bf16.msra.mxu0 %v5928_v5  ;;  %4787 = vmatpush1.bf16.msra.mxu1 %v5930_v1  ;;  %v5976_v5 = vcombine.low %v1796_v53, %v1800_v55  ;;  %v5978_v1 = vcombine.low %v1797_v56, %v1801_v57  ;;  %v1844_v53 = vld [vmem:[#allocation8 + $0xe40] sm:$0xff]  ;;  %v1845_v56 = vld [vmem:[#allocation8 + $0xe48] sm:$0xff] }
 0x24a   : > { %4616 = vmatprep.subr.bf16.mxu0 %v5937_v2  ;;  %4788 = vmatprep.subr.bf16.mxu1 %v5939_v8  ;;  %v5985_v2 = vcombine.high %v1804_v23, %v1808_v62  ;;  %v5987_v8 = vcombine.high %v1805_v63, %v1809_v4  ;;  %v1848_v55 = vld [vmem:[#allocation8 + $0xe60] sm:$0xff]  ;;  %v1849_v57 = vld [vmem:[#allocation8 + $0xe68] sm:$0xff] }
 0x24d   : > { %4617 = vmatpush1.bf16.msra.mxu0 %v5936_v10  ;;  %4789 = vmatpush1.bf16.msra.mxu1 %v5938_v11  ;;  %v5984_v10 = vcombine.low %v1804_v23, %v1808_v62  ;;  %v5986_v11 = vcombine.low %v1805_v63, %v1809_v4  ;;  %v1852_v23 = vld [vmem:[#allocation8 + $0xe80] sm:$0xff]  ;;  %v1853_v63 = vld [vmem:[#allocation8 + $0xe88] sm:$0xff] }
 0x24e   : > { %4618 = vmatprep.subr.bf16.mxu0 %v5945_v12  ;;  %4790 = vmatprep.subr.bf16.mxu1 %v5947_v13  ;;  %v5993_v12 = vcombine.high %v1812_v7, %v1816_v3  ;;  %v5995_v13 = vcombine.high %v1813_v6, %v1817_v9  ;;  %v1856_v62 = vld [vmem:[#allocation8 + $0xea0] sm:$0xff]  ;;  %v1857_v4 = vld [vmem:[#allocation8 + $0xea8] sm:$0xff] }
 0x251   : > { %4619 = vmatpush1.bf16.msra.mxu0 %v5944_v27  ;;  %4791 = vmatpush1.bf16.msra.mxu1 %v5946_v28  ;;  %v5992_v27 = vcombine.low %v1812_v7, %v1816_v3  ;;  %v5994_v28 = vcombine.low %v1813_v6, %v1817_v9  ;;  %v1860_v7 = vld [vmem:[#allocation8 + $0xec0] sm:$0xff]  ;;  %v1861_v6 = vld [vmem:[#allocation8 + $0xec8] sm:$0xff] }
 0x252   : > { %4631 = vmatprep.subr.bf16.mxu0 %v5953_v30  ;;  %4803 = vmatprep.subr.bf16.mxu1 %v5955_v31  ;;  %v6001_v30 = vcombine.high %v1820_v14, %v1824_v15  ;;  %v6003_v31 = vcombine.high %v1821_v16, %v1825_v17  ;;  %v1864_v3 = vld [vmem:[#allocation8 + $0xee0] sm:$0xff]  ;;  %v1865_v9 = vld [vmem:[#allocation8 + $0xee8] sm:$0xff] }
 0x254   : > { %4621 = vmatmul.mubr.bf16.vlgmr.msra.gmra.mrb[8].mxu0 %v6860_v42  ;;  %4793 = vmatmul.mubr.bf16.vlgmr.msra.gmra.mrb[8].mxu1 %v6860_v42 }
 0x255   : > { %4632 = vmatpush1.bf16.msra.mxu0 %v5952_v38  ;;  %4804 = vmatpush1.bf16.msra.mxu1 %v5954_v40  ;;  %v6000_v38 = vcombine.low %v1820_v14, %v1824_v15  ;;  %v6002_v40 = vcombine.low %v1821_v16, %v1825_v17  ;;  %v1868_v14 = vld [vmem:[#allocation8 + $0xf00] sm:$0xff]  ;;  %v1869_v16 = vld [vmem:[#allocation8 + $0xf08] sm:$0xff] }
 0x256   : > { %4633 = vmatprep.subr.bf16.mxu0 %v5961_v41  ;;  %4805 = vmatprep.subr.bf16.mxu1 %v5963_v43  ;;  %v6009_v41 = vcombine.high %v1828_v32, %v1832_v33  ;;  %v6011_v43 = vcombine.high %v1829_v36, %v1833_v37  ;;  %v1872_v15 = vld [vmem:[#allocation8 + $0xf20] sm:$0xff]  ;;  %v1873_v17 = vld [vmem:[#allocation8 + $0xf28] sm:$0xff] }
 0x257   : > { %4663 = vmatprep.mubr.bf16.mxu0 %v6874_v26  ;;  %4835 = vmatprep.mubr.bf16.mxu1 %v6874_v26 }
 0x259   : > { %4634 = vmatpush1.bf16.msra.mxu0 %v5960_v48  ;;  %4806 = vmatpush1.bf16.msra.mxu1 %v5962_v49  ;;  %v6008_v48 = vcombine.low %v1828_v32, %v1832_v33  ;;  %v6010_v49 = vcombine.low %v1829_v36, %v1833_v37  ;;  %v1876_v32 = vld [vmem:[#allocation8 + $0xf40] sm:$0xff]  ;;  %v1877_v36 = vld [vmem:[#allocation8 + $0xf48] sm:$0xff] }
 0x25a   : > { %4635 = vmatprep.subr.bf16.mxu0 %v5969_v51  ;;  %4807 = vmatprep.subr.bf16.mxu1 %v5971_v52  ;;  %v6017_v51 = vcombine.high %v1836_v46, %v1840_v22  ;;  %v6019_v52 = vcombine.high %v1837_v20, %v1841_v47  ;;  %v1880_v33 = vld [vmem:[#allocation8 + $0xf60] sm:$0xff]  ;;  %v1881_v37 = vld [vmem:[#allocation8 + $0xf68] sm:$0xff] }
 0x25d   : > { %4636 = vmatpush1.bf16.msra.mxu0 %v5968_v58  ;;  %4808 = vmatpush1.bf16.msra.mxu1 %v5970_v59  ;;  %v6016_v58 = vcombine.low %v1836_v46, %v1840_v22  ;;  %v6018_v59 = vcombine.low %v1837_v20, %v1841_v47  ;;  %v1884_v46 = vld [vmem:[#allocation8 + $0xf80] sm:$0xff]  ;;  %v1885_v20 = vld [vmem:[#allocation8 + $0xf88] sm:$0xff] }
 0x25e   : > { %4637 = vmatprep.subr.bf16.mxu0 %v5977_v60  ;;  %4809 = vmatprep.subr.bf16.mxu1 %v5979_v61  ;;  %v6025_v60 = vcombine.high %v1844_v53, %v1848_v55  ;;  %v6027_v61 = vcombine.high %v1845_v56, %v1849_v57  ;;  %v1888_v22 = vld [vmem:[#allocation8 + $0xfa0] sm:$0xff]  ;;  %v1889_v47 = vld [vmem:[#allocation8 + $0xfa8] sm:$0xff] }
 0x261   : > { %4638 = vmatpush1.bf16.msra.mxu0 %v5976_v5  ;;  %4810 = vmatpush1.bf16.msra.mxu1 %v5978_v1  ;;  %v6024_v5 = vcombine.low %v1844_v53, %v1848_v55  ;;  %v6026_v1 = vcombine.low %v1845_v56, %v1849_v57  ;;  %v1892_v53 = vld [vmem:[#allocation8 + $0xfc0] sm:$0xff]  ;;  %v1893_v56 = vld [vmem:[#allocation8 + $0xfc8] sm:$0xff] }
 0x262   : > { %4639 = vmatprep.subr.bf16.mxu0 %v5985_v2  ;;  %4811 = vmatprep.subr.bf16.mxu1 %v5987_v8  ;;  %v6033_v2 = vcombine.high %v1852_v23, %v1856_v62  ;;  %v6035_v8 = vcombine.high %v1853_v63, %v1857_v4  ;;  %v1896_v55 = vld [vmem:[#allocation8 + $0xfe0] sm:$0xff]  ;;  %v1897_v57 = vld [vmem:[#allocation8 + $0xfe8] sm:$0xff] }
 0x265   : > { %4640 = vmatpush1.bf16.msra.mxu0 %v5984_v10  ;;  %4812 = vmatpush1.bf16.msra.mxu1 %v5986_v11  ;;  %v6032_v10 = vcombine.low %v1852_v23, %v1856_v62  ;;  %v6034_v11 = vcombine.low %v1853_v63, %v1857_v4  ;;  %v1390_v23 = vld [vmem:[#allocation8 + $0x10] sm:$0xff]  ;;  %v1391_v63 = vld [vmem:[#allocation8 + $0x18] sm:$0xff] }
 0x266   : > { %4641 = vmatprep.subr.bf16.mxu0 %v5993_v12  ;;  %4813 = vmatprep.subr.bf16.mxu1 %v5995_v13  ;;  %v6041_v12 = vcombine.high %v1860_v7, %v1864_v3  ;;  %v6043_v13 = vcombine.high %v1861_v6, %v1865_v9  ;;  %v1394_v62 = vld [vmem:[#allocation8 + $0x30] sm:$0xff]  ;;  %v1395_v4 = vld [vmem:[#allocation8 + $0x38] sm:$0xff] }
 0x269   : > { %4642 = vmatpush1.bf16.msra.mxu0 %v5992_v27  ;;  %4814 = vmatpush1.bf16.msra.mxu1 %v5994_v28  ;;  %v6040_v27 = vcombine.low %v1860_v7, %v1864_v3  ;;  %v6042_v28 = vcombine.low %v1861_v6, %v1865_v9  ;;  %v1398_v7 = vld [vmem:[#allocation8 + $0x50] sm:$0xff]  ;;  %v1399_v6 = vld [vmem:[#allocation8 + $0x58] sm:$0xff] }
 0x26a   : > { %4643 = vmatprep.subr.bf16.mxu0 %v6001_v30  ;;  %4815 = vmatprep.subr.bf16.mxu1 %v6003_v31  ;;  %v6049_v30 = vcombine.high %v1868_v14, %v1872_v15  ;;  %v6051_v31 = vcombine.high %v1869_v16, %v1873_v17  ;;  %v1402_v3 = vld [vmem:[#allocation8 + $0x70] sm:$0xff]  ;;  %v1403_v9 = vld [vmem:[#allocation8 + $0x78] sm:$0xff] }
 0x26d   : > { %4644 = vmatpush1.bf16.msra.mxu0 %v6000_v38  ;;  %4816 = vmatpush1.bf16.msra.mxu1 %v6002_v40  ;;  %v6048_v38 = vcombine.low %v1868_v14, %v1872_v15  ;;  %v6050_v40 = vcombine.low %v1869_v16, %v1873_v17  ;;  %v1406_v14 = vld [vmem:[#allocation8 + $0x90] sm:$0xff]  ;;  %v1407_v16 = vld [vmem:[#allocation8 + $0x98] sm:$0xff] }
 0x26e   : > { %4645 = vmatprep.subr.bf16.mxu0 %v6009_v41  ;;  %4817 = vmatprep.subr.bf16.mxu1 %v6011_v43  ;;  %v6057_v41 = vcombine.high %v1876_v32, %v1880_v33  ;;  %v6059_v43 = vcombine.high %v1877_v36, %v1881_v37  ;;  %v1410_v15 = vld [vmem:[#allocation8 + $0xb0] sm:$0xff]  ;;  %v1411_v17 = vld [vmem:[#allocation8 + $0xb8] sm:$0xff] }
 0x271   : > { %4646 = vmatpush1.bf16.msra.mxu0 %v6008_v48  ;;  %4818 = vmatpush1.bf16.msra.mxu1 %v6010_v49  ;;  %v6056_v48 = vcombine.low %v1876_v32, %v1880_v33  ;;  %v6058_v49 = vcombine.low %v1877_v36, %v1881_v37  ;;  %v1414_v32 = vld [vmem:[#allocation8 + $0xd0] sm:$0xff]  ;;  %v1415_v36 = vld [vmem:[#allocation8 + $0xd8] sm:$0xff] }
 0x272   : > { %4647 = vmatprep.subr.bf16.mxu0 %v6017_v51  ;;  %4819 = vmatprep.subr.bf16.mxu1 %v6019_v52  ;;  %v6065_v51 = vcombine.high %v1884_v46, %v1888_v22  ;;  %v6067_v52 = vcombine.high %v1885_v20, %v1889_v47  ;;  %v1418_v33 = vld [vmem:[#allocation8 + $0xf0] sm:$0xff]  ;;  %v1419_v37 = vld [vmem:[#allocation8 + $0xf8] sm:$0xff] }
 0x275   : > { %4648 = vmatpush1.bf16.msra.mxu0 %v6016_v58  ;;  %4820 = vmatpush1.bf16.msra.mxu1 %v6018_v59  ;;  %v6064_v58 = vcombine.low %v1884_v46, %v1888_v22  ;;  %v6066_v59 = vcombine.low %v1885_v20, %v1889_v47  ;;  %v1422_v46 = vld [vmem:[#allocation8 + $0x110] sm:$0xff]  ;;  %v1427_v20 = vld [vmem:[#allocation8 + $0x138] sm:$0xff]  ;;  %v5596_v47 = vcombine.low %v1414_v32, %v1418_v33 }
 0x276   : > { %4649 = vmatprep.subr.bf16.mxu0 %v6025_v60  ;;  %4821 = vmatprep.subr.bf16.mxu1 %v6027_v61  ;;  %v6073_v60 = vcombine.high %v1892_v53, %v1896_v55  ;;  %v6075_v61 = vcombine.high %v1893_v56, %v1897_v57  ;;  %v1426_v22 = vld [vmem:[#allocation8 + $0x130] sm:$0xff] }
 0x279   : > { %4650 = vmatpush1.bf16.msra.mxu0 %v6024_v5  ;;  %4822 = vmatpush1.bf16.msra.mxu1 %v6026_v1  ;;  %v6072_v5 = vcombine.low %v1892_v53, %v1896_v55  ;;  %v6074_v1 = vcombine.low %v1893_v56, %v1897_v57  ;;  %v1434_v53 = vld [vmem:[#allocation8 + $0x170] sm:$0xff]  ;;  %v1431_v55 = vld [vmem:[#allocation8 + $0x158] sm:$0xff]  ;;  %v5604_v57 = vcombine.low %v1422_v46, %v1426_v22 }
 0x27a   : > { %4651 = vmatprep.subr.bf16.mxu0 %v6033_v2  ;;  %4823 = vmatprep.subr.bf16.mxu1 %v6035_v8  ;;  %v5573_v2 = vcombine.high %v1390_v23, %v1394_v62  ;;  %v5575_v8 = vcombine.high %v1391_v63, %v1395_v4  ;;  %v1435_v56 = vld [vmem:[#allocation8 + $0x178] sm:$0xff] }
 0x27d   : > { %4652 = vmatpush1.bf16.msra.mxu0 %v6032_v10  ;;  %4824 = vmatpush1.bf16.msra.mxu1 %v6034_v11  ;;  %v5572_v10 = vcombine.low %v1390_v23, %v1394_v62  ;;  %v5574_v11 = vcombine.low %v1391_v63, %v1395_v4  ;;  %v1442_v23 = vld [vmem:[#allocation8 + $0x1b0] sm:$0xff]  ;;  %v1439_v62 = vld [vmem:[#allocation8 + $0x198] sm:$0xff] }
 0x27e   : > { %4653 = vmatprep.subr.bf16.mxu0 %v6041_v12  ;;  %4825 = vmatprep.subr.bf16.mxu1 %v6043_v13  ;;  %v5581_v12 = vcombine.high %v1398_v7, %v1402_v3  ;;  %v5583_v13 = vcombine.high %v1399_v6, %v1403_v9  ;;  %v1443_v63 = vld [vmem:[#allocation8 + $0x1b8] sm:$0xff] }
 0x281   : > { %4654 = vmatpush1.bf16.msra.mxu0 %v6040_v27  ;;  %4826 = vmatpush1.bf16.msra.mxu1 %v6042_v28  ;;  %v5580_v27 = vcombine.low %v1398_v7, %v1402_v3  ;;  %v5582_v28 = vcombine.low %v1399_v6, %v1403_v9  ;;  %v1450_v7 = vld [vmem:[#allocation8 + $0x1f0] sm:$0xff]  ;;  %v1447_v3 = vld [vmem:[#allocation8 + $0x1d8] sm:$0xff] }
 0x282   : > { %4655 = vmatprep.subr.bf16.mxu0 %v6049_v30  ;;  %4827 = vmatprep.subr.bf16.mxu1 %v6051_v31  ;;  %v5589_v30 = vcombine.high %v1406_v14, %v1410_v15  ;;  %v5591_v31 = vcombine.high %v1407_v16, %v1411_v17  ;;  %v1451_v6 = vld [vmem:[#allocation8 + $0x1f8] sm:$0xff] }
 0x285   : > { %4656 = vmatpush1.bf16.msra.mxu0 %v6048_v38  ;;  %4828 = vmatpush1.bf16.msra.mxu1 %v6050_v40  ;;  %v5588_v38 = vcombine.low %v1406_v14, %v1410_v15  ;;  %v5590_v40 = vcombine.low %v1407_v16, %v1411_v17  ;;  %v1458_v14 = vld [vmem:[#allocation8 + $0x230] sm:$0xff]  ;;  %v1455_v15 = vld [vmem:[#allocation8 + $0x218] sm:$0xff] }
 0x286   : > { %4657 = vmatprep.subr.bf16.mxu0 %v6057_v41  ;;  %4829 = vmatprep.subr.bf16.mxu1 %v6059_v43  ;;  %v5597_v41 = vcombine.high %v1414_v32, %v1418_v33  ;;  %v5599_v43 = vcombine.high %v1415_v36, %v1419_v37  ;;  %v1459_v16 = vld [vmem:[#allocation8 + $0x238] sm:$0xff]  ;;  %v1466_v32 = vld [vmem:[#allocation8 + $0x270] sm:$0xff] }
 0x287   : > { %v1463_v33 = vld [vmem:[#allocation8 + $0x258] sm:$0xff] }
 0x289   : > { %4658 = vmatpush1.bf16.msra.mxu0 %v6056_v48  ;;  %4830 = vmatpush1.bf16.msra.mxu1 %v6058_v49  ;;  %v5598_v48 = vcombine.low %v1415_v36, %v1419_v37  ;;  %v5605_v49 = vcombine.high %v1422_v46, %v1426_v22  ;;  %v1467_v36 = vld [vmem:[#allocation8 + $0x278] sm:$0xff]  ;;  %v1474_v46 = vld [vmem:[#allocation8 + $0x2b0] sm:$0xff] }
 0x28a   : > { %4659 = vmatprep.subr.bf16.mxu0 %v6065_v51  ;;  %4831 = vmatprep.subr.bf16.mxu1 %v6067_v52  ;;  %v1430_v52 = vld [vmem:[#allocation8 + $0x150] sm:$0xff]  ;;  %v1471_v22 = vld [vmem:[#allocation8 + $0x298] sm:$0xff] }
 0x28b   : > { %v5612_v4 = vcombine.low %v1430_v52, %v1434_v53 }
 0x28d   : > { %4660 = vmatpush1.bf16.msra.mxu0 %v6064_v58  ;;  %4832 = vmatpush1.bf16.msra.mxu1 %v6066_v59  ;;  %v5613_v59 = vcombine.high %v1430_v52, %v1434_v53  ;;  %v1482_v52 = vld [vmem:[#allocation8 + $0x2f0] sm:$0xff]  ;;  %v1479_v53 = vld [vmem:[#allocation8 + $0x2d8] sm:$0xff] }
 0x28e   : > { %4661 = vmatprep.subr.bf16.mxu0 %v6073_v60  ;;  %4833 = vmatprep.subr.bf16.mxu1 %v6075_v61  ;;  %v5615_v60 = vcombine.high %v1431_v55, %v1435_v56  ;;  %v1438_v61 = vld [vmem:[#allocation8 + $0x190] sm:$0xff] }
 0x28f   : > { %v5620_v9 = vcombine.low %v1438_v61, %v1442_v23 }
 0x291   : > { %4662 = vmatpush1.bf16.msra.mxu0 %v6072_v5  ;;  %4834 = vmatpush1.bf16.msra.mxu1 %v6074_v1  ;;  %v5614_v5 = vcombine.low %v1431_v55, %v1435_v56  ;;  %v5621_v1 = vcombine.high %v1438_v61, %v1442_v23  ;;  %v1483_v55 = vld [vmem:[#allocation8 + $0x2f8] sm:$0xff]  ;;  %v1490_v61 = vld [vmem:[#allocation8 + $0x330] sm:$0xff] }
 0x292   : > { %4846 = vmatprep.subr.bf16.mxu0 %v5573_v2  ;;  %5018 = vmatprep.subr.bf16.mxu1 %v5575_v8  ;;  %v5623_v2 = vcombine.high %v1439_v62, %v1443_v63  ;;  %v1446_v8 = vld [vmem:[#allocation8 + $0x1d0] sm:$0xff]  ;;  %v1487_v23 = vld [vmem:[#allocation8 + $0x318] sm:$0xff] }
 0x293   : > { %v5628_v17 = vcombine.low %v1446_v8, %v1450_v7 }
 0x294   : > { %4664 = vmatmul.mubr.bf16.vlgmr.msra.gmra.mrb[8].mxu0 %v6872_v25  ;;  %4836 = vmatmul.mubr.bf16.vlgmr.msra.gmra.mrb[8].mxu1 %v6872_v25 }
 0x295   : > { %4847 = vmatpush1.bf16.msra.mxu0 %v5572_v10  ;;  %4878 = vmatprep.mubr.bf16.mxu0 %v6822_v0  ;;  %v5622_v10 = vcombine.low %v1439_v62, %v1443_v63  ;;  %v1491_v62 = vld [vmem:[#allocation8 + $0x338] sm:$0xff] }
 0x296   : > { %5019 = vmatpush1.bf16.msra.mxu1 %v5574_v11  ;;  %5050 = vmatprep.mubr.bf16.mxu1 %v6822_v0  ;;  %v1423_v0 = vld [vmem:[#allocation8 + $0x118] sm:$0xff]  ;;  %v5629_v11 = vcombine.high %v1446_v8, %v1450_v7  ;;  %v1498_v8 = vld [vmem:[#allocation8 + $0x370] sm:$0xff] }
 0x297   : > { %4848 = vmatprep.subr.bf16.mxu0 %v5581_v12  ;;  %5020 = vmatprep.subr.bf16.mxu1 %v5583_v13  ;;  %v5607_v51 = vcombine.high %v1423_v0, %v1427_v20  ;;  %v5606_v58 = vcombine.low %v1423_v0, %v1427_v20  ;;  %v5631_v12 = vcombine.high %v1447_v3, %v1451_v6  ;;  %v1454_v13 = vld [vmem:[#allocation8 + $0x210] sm:$0xff]  ;;  %v1475_v0 = vld [vmem:[#allocation8 + $0x2b8] sm:$0xff] }
 0x298   : > { %v5636_v37 = vcombine.low %v1454_v13, %v1458_v14  ;;  %v1495_v7 = vld [vmem:[#allocation8 + $0x358] sm:$0xff] }
 0x299   : > { %4849 = vmatpush1.bf16.msra.mxu0 %v5580_v27  ;;  %v5630_v27 = vcombine.low %v1447_v3, %v1451_v6  ;;  %v1499_v3 = vld [vmem:[#allocation8 + $0x378] sm:$0xff] }
 0x29a   : > { %5021 = vmatpush1.bf16.msra.mxu1 %v5582_v28  ;;  %4850 = vmatprep.subr.bf16.mxu0 %v5589_v30  ;;  %v5637_v28 = vcombine.high %v1454_v13, %v1458_v14  ;;  %v5639_v30 = vcombine.high %v1455_v15, %v1459_v16  ;;  %v1506_v13 = vld [vmem:[#allocation8 + $0x3b0] sm:$0xff]  ;;  %v1503_v14 = vld [vmem:[#allocation8 + $0x398] sm:$0xff] }
 0x29b   : > { %5022 = vmatprep.subr.bf16.mxu1 %v5591_v31  ;;  %v1462_v31 = vld [vmem:[#allocation8 + $0x250] sm:$0xff] }
 0x29c   : > { %v5644_v20 = vcombine.low %v1462_v31, %v1466_v32 }
 0x29d   : > { %4851 = vmatpush1.bf16.msra.mxu0 %v5588_v38  ;;  %v5638_v38 = vcombine.low %v1455_v15, %v1459_v16  ;;  %v1507_v15 = vld [vmem:[#allocation8 + $0x3b8] sm:$0xff] }
 0x29e   : > { %5023 = vmatpush1.bf16.msra.mxu1 %v5590_v40  ;;  %4852 = vmatprep.subr.bf16.mxu0 %v5597_v41  ;;  %v5645_v40 = vcombine.high %v1462_v31, %v1466_v32  ;;  %v5647_v41 = vcombine.high %v1463_v33, %v1467_v36  ;;  %v1514_v31 = vld [vmem:[#allocation8 + $0x3f0] sm:$0xff]  ;;  %v1511_v32 = vld [vmem:[#allocation8 + $0x3d8] sm:$0xff] }
 0x29f   : > { %5024 = vmatprep.subr.bf16.mxu1 %v5599_v43  ;;  %v1470_v43 = vld [vmem:[#allocation8 + $0x290] sm:$0xff] }
 0x2a0   : > { %v5652_v56 = vcombine.low %v1470_v43, %v1474_v46 }
 0x2a1   : > { %4853 = vmatpush1.bf16.msra.mxu0 %v5596_v47  ;;  %v5646_v47 = vcombine.low %v1463_v33, %v1467_v36  ;;  %v1515_v33 = vld [vmem:[#allocation8 + $0x3f8] sm:$0xff] }
 0x2a2   : > { %5025 = vmatpush1.bf16.msra.mxu1 %v5598_v48  ;;  %4854 = vmatprep.subr.bf16.mxu0 %v5605_v49  ;;  %v5653_v48 = vcombine.high %v1470_v43, %v1474_v46  ;;  %v5655_v49 = vcombine.high %v1471_v22, %v1475_v0  ;;  %v1522_v43 = vld [vmem:[#allocation8 + $0x430] sm:$0xff]  ;;  %v1519_v46 = vld [vmem:[#allocation8 + $0x418] sm:$0xff] }
 0x2a3   : > { %5026 = vmatprep.subr.bf16.mxu1 %v5607_v51  ;;  %v1478_v51 = vld [vmem:[#allocation8 + $0x2d0] sm:$0xff] }
 0x2a4   : > { %v5660_v63 = vcombine.low %v1478_v51, %v1482_v52 }
 0x2a5   : > { %4855 = vmatpush1.bf16.msra.mxu0 %v5604_v57  ;;  %v5654_v57 = vcombine.low %v1471_v22, %v1475_v0  ;;  %v1523_v22 = vld [vmem:[#allocation8 + $0x438] sm:$0xff] }
 0x2a6   : > { %5027 = vmatpush1.bf16.msra.mxu1 %v5606_v58  ;;  %4856 = vmatprep.subr.bf16.mxu0 %v5613_v59  ;;  %v5661_v58 = vcombine.high %v1478_v51, %v1482_v52  ;;  %v5663_v59 = vcombine.high %v1479_v53, %v1483_v55  ;;  %v1530_v51 = vld [vmem:[#allocation8 + $0x470] sm:$0xff] }
 0x2a7   : > { %5028 = vmatprep.subr.bf16.mxu1 %v5615_v60  ;;  %v1486_v60 = vld [vmem:[#allocation8 + $0x310] sm:$0xff] }
 0x2a8   : > { %v5668_v6 = vcombine.low %v1486_v60, %v1490_v61 }
 0x2a9   : > { %4857 = vmatpush1.bf16.msra.mxu0 %v5612_v4  ;;  %v5662_v4 = vcombine.low %v1479_v53, %v1483_v55  ;;  %v1527_v53 = vld [vmem:[#allocation8 + $0x458] sm:$0xff] }
 0x2aa   : > { %5029 = vmatpush1.bf16.msra.mxu1 %v5614_v5  ;;  %4858 = vmatprep.subr.bf16.mxu0 %v5621_v1  ;;  %v5669_v5 = vcombine.high %v1486_v60, %v1490_v61  ;;  %v5671_v1 = vcombine.high %v1487_v23, %v1491_v62  ;;  %v1531_v55 = vld [vmem:[#allocation8 + $0x478] sm:$0xff] }
 0x2ab   : > { %5030 = vmatprep.subr.bf16.mxu1 %v5623_v2  ;;  %v1494_v2 = vld [vmem:[#allocation8 + $0x350] sm:$0xff]  ;;  %v5711_v60 = vcombine.high %v1527_v53, %v1531_v55  ;;  %v1535_v61 = vld [vmem:[#allocation8 + $0x498] sm:$0xff] }
 0x2ac   : > { %v5676_v16 = vcombine.low %v1494_v2, %v1498_v8 }
 0x2ad   : > { %4859 = vmatpush1.bf16.msra.mxu0 %v5620_v9  ;;  %v5670_v9 = vcombine.low %v1487_v23, %v1491_v62  ;;  %v1539_v23 = vld [vmem:[#allocation8 + $0x4b8] sm:$0xff] }
 0x2ae   : > { %5031 = vmatpush1.bf16.msra.mxu1 %v5622_v10  ;;  %4860 = vmatprep.subr.bf16.mxu0 %v5629_v11  ;;  %v5677_v10 = vcombine.high %v1494_v2, %v1498_v8  ;;  %v5679_v11 = vcombine.high %v1495_v7, %v1499_v3  ;;  %v1546_v2 = vld [vmem:[#allocation8 + $0x4f0] sm:$0xff]  ;;  %v1543_v8 = vld [vmem:[#allocation8 + $0x4d8] sm:$0xff] }
 0x2af   : > { %5032 = vmatprep.subr.bf16.mxu1 %v5631_v12  ;;  %v1502_v12 = vld [vmem:[#allocation8 + $0x390] sm:$0xff] }
 0x2b0   : > { %v5684_v36 = vcombine.low %v1502_v12, %v1506_v13 }
 0x2b1   : > { %4861 = vmatpush1.bf16.msra.mxu0 %v5628_v17  ;;  %v5678_v17 = vcombine.low %v1495_v7, %v1499_v3  ;;  %v1547_v7 = vld [vmem:[#allocation8 + $0x4f8] sm:$0xff] }
 0x2b2   : > { %5033 = vmatpush1.bf16.msra.mxu1 %v5630_v27  ;;  %4862 = vmatprep.subr.bf16.mxu0 %v5637_v28  ;;  %v5685_v27 = vcombine.high %v1502_v12, %v1506_v13  ;;  %v5687_v28 = vcombine.high %v1503_v14, %v1507_v15  ;;  %v1551_v12 = vld [vmem:[#allocation8 + $0x518] sm:$0xff] }
 0x2b3   : > { %5034 = vmatprep.subr.bf16.mxu1 %v5639_v30  ;;  %v1510_v30 = vld [vmem:[#allocation8 + $0x3d0] sm:$0xff]  ;;  %v1555_v13 = vld [vmem:[#allocation8 + $0x538] sm:$0xff] }
 0x2b4   : > { %v5692_v0 = vcombine.low %v1510_v30, %v1514_v31 }
 0x2b5   : > { %4863 = vmatpush1.bf16.msra.mxu0 %v5636_v37  ;;  %v5686_v37 = vcombine.low %v1503_v14, %v1507_v15  ;;  %v5726_v14 = vcombine.low %v1543_v8, %v1547_v7 }
 0x2b6   : > { %5035 = vmatpush1.bf16.msra.mxu1 %v5638_v38  ;;  %4864 = vmatprep.subr.bf16.mxu0 %v5645_v40  ;;  %v5693_v38 = vcombine.high %v1510_v30, %v1514_v31  ;;  %v5695_v40 = vcombine.high %v1511_v32, %v1515_v33  ;;  %v1563_v30 = vld [vmem:[#allocation8 + $0x578] sm:$0xff] }
 0x2b7   : > { %5036 = vmatprep.subr.bf16.mxu1 %v5647_v41  ;;  %v1518_v41 = vld [vmem:[#allocation8 + $0x410] sm:$0xff] }
 0x2b8   : > { %v5700_v52 = vcombine.low %v1518_v41, %v1522_v43 }
 0x2b9   : > { %4865 = vmatpush1.bf16.msra.mxu0 %v5644_v20  ;;  %v5694_v20 = vcombine.low %v1511_v32, %v1515_v33  ;;  %v5734_v32 = vcombine.low %v1551_v12, %v1555_v13 }
 0x2ba   : > { %5037 = vmatpush1.bf16.msra.mxu1 %v5646_v47  ;;  %4866 = vmatprep.subr.bf16.mxu0 %v5653_v48  ;;  %v5701_v47 = vcombine.high %v1518_v41, %v1522_v43  ;;  %v5703_v48 = vcombine.high %v1519_v46, %v1523_v22  ;;  %v1571_v41 = vld [vmem:[#allocation8 + $0x5b8] sm:$0xff] }
 0x2bb   : > { %5038 = vmatprep.subr.bf16.mxu1 %v5655_v49  ;;  %v1526_v49 = vld [vmem:[#allocation8 + $0x450] sm:$0xff] }
 0x2bc   : > { %v5708_v62 = vcombine.low %v1526_v49, %v1530_v51 }
 0x2bd   : > { %4867 = vmatpush1.bf16.msra.mxu0 %v5652_v56  ;;  %v5702_v56 = vcombine.low %v1519_v46, %v1523_v22 }
 0x2be   : > { %5039 = vmatpush1.bf16.msra.mxu1 %v5654_v57  ;;  %4868 = vmatprep.subr.bf16.mxu0 %v5661_v58  ;;  %v5709_v57 = vcombine.high %v1526_v49, %v1530_v51  ;;  %v1534_v58 = vld [vmem:[#allocation8 + $0x490] sm:$0xff]  ;;  %v1579_v49 = vld [vmem:[#allocation8 + $0x5f8] sm:$0xff] }
 0x2bf   : > { %5040 = vmatprep.subr.bf16.mxu1 %v5663_v59  ;;  %v1538_v59 = vld [vmem:[#allocation8 + $0x4b0] sm:$0xff] }
 0x2c0   : > { %v5716_v3 = vcombine.low %v1534_v58, %v1538_v59 }
 0x2c1   : > { %4869 = vmatpush1.bf16.msra.mxu0 %v5660_v63  ;;  %v5710_v63 = vcombine.low %v1527_v53, %v1531_v55 }
 0x2c2   : > { %5041 = vmatpush1.bf16.msra.mxu1 %v5662_v4  ;;  %4870 = vmatprep.subr.bf16.mxu0 %v5669_v5  ;;  %v5717_v4 = vcombine.high %v1534_v58, %v1538_v59  ;;  %v5719_v5 = vcombine.high %v1535_v61, %v1539_v23  ;;  %v1583_v58 = vld [vmem:[#allocation8 + $0x618] sm:$0xff] }
 0x2c3   : > { %5042 = vmatprep.subr.bf16.mxu1 %v5671_v1  ;;  %v1542_v1 = vld [vmem:[#allocation8 + $0x4d0] sm:$0xff]  ;;  %v1587_v59 = vld [vmem:[#allocation8 + $0x638] sm:$0xff] }
 0x2c5   : > { %4871 = vmatpush1.bf16.msra.mxu0 %v5668_v6  ;;  %v5725_v6 = vcombine.high %v1542_v1, %v1546_v2 }
 0x2c6   : > { %5043 = vmatpush1.bf16.msra.mxu1 %v5670_v9  ;;  %4872 = vmatprep.subr.bf16.mxu0 %v5677_v10  ;;  %v5727_v9 = vcombine.high %v1543_v8, %v1547_v7  ;;  %v1550_v10 = vld [vmem:[#allocation8 + $0x510] sm:$0xff]  ;;  %v5766_v8 = vcombine.low %v1583_v58, %v1587_v59 }
 0x2c7   : > { %5044 = vmatprep.subr.bf16.mxu1 %v5679_v11  ;;  %v1554_v11 = vld [vmem:[#allocation8 + $0x530] sm:$0xff] }
 0x2c8   : > { %v5733_v15 = vcombine.high %v1550_v10, %v1554_v11  ;;  %v5732_v31 = vcombine.low %v1550_v10, %v1554_v11  ;;  %v1603_v10 = vld [vmem:[#allocation8 + $0x6b8] sm:$0xff] }
 0x2c9   : > { %4873 = vmatpush1.bf16.msra.mxu0 %v5676_v16  ;;  %v5735_v16 = vcombine.high %v1551_v12, %v1555_v13 }
 0x2ca   : > { %5045 = vmatpush1.bf16.msra.mxu1 %v5678_v17  ;;  %4874 = vmatprep.subr.bf16.mxu0 %v5685_v27  ;;  %v1558_v17 = vld [vmem:[#allocation8 + $0x550] sm:$0xff] }
 0x2cb   : > { %5046 = vmatprep.subr.bf16.mxu1 %v5687_v28  ;;  %v1562_v27 = vld [vmem:[#allocation8 + $0x570] sm:$0xff]  ;;  %v1559_v28 = vld [vmem:[#allocation8 + $0x558] sm:$0xff] }
 0x2cc   : > { %v5741_v33 = vcombine.high %v1558_v17, %v1562_v27  ;;  %v5740_v43 = vcombine.low %v1558_v17, %v1562_v27  ;;  %v5742_v46 = vcombine.low %v1559_v28, %v1563_v30  ;;  %v1611_v17 = vld [vmem:[#allocation8 + $0x6f8] sm:$0xff] }
 0x2cd   : > { %4875 = vmatpush1.bf16.msra.mxu0 %v5684_v36  ;;  %v5743_v36 = vcombine.high %v1559_v28, %v1563_v30 }
 0x2ce   : > { %5047 = vmatpush1.bf16.msra.mxu1 %v5686_v37  ;;  %4876 = vmatprep.subr.bf16.mxu0 %v5693_v38  ;;  %v1566_v37 = vld [vmem:[#allocation8 + $0x590] sm:$0xff] }
 0x2cf   : > { %5048 = vmatprep.subr.bf16.mxu1 %v5695_v40  ;;  %v1570_v38 = vld [vmem:[#allocation8 + $0x5b0] sm:$0xff]  ;;  %v1567_v40 = vld [vmem:[#allocation8 + $0x598] sm:$0xff] }
 0x2d0   : > { %v5749_v22 = vcombine.high %v1566_v37, %v1570_v38  ;;  %v5748_v51 = vcombine.low %v1566_v37, %v1570_v38  ;;  %v1619_v37 = vld [vmem:[#allocation8 + $0x738] sm:$0xff] }
 0x2d1   : > { %4877 = vmatpush1.bf16.msra.mxu0 %v5692_v0  ;;  %v5751_v0 = vcombine.high %v1567_v40, %v1571_v41 }
 0x2d2   : > { %5049 = vmatpush1.bf16.msra.mxu1 %v5694_v20  ;;  %4889 = vmatprep.subr.bf16.mxu0 %v5701_v47  ;;  %v1574_v20 = vld [vmem:[#allocation8 + $0x5d0] sm:$0xff] }
 0x2d3   : > { %5061 = vmatprep.subr.bf16.mxu1 %v5703_v48  ;;  %v1578_v47 = vld [vmem:[#allocation8 + $0x5f0] sm:$0xff]  ;;  %v1575_v48 = vld [vmem:[#allocation8 + $0x5d8] sm:$0xff] }
 0x2d4   : > { %4879 = vmatmul.mubr.bf16.vlgmr.msra.gmra.mrb[12].mxu0 %v6820_v45  ;;  %v5757_v53 = vcombine.high %v1574_v20, %v1578_v47  ;;  %v5759_v55 = vcombine.high %v1575_v48, %v1579_v49 }
 0x2d5   : > { %5051 = vmatmul.mubr.bf16.vlgmr.msra.gmra.mrb[12].mxu1 %v6820_v45  ;;  %4890 = vmatpush1.bf16.msra.mxu0 %v5700_v52  ;;  %v5718_v45 = vcombine.low %v1535_v61, %v1539_v23  ;;  %v5750_v52 = vcombine.low %v1567_v40, %v1571_v41  ;;  %v5758_v61 = vcombine.low %v1575_v48, %v1579_v49 }
 0x2d6   : > { %4921 = vmatprep.mubr.bf16.mxu0 %v6840_v19  ;;  %5062 = vmatpush1.bf16.msra.mxu1 %v5702_v56  ;;  %v1582_v56 = vld [vmem:[#allocation8 + $0x610] sm:$0xff] }
 0x2d7   : > { %5093 = vmatprep.mubr.bf16.mxu1 %v6840_v19  ;;  %4891 = vmatprep.subr.bf16.mxu0 %v5709_v57  ;;  %v5724_v19 = vcombine.low %v1542_v1, %v1546_v2  ;;  %v1586_v57 = vld [vmem:[#allocation8 + $0x630] sm:$0xff]  ;;  %v1595_v1 = vld [vmem:[#allocation8 + $0x678] sm:$0xff] }
 0x2d8   : > { %5063 = vmatprep.subr.bf16.mxu1 %v5711_v60  ;;  %v5756_v60 = vcombine.low %v1574_v20, %v1578_v47  ;;  %v5765_v23 = vcombine.high %v1582_v56, %v1586_v57  ;;  %v5764_v2 = vcombine.low %v1582_v56, %v1586_v57  ;;  %v1627_v20 = vld [vmem:[#allocation8 + $0x778] sm:$0xff] }
 0x2d9   : > { %4892 = vmatpush1.bf16.msra.mxu0 %v5708_v62  ;;  %v5767_v62 = vcombine.high %v1583_v58, %v1587_v59  ;;  %v1635_v56 = vld [vmem:[#allocation8 + $0x7b8] sm:$0xff] }
 0x2da   : > { %5064 = vmatpush1.bf16.msra.mxu1 %v5710_v63  ;;  %4893 = vmatprep.subr.bf16.mxu0 %v5717_v4  ;;  %v1590_v63 = vld [vmem:[#allocation8 + $0x650] sm:$0xff] }
 0x2db   : > { %5065 = vmatprep.subr.bf16.mxu1 %v5719_v5  ;;  %v1594_v4 = vld [vmem:[#allocation8 + $0x670] sm:$0xff]  ;;  %v1591_v5 = vld [vmem:[#allocation8 + $0x658] sm:$0xff] }
 0x2dc   : > { %v5773_v7 = vcombine.high %v1590_v63, %v1594_v4  ;;  %v5772_v11 = vcombine.low %v1590_v63, %v1594_v4  ;;  %v5774_v12 = vcombine.low %v1591_v5, %v1595_v1  ;;  %v1643_v63 = vld [vmem:[#allocation8 + $0x7f8] sm:$0xff] }
 0x2dd   : > { %4894 = vmatpush1.bf16.msra.mxu0 %v5716_v3  ;;  %v5775_v3 = vcombine.high %v1591_v5, %v1595_v1 }
 0x2de   : > { %5066 = vmatpush1.bf16.msra.mxu1 %v5718_v45  ;;  %4895 = vmatprep.subr.bf16.mxu0 %v5725_v6  ;;  %v1598_v45 = vld [vmem:[#allocation8 + $0x690] sm:$0xff] }
 0x2df   : > { %5067 = vmatprep.subr.bf16.mxu1 %v5727_v9  ;;  %v1602_v6 = vld [vmem:[#allocation8 + $0x6b0] sm:$0xff]  ;;  %v1599_v9 = vld [vmem:[#allocation8 + $0x698] sm:$0xff] }
 0x2e0   : > { %v5781_v13 = vcombine.high %v1598_v45, %v1602_v6  ;;  %v5780_v27 = vcombine.low %v1598_v45, %v1602_v6  ;;  %v5782_v28 = vcombine.low %v1599_v9, %v1603_v10  ;;  %v1651_v45 = vld [vmem:[#allocation8 + $0x838] sm:$0xff] }
 0x2e1   : > { %4896 = vmatpush1.bf16.msra.mxu0 %v5724_v19  ;;  %v5783_v19 = vcombine.high %v1599_v9, %v1603_v10 }
 0x2e2   : > { %5068 = vmatpush1.bf16.msra.mxu1 %v5726_v14  ;;  %4897 = vmatprep.subr.bf16.mxu0 %v5733_v15  ;;  %v1606_v14 = vld [vmem:[#allocation8 + $0x6d0] sm:$0xff] }
 0x2e3   : > { %5069 = vmatprep.subr.bf16.mxu1 %v5735_v16  ;;  %v1610_v15 = vld [vmem:[#allocation8 + $0x6f0] sm:$0xff]  ;;  %v1607_v16 = vld [vmem:[#allocation8 + $0x6d8] sm:$0xff] }
 0x2e4   : > { %v5789_v30 = vcombine.high %v1606_v14, %v1610_v15  ;;  %v5788_v38 = vcombine.low %v1606_v14, %v1610_v15  ;;  %v5790_v40 = vcombine.low %v1607_v16, %v1611_v17  ;;  %v1655_v14 = vld [vmem:[#allocation8 + $0x858] sm:$0xff] }
 0x2e5   : > { %4898 = vmatpush1.bf16.msra.mxu0 %v5732_v31  ;;  %v5791_v31 = vcombine.high %v1607_v16, %v1611_v17  ;;  %v1659_v15 = vld [vmem:[#allocation8 + $0x878] sm:$0xff] }
 0x2e6   : > { %5070 = vmatpush1.bf16.msra.mxu1 %v5734_v32  ;;  %4899 = vmatprep.subr.bf16.mxu0 %v5741_v33  ;;  %v1614_v32 = vld [vmem:[#allocation8 + $0x710] sm:$0xff] }
 0x2e7   : > { %5071 = vmatprep.subr.bf16.mxu1 %v5743_v36  ;;  %v1618_v33 = vld [vmem:[#allocation8 + $0x730] sm:$0xff]  ;;  %v1615_v36 = vld [vmem:[#allocation8 + $0x718] sm:$0xff] }
 0x2e8   : > { %v5797_v41 = vcombine.high %v1614_v32, %v1618_v33  ;;  %v5796_v47 = vcombine.low %v1614_v32, %v1618_v33  ;;  %v5798_v48 = vcombine.low %v1615_v36, %v1619_v37  ;;  %v1667_v32 = vld [vmem:[#allocation8 + $0x8b8] sm:$0xff] }
 0x2e9   : > { %4900 = vmatpush1.bf16.msra.mxu0 %v5740_v43  ;;  %v5799_v43 = vcombine.high %v1615_v36, %v1619_v37  ;;  %v5838_v36 = vcombine.low %v1655_v14, %v1659_v15 }
 0x2ea   : > { %5072 = vmatpush1.bf16.msra.mxu1 %v5742_v46  ;;  %4901 = vmatprep.subr.bf16.mxu0 %v5749_v22  ;;  %v1622_v46 = vld [vmem:[#allocation8 + $0x750] sm:$0xff] }
 0x2eb   : > { %5073 = vmatprep.subr.bf16.mxu1 %v5751_v0  ;;  %v1626_v22 = vld [vmem:[#allocation8 + $0x770] sm:$0xff]  ;;  %v1623_v0 = vld [vmem:[#allocation8 + $0x758] sm:$0xff] }
 0x2ec   : > { %v5805_v49 = vcombine.high %v1622_v46, %v1626_v22  ;;  %v5804_v57 = vcombine.low %v1622_v46, %v1626_v22  ;;  %v5806_v58 = vcombine.low %v1623_v0, %v1627_v20  ;;  %v1675_v46 = vld [vmem:[#allocation8 + $0x8f8] sm:$0xff] }
 0x2ed   : > { %4902 = vmatpush1.bf16.msra.mxu0 %v5748_v51  ;;  %v5807_v51 = vcombine.high %v1623_v0, %v1627_v20 }
 0x2ee   : > { %5074 = vmatpush1.bf16.msra.mxu1 %v5750_v52  ;;  %4903 = vmatprep.subr.bf16.mxu0 %v5757_v53  ;;  %v1630_v52 = vld [vmem:[#allocation8 + $0x790] sm:$0xff] }
 0x2ef   : > { %5075 = vmatprep.subr.bf16.mxu1 %v5759_v55  ;;  %v1634_v53 = vld [vmem:[#allocation8 + $0x7b0] sm:$0xff]  ;;  %v1631_v55 = vld [vmem:[#allocation8 + $0x798] sm:$0xff] }
 0x2f0   : > { %v5813_v59 = vcombine.high %v1630_v52, %v1634_v53  ;;  %v5812_v4 = vcombine.low %v1630_v52, %v1634_v53  ;;  %v5814_v5 = vcombine.low %v1631_v55, %v1635_v56 }
 0x2f1   : > { %4904 = vmatpush1.bf16.msra.mxu0 %v5756_v60  ;;  %v5815_v60 = vcombine.high %v1631_v55, %v1635_v56  ;;  %v1686_v56 = vld [vmem:[#allocation8 + $0x950] sm:$0xff] }
 0x2f2   : > { %5076 = vmatpush1.bf16.msra.mxu1 %v5758_v61  ;;  %4905 = vmatprep.subr.bf16.mxu0 %v5765_v23  ;;  %v1638_v61 = vld [vmem:[#allocation8 + $0x7d0] sm:$0xff] }
 0x2f3   : > { %5077 = vmatprep.subr.bf16.mxu1 %v5767_v62  ;;  %v1642_v23 = vld [vmem:[#allocation8 + $0x7f0] sm:$0xff]  ;;  %v1639_v62 = vld [vmem:[#allocation8 + $0x7d8] sm:$0xff] }
 0x2f4   : > { %v5821_v1 = vcombine.high %v1638_v61, %v1642_v23  ;;  %v5820_v6 = vcombine.low %v1638_v61, %v1642_v23  ;;  %v5822_v9 = vcombine.low %v1639_v62, %v1643_v63 }
 0x2f5   : > { %4906 = vmatpush1.bf16.msra.mxu0 %v5764_v2  ;;  %v5823_v2 = vcombine.high %v1639_v62, %v1643_v63  ;;  %v1694_v63 = vld [vmem:[#allocation8 + $0x990] sm:$0xff] }
 0x2f6   : > { %5078 = vmatpush1.bf16.msra.mxu1 %v5766_v8  ;;  %4907 = vmatprep.subr.bf16.mxu0 %v5773_v7  ;;  %v1646_v8 = vld [vmem:[#allocation8 + $0x810] sm:$0xff] }
 0x2f7   : > { %5079 = vmatprep.subr.bf16.mxu1 %v5775_v3  ;;  %v1650_v7 = vld [vmem:[#allocation8 + $0x830] sm:$0xff]  ;;  %v1647_v3 = vld [vmem:[#allocation8 + $0x818] sm:$0xff] }
 0x2f8   : > { %v5829_v10 = vcombine.high %v1646_v8, %v1650_v7  ;;  %v5830_v16 = vcombine.low %v1647_v3, %v1651_v45 }
 0x2f9   : > { %4908 = vmatpush1.bf16.msra.mxu0 %v5772_v11  ;;  %v5831_v11 = vcombine.high %v1647_v3, %v1651_v45  ;;  %v1702_v45 = vld [vmem:[#allocation8 + $0x9d0] sm:$0xff] }
 0x2fa   : > { %5080 = vmatpush1.bf16.msra.mxu1 %v5774_v12  ;;  %4909 = vmatprep.subr.bf16.mxu0 %v5781_v13  ;;  %v1654_v12 = vld [vmem:[#allocation8 + $0x850] sm:$0xff] }
 0x2fb   : > { %5081 = vmatprep.subr.bf16.mxu1 %v5783_v19  ;;  %v1658_v13 = vld [vmem:[#allocation8 + $0x870] sm:$0xff]  ;;  %v5828_v19 = vcombine.low %v1646_v8, %v1650_v7 }
 0x2fc   : > { %v5837_v17 = vcombine.high %v1654_v12, %v1658_v13  ;;  %v5836_v33 = vcombine.low %v1654_v12, %v1658_v13 }
 0x2fd   : > { %4910 = vmatpush1.bf16.msra.mxu0 %v5780_v27  ;;  %v1662_v27 = vld [vmem:[#allocation8 + $0x890] sm:$0xff] }
 0x2fe   : > { %5082 = vmatpush1.bf16.msra.mxu1 %v5782_v28  ;;  %4911 = vmatprep.subr.bf16.mxu0 %v5789_v30  ;;  %v1666_v28 = vld [vmem:[#allocation8 + $0x8b0] sm:$0xff]  ;;  %v5839_v30 = vcombine.high %v1655_v14, %v1659_v15 }
 0x2ff   : > { %5083 = vmatprep.subr.bf16.mxu1 %v5791_v31  ;;  %v1663_v31 = vld [vmem:[#allocation8 + $0x898] sm:$0xff]  ;;  %v5845_v37 = vcombine.high %v1662_v27, %v1666_v28  ;;  %v5844_v22 = vcombine.low %v1662_v27, %v1666_v28  ;;  %v1710_v14 = vld [vmem:[#allocation8 + $0xa10] sm:$0xff] }
 0x300   : > { %v1714_v15 = vld [vmem:[#allocation8 + $0xa30] sm:$0xff] }
 0x301   : > { %4912 = vmatpush1.bf16.msra.mxu0 %v5788_v38  ;;  %v5847_v38 = vcombine.high %v1663_v31, %v1667_v32 }
 0x302   : > { %5084 = vmatpush1.bf16.msra.mxu1 %v5790_v40  ;;  %4913 = vmatprep.subr.bf16.mxu0 %v5797_v41  ;;  %v1670_v40 = vld [vmem:[#allocation8 + $0x8d0] sm:$0xff] }
 0x303   : > { %5085 = vmatprep.subr.bf16.mxu1 %v5799_v43  ;;  %v1674_v41 = vld [vmem:[#allocation8 + $0x8f0] sm:$0xff]  ;;  %v1671_v43 = vld [vmem:[#allocation8 + $0x8d8] sm:$0xff] }
 0x304   : > { %v5853_v0 = vcombine.high %v1670_v40, %v1674_v41  ;;  %v5855_v20 = vcombine.high %v1671_v43, %v1675_v46  ;;  %v5854_v52 = vcombine.low %v1671_v43, %v1675_v46  ;;  %v1726_v46 = vld [vmem:[#allocation8 + $0xa90] sm:$0xff] }
 0x305   : > { %4914 = vmatpush1.bf16.msra.mxu0 %v5796_v47  ;;  %v1678_v47 = vld [vmem:[#allocation8 + $0x910] sm:$0xff] }
 0x306   : > { %5086 = vmatpush1.bf16.msra.mxu1 %v5798_v48  ;;  %4915 = vmatprep.subr.bf16.mxu0 %v5805_v49  ;;  %v1682_v48 = vld [vmem:[#allocation8 + $0x930] sm:$0xff]  ;;  %v1679_v49 = vld [vmem:[#allocation8 + $0x918] sm:$0xff] }
 0x307   : > { %5087 = vmatprep.subr.bf16.mxu1 %v5807_v51  ;;  %v1683_v51 = vld [vmem:[#allocation8 + $0x938] sm:$0xff]  ;;  %v5861_v53 = vcombine.high %v1678_v47, %v1682_v48 }
 0x308   : > { %v5863_v55 = vcombine.high %v1679_v49, %v1683_v51  ;;  %v5862_v61 = vcombine.low %v1679_v49, %v1683_v51  ;;  %v1734_v51 = vld [vmem:[#allocation8 + $0xad0] sm:$0xff] }
 0x309   : > { %4916 = vmatpush1.bf16.msra.mxu0 %v5804_v57  ;;  %v1690_v57 = vld [vmem:[#allocation8 + $0x970] sm:$0xff] }
 0x30a   : > { %5088 = vmatpush1.bf16.msra.mxu1 %v5806_v58  ;;  %4917 = vmatprep.subr.bf16.mxu0 %v5813_v59  ;;  %v1687_v58 = vld [vmem:[#allocation8 + $0x958] sm:$0xff]  ;;  %v5869_v23 = vcombine.high %v1686_v56, %v1690_v57 }
 0x30b   : > { %5089 = vmatprep.subr.bf16.mxu1 %v5815_v60  ;;  %v1691_v59 = vld [vmem:[#allocation8 + $0x978] sm:$0xff]  ;;  %v5860_v60 = vcombine.low %v1678_v47, %v1682_v48 }
 0x30c   : > { %v5871_v62 = vcombine.high %v1687_v58, %v1691_v59  ;;  %v5870_v8 = vcombine.low %v1687_v58, %v1691_v59  ;;  %v1742_v59 = vld [vmem:[#allocation8 + $0xb10] sm:$0xff] }
 0x30d   : > { %4918 = vmatpush1.bf16.msra.mxu0 %v5812_v4  ;;  %v1698_v4 = vld [vmem:[#allocation8 + $0x9b0] sm:$0xff] }
 0x30e   : > { %5090 = vmatpush1.bf16.msra.mxu1 %v5814_v5  ;;  %4919 = vmatprep.subr.bf16.mxu0 %v5821_v1  ;;  %v1695_v5 = vld [vmem:[#allocation8 + $0x998] sm:$0xff]  ;;  %v5877_v7 = vcombine.high %v1694_v63, %v1698_v4 }
 0x30f   : > { %5091 = vmatprep.subr.bf16.mxu1 %v5823_v2  ;;  %v1699_v1 = vld [vmem:[#allocation8 + $0x9b8] sm:$0xff]  ;;  %v5868_v2 = vcombine.low %v1686_v56, %v1690_v57 }
 0x310   : > { %v5879_v3 = vcombine.high %v1695_v5, %v1699_v1  ;;  %v5878_v12 = vcombine.low %v1695_v5, %v1699_v1  ;;  %v1750_v1 = vld [vmem:[#allocation8 + $0xb50] sm:$0xff] }
 0x311   : > { %4920 = vmatpush1.bf16.msra.mxu0 %v5820_v6  ;;  %v1706_v6 = vld [vmem:[#allocation8 + $0x9f0] sm:$0xff] }
 0x312   : > { %5092 = vmatpush1.bf16.msra.mxu1 %v5822_v9  ;;  %4932 = vmatprep.subr.bf16.mxu0 %v5829_v10  ;;  %v1703_v9 = vld [vmem:[#allocation8 + $0x9d8] sm:$0xff]  ;;  %v5885_v13 = vcombine.high %v1702_v45, %v1706_v6  ;;  %v5884_v27 = vcombine.low %v1702_v45, %v1706_v6 }
 0x313   : > { %5104 = vmatprep.subr.bf16.mxu1 %v5831_v11  ;;  %v1707_v10 = vld [vmem:[#allocation8 + $0x9f8] sm:$0xff]  ;;  %v5876_v11 = vcombine.low %v1694_v63, %v1698_v4 }
 0x314   : > { %4922 = vmatmul.mubr.bf16.vlgmr.msra.gmra.mrb[12].mxu0 %v6838_v18  ;;  %v5886_v28 = vcombine.low %v1703_v9, %v1707_v10 }
 0x315   : > { %5094 = vmatmul.mubr.bf16.vlgmr.msra.gmra.mrb[12].mxu1 %v6838_v18  ;;  %4933 = vmatpush1.bf16.msra.mxu0 %v5828_v19  ;;  %v5846_v18 = vcombine.low %v1663_v31, %v1667_v32  ;;  %v5887_v19 = vcombine.high %v1703_v9, %v1707_v10  ;;  %v1718_v32 = vld [vmem:[#allocation8 + $0xa50] sm:$0xff] }
 0x316   : > { %4964 = vmatprep.mubr.bf16.mxu0 %v6862_v44  ;;  %5105 = vmatpush1.bf16.msra.mxu1 %v5830_v16  ;;  %v1711_v16 = vld [vmem:[#allocation8 + $0xa18] sm:$0xff]  ;;  %v1758_v10 = vld [vmem:[#allocation8 + $0xb90] sm:$0xff] }
 0x317   : > { %5136 = vmatprep.mubr.bf16.mxu1 %v6862_v44  ;;  %4934 = vmatprep.subr.bf16.mxu0 %v5837_v17  ;;  %v5852_v44 = vcombine.low %v1670_v40, %v1674_v41  ;;  %v1715_v17 = vld [vmem:[#allocation8 + $0xa38] sm:$0xff] }
 0x318   : > { %5106 = vmatprep.subr.bf16.mxu1 %v5839_v30  ;;  %v5893_v30 = vcombine.high %v1710_v14, %v1714_v15  ;;  %v5895_v31 = vcombine.high %v1711_v16, %v1715_v17  ;;  %v5894_v40 = vcombine.low %v1711_v16, %v1715_v17  ;;  %v1766_v17 = vld [vmem:[#allocation8 + $0xbd0] sm:$0xff] }
 0x319   : > { %4935 = vmatpush1.bf16.msra.mxu0 %v5836_v33  ;;  %v1722_v33 = vld [vmem:[#allocation8 + $0xa70] sm:$0xff] }
 0x31a   : > { %5107 = vmatpush1.bf16.msra.mxu1 %v5838_v36  ;;  %4936 = vmatprep.subr.bf16.mxu0 %v5845_v37  ;;  %v1719_v36 = vld [vmem:[#allocation8 + $0xa58] sm:$0xff]  ;;  %v5901_v41 = vcombine.high %v1718_v32, %v1722_v33 }
 0x31b   : > { %5108 = vmatprep.subr.bf16.mxu1 %v5847_v38  ;;  %v1723_v37 = vld [vmem:[#allocation8 + $0xa78] sm:$0xff]  ;;  %v5892_v38 = vcombine.low %v1710_v14, %v1714_v15 }
 0x31c   : > { %v5903_v43 = vcombine.high %v1719_v36, %v1723_v37  ;;  %v5902_v47 = vcombine.low %v1719_v36, %v1723_v37  ;;  %v1774_v37 = vld [vmem:[#allocation8 + $0xc10] sm:$0xff] }
 0x31d   : > { %4937 = vmatpush1.bf16.msra.mxu0 %v5844_v22  ;;  %v1730_v22 = vld [vmem:[#allocation8 + $0xab0] sm:$0xff] }
 0x31e   : > { %5109 = vmatpush1.bf16.msra.mxu1 %v5846_v18  ;;  %4938 = vmatprep.subr.bf16.mxu0 %v5853_v0  ;;  %v1727_v18 = vld [vmem:[#allocation8 + $0xa98] sm:$0xff]  ;;  %v5909_v48 = vcombine.high %v1726_v46, %v1730_v22 }
 0x31f   : > { %5110 = vmatprep.subr.bf16.mxu1 %v5855_v20  ;;  %v1731_v0 = vld [vmem:[#allocation8 + $0xab8] sm:$0xff]  ;;  %v5900_v20 = vcombine.low %v1718_v32, %v1722_v33 }
 0x320   : > { %v5911_v49 = vcombine.high %v1727_v18, %v1731_v0  ;;  %v5910_v56 = vcombine.low %v1727_v18, %v1731_v0  ;;  %v1782_v0 = vld [vmem:[#allocation8 + $0xc50] sm:$0xff] }
 0x321   : > { %4939 = vmatpush1.bf16.msra.mxu0 %v5852_v44  ;;  %v1738_v44 = vld [vmem:[#allocation8 + $0xaf0] sm:$0xff] }
 0x322   : > { %5111 = vmatpush1.bf16.msra.mxu1 %v5854_v52  ;;  %4940 = vmatprep.subr.bf16.mxu0 %v5861_v53  ;;  %v1735_v52 = vld [vmem:[#allocation8 + $0xad8] sm:$0xff]  ;;  %v5917_v57 = vcombine.high %v1734_v51, %v1738_v44 }
 0x323   : > { %5112 = vmatprep.subr.bf16.mxu1 %v5863_v55  ;;  %v1739_v53 = vld [vmem:[#allocation8 + $0xaf8] sm:$0xff]  ;;  %v5908_v55 = vcombine.low %v1726_v46, %v1730_v22 }
 0x324   : > { %v5919_v58 = vcombine.high %v1735_v52, %v1739_v53  ;;  %v5918_v63 = vcombine.low %v1735_v52, %v1739_v53  ;;  %v1790_v52 = vld [vmem:[#allocation8 + $0xc90] sm:$0xff] }
 0x325   : > { %4941 = vmatpush1.bf16.msra.mxu0 %v5860_v60  ;;  %v1746_v60 = vld [vmem:[#allocation8 + $0xb30] sm:$0xff] }
 0x326   : > { %5113 = vmatpush1.bf16.msra.mxu1 %v5862_v61  ;;  %4942 = vmatprep.subr.bf16.mxu0 %v5869_v23  ;;  %v1743_v61 = vld [vmem:[#allocation8 + $0xb18] sm:$0xff]  ;;  %v5925_v4 = vcombine.high %v1742_v59, %v1746_v60  ;;  %v1794_v53 = vld [vmem:[#allocation8 + $0xcb0] sm:$0xff] }
 0x327   : > { %5114 = vmatprep.subr.bf16.mxu1 %v5871_v62  ;;  %v1747_v23 = vld [vmem:[#allocation8 + $0xb38] sm:$0xff]  ;;  %v5916_v62 = vcombine.low %v1734_v51, %v1738_v44 }
 0x328   : > { %v5927_v5 = vcombine.high %v1743_v61, %v1747_v23  ;;  %v5926_v45 = vcombine.low %v1743_v61, %v1747_v23  ;;  %v1798_v23 = vld [vmem:[#allocation8 + $0xcd0] sm:$0xff] }
 0x329   : > { %4943 = vmatpush1.bf16.msra.mxu0 %v5868_v2  ;;  %v1754_v2 = vld [vmem:[#allocation8 + $0xb70] sm:$0xff] }
 0x32a   : > { %5115 = vmatpush1.bf16.msra.mxu1 %v5870_v8  ;;  %4944 = vmatprep.subr.bf16.mxu0 %v5877_v7  ;;  %v1751_v8 = vld [vmem:[#allocation8 + $0xb58] sm:$0xff]  ;;  %v5933_v6 = vcombine.high %v1750_v1, %v1754_v2 }
 0x32b   : > { %5116 = vmatprep.subr.bf16.mxu1 %v5879_v3  ;;  %v1755_v7 = vld [vmem:[#allocation8 + $0xb78] sm:$0xff]  ;;  %v5924_v3 = vcombine.low %v1742_v59, %v1746_v60  ;;  %v5973_v60 = vcombine.high %v1790_v52, %v1794_v53 }
 0x32c   : > { %v5935_v9 = vcombine.high %v1751_v8, %v1755_v7  ;;  %v5934_v14 = vcombine.low %v1751_v8, %v1755_v7  ;;  %v1806_v8 = vld [vmem:[#allocation8 + $0xd10] sm:$0xff] }
 0x32d   : > { %4945 = vmatpush1.bf16.msra.mxu0 %v5876_v11  ;;  %v1762_v11 = vld [vmem:[#allocation8 + $0xbb0] sm:$0xff] }
 0x32e   : > { %5117 = vmatpush1.bf16.msra.mxu1 %v5878_v12  ;;  %4946 = vmatprep.subr.bf16.mxu0 %v5885_v13  ;;  %v1759_v12 = vld [vmem:[#allocation8 + $0xb98] sm:$0xff]  ;;  %v5941_v15 = vcombine.high %v1758_v10, %v1762_v11  ;;  %v1810_v7 = vld [vmem:[#allocation8 + $0xd30] sm:$0xff] }
 0x32f   : > { %5118 = vmatprep.subr.bf16.mxu1 %v5887_v19  ;;  %v1763_v13 = vld [vmem:[#allocation8 + $0xbb8] sm:$0xff]  ;;  %v5932_v19 = vcombine.low %v1750_v1, %v1754_v2 }
 0x330   : > { %v5943_v16 = vcombine.high %v1759_v12, %v1763_v13  ;;  %v5942_v32 = vcombine.low %v1759_v12, %v1763_v13  ;;  %v1818_v12 = vld [vmem:[#allocation8 + $0xd70] sm:$0xff]  ;;  %v1815_v13 = vld [vmem:[#allocation8 + $0xd58] sm:$0xff] }
 0x331   : > { %4947 = vmatpush1.bf16.msra.mxu0 %v5884_v27  ;;  %v1770_v27 = vld [vmem:[#allocation8 + $0xbf0] sm:$0xff] }
 0x332   : > { %5119 = vmatpush1.bf16.msra.mxu1 %v5886_v28  ;;  %4948 = vmatprep.subr.bf16.mxu0 %v5893_v30  ;;  %v1767_v28 = vld [vmem:[#allocation8 + $0xbd8] sm:$0xff]  ;;  %v5949_v33 = vcombine.high %v1766_v17, %v1770_v27 }
 0x333   : > { %5120 = vmatprep.subr.bf16.mxu1 %v5895_v31  ;;  %v1771_v30 = vld [vmem:[#allocation8 + $0xbf8] sm:$0xff]  ;;  %v5940_v31 = vcombine.low %v1758_v10, %v1762_v11  ;;  %v1814_v11 = vld [vmem:[#allocation8 + $0xd50] sm:$0xff] }
 0x334   : > { %v5951_v36 = vcombine.high %v1767_v28, %v1771_v30  ;;  %v5950_v46 = vcombine.low %v1767_v28, %v1771_v30  ;;  %v6898_v28 = vld [vmem:[#allocation8 + $0xd90] sm:$0xff] }
 0x335   : > { %4949 = vmatpush1.bf16.msra.mxu0 %v5892_v38  ;;  %v1778_v38 = vld [vmem:[#allocation8 + $0xc30] sm:$0xff] }
 0x336   : > { %5121 = vmatpush1.bf16.msra.mxu1 %v5894_v40  ;;  %4950 = vmatprep.subr.bf16.mxu0 %v5901_v41  ;;  %v1775_v40 = vld [vmem:[#allocation8 + $0xc18] sm:$0xff]  ;;  %v5957_v22 = vcombine.high %v1774_v37, %v1778_v38  ;;  %v6900_v30 = vld [vmem:[#allocation8 + $0xdb0] sm:$0xff] }
 0x337   : > { %5122 = vmatprep.subr.bf16.mxu1 %v5903_v43  ;;  %v1779_v41 = vld [vmem:[#allocation8 + $0xc38] sm:$0xff]  ;;  %v5948_v43 = vcombine.low %v1766_v17, %v1770_v27  ;;  %v5997_v17 = vcombine.high %v1814_v11, %v1818_v12 }
 0x338   : > { %v5959_v18 = vcombine.high %v1775_v40, %v1779_v41  ;;  %v5958_v51 = vcombine.low %v1775_v40, %v1779_v41  ;;  %v5996_v41 = vcombine.low %v1814_v11, %v1818_v12 }
 0x339   : > { %4951 = vmatpush1.bf16.msra.mxu0 %v5900_v20  ;;  %v1786_v20 = vld [vmem:[#allocation8 + $0xc70] sm:$0xff] }
 0x33a   : > { %5123 = vmatpush1.bf16.msra.mxu1 %v5902_v47  ;;  %4952 = vmatprep.subr.bf16.mxu0 %v5909_v48  ;;  %v5956_v47 = vcombine.low %v1774_v37, %v1778_v38  ;;  %v1783_v48 = vld [vmem:[#allocation8 + $0xc58] sm:$0xff]  ;;  %v5965_v44 = vcombine.high %v1782_v0, %v1786_v20 }
 0x33b   : > { %5124 = vmatprep.subr.bf16.mxu1 %v5911_v49  ;;  %v1787_v49 = vld [vmem:[#allocation8 + $0xc78] sm:$0xff] }
 0x33c   : > { %v5966_v59 = vcombine.low %v1783_v48, %v1787_v49  ;;  %v1827_v37 = vld [vmem:[#allocation8 + $0xdb8] sm:$0xff] }
 0x33d   : > { %4953 = vmatpush1.bf16.msra.mxu0 %v5908_v55  ;;  %v5967_v55 = vcombine.high %v1783_v48, %v1787_v49 }
 0x33e   : > { %5125 = vmatpush1.bf16.msra.mxu1 %v5910_v56  ;;  %4954 = vmatprep.subr.bf16.mxu0 %v5917_v57  ;;  %v1791_v56 = vld [vmem:[#allocation8 + $0xc98] sm:$0xff] }
 0x33f   : > { %5126 = vmatprep.subr.bf16.mxu1 %v5919_v58  ;;  %v1795_v57 = vld [vmem:[#allocation8 + $0xcb8] sm:$0xff]  ;;  %v5964_v58 = vcombine.low %v1782_v0, %v1786_v20 }
 0x340   : > { %v5975_v61 = vcombine.high %v1791_v56, %v1795_v57 }
 0x341   : > { %4955 = vmatpush1.bf16.msra.mxu0 %v5916_v62  ;;  %v1802_v62 = vld [vmem:[#allocation8 + $0xcf0] sm:$0xff] }
 0x342   : > { %5127 = vmatpush1.bf16.msra.mxu1 %v5918_v63  ;;  %4956 = vmatprep.subr.bf16.mxu0 %v5925_v4  ;;  %v1799_v63 = vld [vmem:[#allocation8 + $0xcd8] sm:$0xff]  ;;  %v5981_v1 = vcombine.high %v1798_v23, %v1802_v62 }
 0x343   : > { %5128 = vmatprep.subr.bf16.mxu1 %v5927_v5  ;;  %v1803_v4 = vld [vmem:[#allocation8 + $0xcf8] sm:$0xff]  ;;  %v5972_v5 = vcombine.low %v1790_v52, %v1794_v53 }
 0x344   : > { %v5983_v2 = vcombine.high %v1799_v63, %v1803_v4  ;;  %v1835_v52 = vld [vmem:[#allocation8 + $0xdf8] sm:$0xff] }
 0x345   : > { %4957 = vmatpush1.bf16.msra.mxu0 %v5924_v3  ;;  %v1807_v3 = vld [vmem:[#allocation8 + $0xd18] sm:$0xff] }
 0x346   : > { %5129 = vmatpush1.bf16.msra.mxu1 %v5926_v45  ;;  %4958 = vmatprep.subr.bf16.mxu0 %v5933_v6  ;;  %v1811_v45 = vld [vmem:[#allocation8 + $0xd38] sm:$0xff]  ;;  %v5982_v6 = vcombine.low %v1799_v63, %v1803_v4 }
 0x347   : > { %5130 = vmatprep.subr.bf16.mxu1 %v5935_v9  ;;  %v5989_v9 = vcombine.high %v1806_v8, %v1810_v7  ;;  %v5991_v10 = vcombine.high %v1807_v3, %v1811_v45 }
 0x349   : > { %4959 = vmatpush1.bf16.msra.mxu0 %v5932_v19  ;;  %v1819_v19 = vld [vmem:[#allocation8 + $0xd78] sm:$0xff] }
 0x34a   : > { %5131 = vmatpush1.bf16.msra.mxu1 %v5934_v14  ;;  %4960 = vmatprep.subr.bf16.mxu0 %v5941_v15  ;;  %v5988_v14 = vcombine.low %v1806_v8, %v1810_v7  ;;  %v6896_v15 = vld [vmem:[#allocation10] sm:$0xff]  ;;  %v5999_v27 = vcombine.high %v1815_v13, %v1819_v19 }
 0x34b   : > { %5132 = vmatprep.subr.bf16.mxu1 %v5943_v16  ;;  %v5990_v16 = vcombine.low %v1807_v3, %v1811_v45  ;;  %v1909_v38 = vrot.slane %v6896_v15, %v6808_v24  ;;  %v1917_v40 = vrot.slane %v6896_v15, %v6818_v39  ;;  %v1842_v45 = vld [vmem:[#allocation8 + $0xe30] sm:$0xff] }
 0x34d   : > { %4961 = vmatpush1.bf16.msra.mxu0 %v5940_v31  ;;  %v1905_v31 = vrot.slane %v6896_v15, %v6803_v21 }
 0x34e   : > { %5133 = vmatpush1.bf16.msra.mxu1 %v5942_v32  ;;  %4962 = vmatprep.subr.bf16.mxu0 %v5949_v33  ;;  %v6904_v32 = vld [vmem:[#allocation11] sm:$0xff]  ;;  %v1913_v33 = vrot.slane %v6896_v15, %v6815_v35 }
 0x34f   : > { %5134 = vmatprep.subr.bf16.mxu1 %v5951_v36  ;;  %v1823_v36 = vld [vmem:[#allocation8 + $0xd98] sm:$0xff]  ;;  %v5211_v20 = vrot.slane %v6904_v32, %v6803_v21  ;;  %v5219_v48 = vrot.slane %v6904_v32, %v6815_v35  ;;  %v5215_v49 = vrot.slane %v6904_v32, %v6808_v24  ;;  %v6004_v21 = vcombine.low %v6898_v28, %v6900_v30 }
 0x350   : > { %v6006_v24 = vcombine.low %v1823_v36, %v1827_v37 }
 0x351   : > { %4963 = vmatpush1.bf16.msra.mxu0 %v5948_v43  ;;  %v5998_v43 = vcombine.low %v1815_v13, %v1819_v19 }
 0x352   : > { %5135 = vmatpush1.bf16.msra.mxu1 %v5950_v46  ;;  %4975 = vmatprep.subr.bf16.mxu0 %v5957_v22  ;;  %v6005_v46 = vcombine.high %v6898_v28, %v6900_v30  ;;  %v6914_v22 = vld [vmem:[#allocation8 + $0xdd0] sm:$0xff] }
 0x353   : > { %5147 = vmatprep.subr.bf16.mxu1 %v5959_v18  ;;  %v6916_v18 = vld [vmem:[#allocation8 + $0xdf0] sm:$0xff] }
 0x354   : > { %4965 = vmatmul.mubr.bf16.vlgmr.msra.gmra.mrb[12].mxu0 %v6860_v42  ;;  %v6012_v11 = vcombine.low %v6914_v22, %v6916_v18 }
 0x355   : > { %5137 = vmatmul.mubr.bf16.vlgmr.msra.gmra.mrb[12].mxu1 %v6860_v42  ;;  %4976 = vmatpush1.bf16.msra.mxu0 %v5956_v47  ;;  %v5974_v42 = vcombine.low %v1791_v56, %v1795_v57 }
 0x356   : > { %5007 = vmatprep.mubr.bf16.mxu0 %v6874_v26  ;;  %5148 = vmatpush1.bf16.msra.mxu1 %v5958_v51  ;;  %v6007_v51 = vcombine.high %v1823_v36, %v1827_v37  ;;  %v1846_v37 = vld [vmem:[#allocation8 + $0xe50] sm:$0xff] }
 0x357   : > { %5179 = vmatprep.mubr.bf16.mxu1 %v6874_v26  ;;  %4977 = vmatprep.subr.bf16.mxu0 %v5965_v44  ;;  %v5980_v26 = vcombine.low %v1798_v23, %v1802_v62  ;;  %v1831_v44 = vld [vmem:[#allocation8 + $0xdd8] sm:$0xff]  ;;  %v6013_v23 = vcombine.high %v6914_v22, %v6916_v18 }
 0x358   : > { %5149 = vmatprep.subr.bf16.mxu1 %v5967_v55  ;;  %v6014_v12 = vcombine.low %v1831_v44, %v1835_v52 }
 0x359   : > { %4978 = vmatpush1.bf16.msra.mxu0 %v5964_v58  ;;  %v5223_v58 = vrot.slane %v6904_v32, %v6818_v39  ;;  %v6015_v39 = vcombine.high %v1831_v44, %v1835_v52 }
 0x35a   : > { %5150 = vmatpush1.bf16.msra.mxu1 %v5966_v59  ;;  %4979 = vmatprep.subr.bf16.mxu0 %v5973_v60 }
 0x35b   : > { %5151 = vmatprep.subr.bf16.mxu1 %v5975_v61 }
 0x35d   : > { %4980 = vmatpush1.bf16.msra.mxu0 %v5972_v5 }
 0x35e   : > { %5152 = vmatpush1.bf16.msra.mxu1 %v5974_v42  ;;  %4981 = vmatprep.subr.bf16.mxu0 %v5981_v1  ;;  %v1838_v1 = vld [vmem:[#allocation8 + $0xe10] sm:$0xff] }
 0x35f   : > { %5153 = vmatprep.subr.bf16.mxu1 %v5983_v2 }
 0x361   : > { %4982 = vmatpush1.bf16.msra.mxu0 %v5980_v26  ;;  %v1839_v26 = vld [vmem:[#allocation8 + $0xe18] sm:$0xff] }
 0x362   : > { %5154 = vmatpush1.bf16.msra.mxu1 %v5982_v6  ;;  %4983 = vmatprep.subr.bf16.mxu0 %v5989_v9  ;;  %v1843_v6 = vld [vmem:[#allocation8 + $0xe38] sm:$0xff] }
 0x363   : > { %5155 = vmatprep.subr.bf16.mxu1 %v5991_v10  ;;  %v6023_v28 = vcombine.high %v1839_v26, %v1843_v6 }
 0x365   : > { %4984 = vmatpush1.bf16.msra.mxu0 %v5988_v14 }
 0x366   : > { %5156 = vmatpush1.bf16.msra.mxu1 %v5990_v16  ;;  %4985 = vmatprep.subr.bf16.mxu0 %v5997_v17 }
 0x367   : > { %v4665_v0 = vpop.f32.mrb[8].mxu0  ;;  %v4837_v47 = vpop.f32.mrb[8].mxu1  ;;  %5157 = vmatprep.subr.bf16.mxu1 %v5999_v27  ;;  %v6021_v27 = vcombine.high %v1838_v1, %v1842_v45 }
 0x368   : > { %v6086_v53 = vadd.f32 %v4665_v0, %v1905_v31  ;;  %v6090_v55 = vadd.f32 %v4837_v47, %v1913_v33  ;;  %v4667_v56 = vpop.f32.mrb[9].mxu0  ;;  %v4839_v57 = vpop.f32.mrb[9].mxu1 }
 0x369   : > { %v6087_v59 = vadd.f32 %v4667_v56, %v1909_v38  ;;  %v6091_v60 = vadd.f32 %v4839_v57, %v1917_v40  ;;  %v4669_v35 = vpop.f32.mrb[10].mxu0  ;;  %v4841_v61 = vpop.f32.mrb[10].mxu1  ;;  %4986 = vmatpush1.bf16.msra.mxu0 %v5996_v41  ;;  %v1847_v41 = vld [vmem:[#allocation8 + $0xe58] sm:$0xff] }
 0x36a   : > { %v5190_v62 = vmax.f32 %v6086_v53, 0.0  ;;  %v6088_v63 = vadd.f32 %v4669_v35, %v1905_v31  ;;  %v6092_v4 = vadd.f32 %v4841_v61, %v1913_v33  ;;  %5158 = vmatpush1.bf16.msra.mxu1 %v5998_v43  ;;  %v4671_v5 = vpop.f32.mrb[11].mxu0  ;;  %v4843_v42 = vpop.f32.mrb[11].mxu1  ;;  %4987 = vmatprep.subr.bf16.mxu0 %v6005_v46  ;;  %v5192_v2 = vmax.f32 %v6090_v55, 0.0  ;;  %v1851_v43 = vld [vmem:[#allocation8 + $0xe78] sm:$0xff]  ;;  %v1854_v53 = vld [vmem:[#allocation8 + $0xe90] sm:$0xff] }
 0x36b   : > { %v5191_v8 = vmax.f32 %v6087_v59, 0.0  ;;  %v6089_v7 = vadd.f32 %v4671_v5, %v1909_v38  ;;  %v6093_v3 = vadd.f32 %v4843_v42, %v1917_v40  ;;  %5159 = vmatprep.subr.bf16.mxu1 %v6007_v51  ;;  %v5193_v19 = vmax.f32 %v6091_v60, 0.0  ;;  %v1850_v38 = vld [vmem:[#allocation8 + $0xe70] sm:$0xff]  ;;  %v1855_v56 = vld [vmem:[#allocation8 + $0xe98] sm:$0xff] }
 0x36c   : > { %v5248_v9 = vmul.f32 %v5211_v20, %v5190_v62  ;;  %v5198_v10 = vmax.f32 %v6088_v63, 0.0  ;;  %v5200_v14 = vmax.f32 %v6092_v4, 0.0  ;;  %v5250_v30 = vmul.f32 %v5219_v48, %v5192_v2  ;;  %v1858_v55 = vld [vmem:[#allocation8 + $0xeb0] sm:$0xff]  ;;  %v1859_v57 = vld [vmem:[#allocation8 + $0xeb8] sm:$0xff] }
 0x36d   : > { %v5249_v13 = vmul.f32 %v5215_v49, %v5191_v8  ;;  %v5199_v16 = vmax.f32 %v6089_v7, 0.0  ;;  %4988 = vmatpush1.bf16.msra.mxu0 %v6004_v21  ;;  %v5201_v36 = vmax.f32 %v6093_v3, 0.0  ;;  %v6020_v40 = vcombine.low %v1838_v1, %v1842_v45  ;;  %v1862_v61 = vld [vmem:[#allocation8 + $0xed0] sm:$0xff]  ;;  %v1871_v1 = vld [vmem:[#allocation8 + $0xf18] sm:$0xff] }
 0x36e   : > { %v5256_v17 = vmul.f32 %v5211_v20, %v5198_v10  ;;  %5160 = vmatpush1.bf16.msra.mxu1 %v6006_v24  ;;  %4989 = vmatprep.subr.bf16.mxu0 %v6013_v23  ;;  %v5251_v46 = vmul.f32 %v5223_v58, %v5193_v19  ;;  %v5258_v18 = vmul.f32 %v5219_v48, %v5200_v14  ;;  %v1866_v24 = vld [vmem:[#allocation8 + $0xef0] sm:$0xff]  ;;  %v1867_v23 = vld [vmem:[#allocation8 + $0xef8] sm:$0xff] }
 0x36f   : > { %v5264_v31 = vadd.f32 %v5249_v13, %v5248_v9  ;;  %v5257_v33 = vmul.f32 %v5215_v49, %v5199_v16  ;;  %5161 = vmatprep.subr.bf16.mxu1 %v6015_v39  ;;  %v6022_v20 = vcombine.low %v1839_v26, %v1843_v6  ;;  %v6029_v47 = vcombine.high %v1846_v37, %v1850_v38  ;;  %v1870_v42 = vld [vmem:[#allocation8 + $0xf10] sm:$0xff]  ;;  %v1875_v2 = vld [vmem:[#allocation8 + $0xf38] sm:$0xff] }
 0x370   : > { %v5259_v44 = vmul.f32 %v5223_v58, %v5201_v36  ;;  %v6031_v52 = vcombine.high %v1847_v41, %v1851_v43  ;;  %v6028_v48 = vcombine.low %v1846_v37, %v1850_v38  ;;  %v6030_v59 = vcombine.low %v1847_v41, %v1851_v43  ;;  %v1863_v58 = vld [vmem:[#allocation8 + $0xed8] sm:$0xff]  ;;  %v1874_v39 = vld [vmem:[#allocation8 + $0xf30] sm:$0xff] }
 0x371   : > { %v5265_v22 = vadd.f32 %v5264_v31, %v5250_v30  ;;  %v5273_v0 = vadd.f32 %v5257_v33, %v5256_v17  ;;  %4990 = vmatpush1.bf16.msra.mxu0 %v6012_v11  ;;  %v6037_v60 = vcombine.high %v1854_v53, %v1858_v55  ;;  %v6039_v35 = vcombine.high %v1855_v56, %v1859_v57  ;;  %v1878_v26 = vld [vmem:[#allocation8 + $0xf50] sm:$0xff]  ;;  %v1879_v9 = vld [vmem:[#allocation8 + $0xf58] sm:$0xff] }
 0x372   : > { %5162 = vmatpush1.bf16.msra.mxu1 %v6014_v12  ;;  %4991 = vmatprep.subr.bf16.mxu0 %v6021_v27  ;;  %v6036_v62 = vcombine.low %v1854_v53, %v1858_v55  ;;  %v6038_v63 = vcombine.low %v1855_v56, %v1859_v57  ;;  %v6045_v4 = vcombine.high %v1862_v61, %v1866_v24  ;;  %v1882_v6 = vld [vmem:[#allocation8 + $0xf70] sm:$0xff]  ;;  %v1883_v10 = vld [vmem:[#allocation8 + $0xf78] sm:$0xff] }
 0x373   : > { %v6932_v51 = vadd.f32 %v5265_v22, %v5251_v46  ;;  %v5274_v49 = vadd.f32 %v5273_v0, %v5258_v18  ;;  %5163 = vmatprep.subr.bf16.mxu1 %v6023_v28  ;;  %v6047_v5 = vcombine.high %v1863_v58, %v1867_v23  ;;  %v6044_v8 = vcombine.low %v1862_v61, %v1866_v24  ;;  %v1886_v14 = vld [vmem:[#allocation8 + $0xf90] sm:$0xff]  ;;  %v1887_v17 = vld [vmem:[#allocation8 + $0xf98] sm:$0xff] }
 0x374   : > { %v6046_v7 = vcombine.low %v1863_v58, %v1867_v23  ;;  %v6053_v3 = vcombine.high %v1870_v42, %v1874_v39  ;;  %v6055_v45 = vcombine.high %v1871_v1, %v1875_v2  ;;  %v6052_v11 = vcombine.low %v1870_v42, %v1874_v39  ;;  %v1890_v16 = vld [vmem:[#allocation8 + $0xfb0] sm:$0xff]  ;;  %v1891_v27 = vld [vmem:[#allocation8 + $0xfb8] sm:$0xff] }
 0x375   : > { %v6934_v21 = vadd.f32 %v5274_v49, %v5259_v44  ;;  %4992 = vmatpush1.bf16.msra.mxu0 %v6020_v40  ;;  %v6054_v12 = vcombine.low %v1871_v1, %v1875_v2  ;;  %v6061_v13 = vcombine.high %v1878_v26, %v1882_v6  ;;  %v6063_v19 = vcombine.high %v1879_v9, %v1883_v10  ;;  %v1894_v36 = vld [vmem:[#allocation8 + $0xfd0] sm:$0xff]  ;;  %v1895_v38 = vld [vmem:[#allocation8 + $0xfd8] sm:$0xff] }
 0x376   : > { %5164 = vmatpush1.bf16.msra.mxu1 %v6022_v20  ;;  %4993 = vmatprep.subr.bf16.mxu0 %v6029_v47  ;;  %v6060_v28 = vcombine.low %v1878_v26, %v1882_v6  ;;  %v6062_v30 = vcombine.low %v1879_v9, %v1883_v10  ;;  %v6069_v31 = vcombine.high %v1886_v14, %v1890_v16  ;;  %v1898_v37 = vld [vmem:[#allocation8 + $0xff0] sm:$0xff]  ;;  %v1899_v40 = vld [vmem:[#allocation8 + $0xff8] sm:$0xff] }
 0x377   : > { %5165 = vmatprep.subr.bf16.mxu1 %v6031_v52  ;;  %v6071_v33 = vcombine.high %v1887_v17, %v1891_v27  ;;  %v6068_v41 = vcombine.low %v1886_v14, %v1890_v16  ;;  %v6070_v43 = vcombine.low %v1887_v17, %v1891_v27  ;;  %v6077_v46 = vcombine.high %v1894_v36, %v1898_v37 }
 0x378   : > { %v6079_v22 = vcombine.high %v1895_v38, %v1899_v40  ;;  %v6076_v18 = vcombine.low %v1894_v36, %v1898_v37  ;;  %v6078_v0 = vcombine.low %v1895_v38, %v1899_v40  ;;  %v1921_v20 = vrot.slane %v6896_v15, %v6845_v50 }
 0x379   : > { %4994 = vmatpush1.bf16.msra.mxu0 %v6028_v48  ;;  %v1929_v47 = vrot.slane %v6896_v15, %v6855_v29  ;;  %v1925_v44 = vrot.slane %v6896_v15, %v6848_v54  ;;  %v1933_v49 = vrot.slane %v6896_v15, %v6858_v34  ;;  %v5227_v55 = vrot.slane %v6904_v32, %v6845_v50 }
 0x37a   : > { %5166 = vmatpush1.bf16.msra.mxu1 %v6030_v59  ;;  %4995 = vmatprep.subr.bf16.mxu0 %v6037_v60  ;;  %v5231_v59 = vrot.slane %v6904_v32, %v6848_v54  ;;  %v5235_v15 = vrot.slane %v6904_v32, %v6855_v29 }
 0x37b   : > { %5167 = vmatprep.subr.bf16.mxu1 %v6039_v35 }
 0x37d   : > { %4996 = vmatpush1.bf16.msra.mxu0 %v6036_v62 }
 0x37e   : > { %5168 = vmatpush1.bf16.msra.mxu1 %v6038_v63  ;;  %4997 = vmatprep.subr.bf16.mxu0 %v6045_v4 }
 0x37f   : > { %5169 = vmatprep.subr.bf16.mxu1 %v6047_v5 }
 0x381   : > { %4998 = vmatpush1.bf16.msra.mxu0 %v6044_v8 }
 0x382   : > { %5170 = vmatpush1.bf16.msra.mxu1 %v6046_v7  ;;  %4999 = vmatprep.subr.bf16.mxu0 %v6053_v3  ;;  %v5239_v7 = vrot.slane %v6904_v32, %v6858_v34  ;;  %v5283_v32 = vstv %s5282_s9 }
 0x383   : > { %5171 = vmatprep.subr.bf16.mxu1 %v6055_v45 }
 0x385   : > { %5000 = vmatpush1.bf16.msra.mxu0 %v6052_v11 }
 0x386   : > { %5172 = vmatpush1.bf16.msra.mxu1 %v6054_v12  ;;  %5001 = vmatprep.subr.bf16.mxu0 %v6061_v13 }
 0x387   : > { %5173 = vmatprep.subr.bf16.mxu1 %v6063_v19 }
 0x389   : > { %5002 = vmatpush1.bf16.msra.mxu0 %v6060_v28 }
 0x38a   : > { %5174 = vmatpush1.bf16.msra.mxu1 %v6062_v30  ;;  %5003 = vmatprep.subr.bf16.mxu0 %v6069_v31 }
 0x38b   : > { %5175 = vmatprep.subr.bf16.mxu1 %v6071_v33 }
 0x38d   : > { %5004 = vmatpush1.bf16.msra.mxu0 %v6068_v41 }
 0x38e   : > { %5176 = vmatpush1.bf16.msra.mxu1 %v6070_v43  ;;  %5005 = vmatprep.subr.bf16.mxu0 %v6077_v46 }
 0x38f   : > { %5177 = vmatprep.subr.bf16.mxu1 %v6079_v22 }
 0x391   : > { %5006 = vmatpush1.bf16.msra.mxu0 %v6076_v18 }
 0x392   : > { %5178 = vmatpush1.bf16.msra.mxu1 %v6078_v0 }
 0x394   : > { %5008 = vmatmul.mubr.bf16.vlgmr.msra.gmra.mrb[12].mxu0 %v6872_v25 }
 0x395   : > { %5180 = vmatmul.mubr.bf16.vlgmr.msra.gmra.mrb[12].mxu1 %v6872_v25 }
 0x467   : > { %v5009_v52 = vpop.f32.mrb[12].mxu0 }
 0x468   : > { %v6094_v53 = vadd.f32 %v5009_v52, %v1921_v20  ;;  %v5181_v56 = vpop.f32.mrb[12].mxu1  ;;  %v5011_v57 = vpop.f32.mrb[13].mxu0 }
 0x469   : > { %v6098_v25 = vadd.f32 %v5181_v56, %v1929_v47  ;;  %v6095_v48 = vadd.f32 %v5011_v57, %v1925_v44  ;;  %v5183_v60 = vpop.f32.mrb[13].mxu1  ;;  %v5013_v35 = vpop.f32.mrb[14].mxu0 }
 0x46a   : > { %v5194_v61 = vmax.f32 %v6094_v53, 0.0  ;;  %v6099_v24 = vadd.f32 %v5183_v60, %v1933_v49  ;;  %v6096_v58 = vadd.f32 %v5013_v35, %v1921_v20  ;;  %v5185_v23 = vpop.f32.mrb[14].mxu1  ;;  %v5015_v62 = vpop.f32.mrb[15].mxu0 }
 0x46b   : > { %v5195_v63 = vmax.f32 %v6095_v48, 0.0  ;;  %v6100_v4 = vadd.f32 %v5185_v23, %v1929_v47  ;;  %v6097_v50 = vadd.f32 %v5015_v62, %v1925_v44  ;;  %v5187_v5 = vpop.f32.mrb[15].mxu1  ;;  %v5196_v39 = vmax.f32 %v6098_v25, 0.0 }
 0x46c   : > { %v5252_v42 = vmul.f32 %v5227_v55, %v5194_v61  ;;  %v5202_v1 = vmax.f32 %v6096_v58, 0.0  ;;  %v6101_v2 = vadd.f32 %v5187_v5, %v1933_v49  ;;  %v5197_v45 = vmax.f32 %v6099_v24, 0.0 }
 0x46d   : > { %v5253_v8 = vmul.f32 %v5231_v59, %v5195_v63  ;;  %v5203_v54 = vmax.f32 %v6097_v50, 0.0  ;;  %v5204_v6 = vmax.f32 %v6100_v4, 0.0  ;;  %v5254_v29 = vmul.f32 %v5235_v15, %v5196_v39 }
 0x46e   : > { %v5267_v3 = vadd.f32 %v6932_v51, %v5252_v42  ;;  %v5260_v26 = vmul.f32 %v5227_v55, %v5202_v1  ;;  %v5205_v11 = vmax.f32 %v6101_v2, 0.0  ;;  %v5255_v14 = vmul.f32 %v5239_v7, %v5197_v45 }
 0x46f   : > { %v5261_v9 = vmul.f32 %v5231_v59, %v5203_v54  ;;  %v5262_v13 = vmul.f32 %v5235_v15, %v5204_v6 }
 0x470   : > { %v5276_v10 = vadd.f32 %v6934_v21, %v5260_v26  ;;  %v5268_v12 = vadd.f32 %v5267_v3, %v5253_v8  ;;  %v5263_v17 = vmul.f32 %v5239_v7, %v5205_v11 }
 0x472   : > { %v5277_v19 = vadd.f32 %v5276_v10, %v5261_v9  ;;  %v5269_v16 = vadd.f32 %v5268_v12, %v5254_v29 }
 0x474   : > { %v5270_v27 = vadd.f32 %v5269_v16, %v5255_v14  ;;  %v5278_v28 = vadd.f32 %v5277_v19, %v5262_v13 }
 0x476   : > { %5271 = vadd.xlane.f32.xlu0 %v5270_v27  ;;  %v5279_v34 = vadd.f32 %v5278_v28, %v5263_v17 }
 0x47a   : > { %5280 = vadd.xlane.f32.xlu0 %v5279_v34 }
 0x503   : > { %v5272_v51 = vpop.xlane.xlu0 %5271 }
 0x504   : > { %v5284_v30 = vadd.f32 %v5283_v32, %v5272_v51 }
 0x506   : > { %v6080_v31 = vmul.f32 -1.442695, %v5284_v30 }
 0x507   : > { %v5281_v33 = vpop.xlane.xlu0 %5280 }
 0x508   : > { %6247 = vpow2.f32 %v6080_v31  ;;  %v5285_v21 = vadd.f32 %v5283_v32, %v5281_v33 }
 0x50a   : > { %v6081_v36 = vmul.f32 -1.442695, %v5285_v21 }
 0x50c   : > { %6249 = vpow2.f32 %v6081_v36 }
 0x512   : > { %v6248_v37 = vpop.eup %6247 }
 0x513   : > { %v5292_v38 = vadd.f32 1.0, %v6248_v37 }
 0x515   : > { %6251 = vrcp.f32 %v5292_v38 }
 0x516   : > { %v6250_v40 = vpop.eup %6249 }
 0x517   : > { %v5293_v41 = vadd.f32 1.0, %v6250_v40 }
 0x519   : > { %6253 = vrcp.f32 %v5293_v41 }
 0x51f   : > { %v6252_v43 = vpop.eup %6251 }
 0x520   : > { %5299 = vst.msk [vmem:[%s368_s17] sm:$0xff] %vm5298_vm0, %v6252_v43 }
 0x523   : > { %v6254_v46 = vpop.eup %6253 }
 0x524   : > { %5300 = vst.msk [vmem:[%s368_s17 + $0x8] sm:$0xff] %vm5298_vm0, %v6254_v46 }
 0x525 PF: > { %p21_p5 = scmp.ge.s32.totalorder %s6685_s21, 4   ;;  %s6994_s26 = smov %s6463_s27 }
 0x526   : > { %s6995_s27 = smov %s6467_s28  ;;  %s6996_s28 = smov %s6696_s15 }
 0x527   : > { %s6997_s29 = smov %s6685_s21  ;;  %23 = sbr.rel (!%p21_p5) target bundleno = 8 (0x8), region = 108 }
 0x52e   :  { %5323 = vsyncpa [#allocation4], 1 }
 0x52f   :  { %5325 = vsyncpa [#allocation4 + $0x1], 1 }
 0x530   :  { %5326 = vsyncpa [#allocation6], 1 }
 0x531   :  { %5327 = vsyncpa [#allocation9], 1 }
 0x532   :  { %5328 = vsyncpa [#allocation12], 1 }

</bundles_post_ra>
